<compile_context>
chip_gen: v6e
topology: v6e:2x2x1
jax: 0.10.0
libtpu: 0.0.40
codegen_flags: <defaults>
</compile_context>

<pallas_src>
import numpy as np
import jax
import jax.numpy as jnp
from jax import lax
from jax.experimental import pallas as pl
from jax.experimental.pallas import tpu as pltpu

K = 5          # kernel size of every layer in Autoencoder2
PAD = K - 1    # halo of a stride-1 ConvTranspose2d


# ------------------------------- fused kernel --------------------------------
def _make_kernel(H, W):
    FF = H * W                      # flattened spatial frame == lane dimension
    border = PAD * W + PAD          # largest |tap shift| within the frame

    def _layer(src, w_ref, b_ref, patch_ref, *, deconv, mask=None, final=False):
        """One Conv2d / ConvTranspose2d (stride 1) + bias + ReLU (+ Sigmoid).

        src : (Cin, FF) f32 value; valid data anchored at rows/cols [0,h)x[0,w) of
              the HxW frame, exactly zero outside that square.
        out : (Cout, FF) f32 value in the same frame layout.
        """
        cin = src.shape[0]
        kkc = K * K * cin
        base = -border if deconv else 0

        # Zero ONLY the border strip the tap writes below do not cover
        # (deconv: out-of-frame taps at the front; conv: lane tail).
        if deconv:
            patch_ref[0:kkc, 0:border] = jnp.zeros((kkc, border), jnp.float32)
        else:
            patch_ref[0:kkc, FF - border:FF] = jnp.zeros((kkc, border), jnp.float32)

        # Transposed im2col: patch[(dy*K+dx)*cin + ci, p] = src[ci, p + base + dy*W + dx]
        # One full-lane-width copy per tap; tap index sits on the sublane axis, so the
        # destination lane offset is 0 (or |shift|) -- no per-channel lane-shifted
        # masked stores like the old NHWC patch layout.
        for dy in range(K):
            for dx in range(K):
                s = base + dy * W + dx
                r0 = (dy * K + dx) * cin
                if s >= 0:
                    patch_ref[r0:r0 + cin, 0:FF - s] = src[:, s:FF]
                else:
                    patch_ref[r0:r0 + cin, -s:FF] = src[:, 0:FF + s]

        # One lane-dense MXU matmul per layer: (Cout, KKC) x (KKC, FF) -> (Cout, FF).
        # v6e/v7x option: cast both operands to bf16 here (keep f32 accumulate);
        # left in f32 so the result matches the f32 reference to ~1e-5.
        z = jnp.dot(w_ref[...], patch_ref[0:kkc, :],
                    preferred_element_type=jnp.float32)
        y = jnp.maximum(z + b_ref[...], 0.0)                 # bias + ReLU
        if final:
            y = 1.0 / (1.0 + jnp.exp(-y))                    # Sigmoid(ReLU(x))
        if mask is not None:                                 # zero outside valid square
            y = jnp.where(mask != 0.0, y, 0.0)               # (select: no garbage leaks)
        return y

    def kernel(x_ref, m12_ref, m8_ref,
               w1_ref, b1_ref, w2_ref, b2_ref, w3_ref, b3_ref, w4_ref, b4_ref,
               o_ref, patch_ref):
        m12 = m12_ref[...]                                   # keep rows/cols < 12
        m8 = m8_ref[...]                                     # keep rows/cols <  8
        x = x_ref[0]                                         # (3, FF) one image
        a1 = _layer(x, w1_ref, b1_ref, patch_ref, deconv=False, mask=m12)    # 16 -> 12
        a2 = _layer(a1, w2_ref, b2_ref, patch_ref, deconv=False, mask=m8)    # 12 ->  8
        a3 = _layer(a2, w3_ref, b3_ref, patch_ref, deconv=True,  mask=m12)   #  8 -> 12
        a4 = _layer(a3, w4_ref, b4_ref, patch_ref, deconv=True,  final=True) # 12 -> 16
        o_ref[0] = a4                                        # lane-dense output store

    return kernel


# ------------------------------- host wrapper ---------------------------------
def _square_mask(h, w, H, W):
    m = np.zeros((H, W), np.float32)
    m[:h, :w] = 1.0
    return jnp.asarray(m.reshape(1, H * W))


@jax.jit
def autoencoder2_forward(x_nchw, p):
    n, cin, H, W = x_nchw.shape
    assert cin == 3
    FF = H * W
    hv1, wv1 = H - PAD, W - PAD          # conv1 / deconv1 valid extent (12x12)
    hv2, wv2 = hv1 - PAD, wv1 - PAD      # conv2 valid extent (8x8)

    x_flat = x_nchw.astype(jnp.float32).reshape(n, cin, FF)  # pure reshape, no transpose
    m12 = _square_mask(hv1, wv1, H, W)
    m8 = _square_mask(hv2, wv2, H, W)

    def _fixed(shape):
        nd = len(shape)
        return pl.BlockSpec(shape, lambda i, _nd=nd: (0,) * _nd)

    out_flat = pl.pallas_call(
        _make_kernel(H, W),
        out_shape=jax.ShapeDtypeStruct((n, 3, FF), jnp.float32),
        grid=(n,),                                           # one image per grid step
        in_specs=[
            pl.BlockSpec((1, 3, FF), lambda i: (i, 0, 0)),   # x
            _fixed((1, FF)),                                 # mask 12x12
            _fixed((1, FF)),                                 # mask  8x8
            _fixed(p["w1"].shape), _fixed(p["b1"].shape),
            _fixed(p["w2"].shape), _fixed(p["b2"].shape),
            _fixed(p["w3"].shape), _fixed(p["b3"].shape),
            _fixed(p["w4"].shape), _fixed(p["b4"].shape),
        ],
        out_specs=pl.BlockSpec((1, 3, FF), lambda i: (i, 0, 0)),
        scratch_shapes=[pltpu.VMEM((K * K * 16, FF), jnp.float32)],  # shared im2col patch
        compiler_params=pltpu.CompilerParams(
            dimension_semantics=("parallel",)),              # 2 TCs on v7x megacore
    )(x_flat, m12, m8,
      p["w1"], p["b1"], p["w2"], p["b2"], p["w3"], p["b3"], p["w4"], p["b4"])

    return out_flat.reshape(n, 3, H, W)                      # NCHW, no transpose needed


# ----------------------------- parameter handling ------------------------------
def _pack_conv_w(w):
    """PyTorch Conv2d weight (O, I, K, K) -> (O, K*K*I), rows ordered (dy, dx, ci)."""
    o, i = w.shape[0], w.shape[1]
    return jnp.transpose(w, (0, 2, 3, 1)).reshape(o, K * K * i)


def _pack_deconv_w(w):
    """PyTorch ConvTranspose2d weight (I, O, K, K) -> equivalent correlation weight
    (O, K*K*I): spatially flipped, rows ordered (dy, dx, ci)."""
    i, o = w.shape[0], w.shape[1]
    wf = w[:, :, ::-1, ::-1]
    return jnp.transpose(wf, (1, 2, 3, 0)).reshape(o, K * K * i)


def pack_params(tp):
    return dict(
        w1=_pack_conv_w(tp["w1"]),   b1=tp["b1"].reshape(-1, 1),
        w2=_pack_conv_w(tp["w2"]),   b2=tp["b2"].reshape(-1, 1),
        w3=_pack_deconv_w(tp["w3"]), b3=tp["b3"].reshape(-1, 1),
        w4=_pack_deconv_w(tp["w4"]), b4=tp["b4"].reshape(-1, 1),
    )


def init_params(key):
    """Deterministic init mirroring the PyTorch layer shapes (uniform +-1/sqrt(fan_in))."""
    ks = jax.random.split(key, 8)

    def u(k, shape, fan_in):
        bound = 1.0 / np.sqrt(fan_in)
        return jax.random.uniform(k, shape, jnp.float32, -bound, bound)

    # encoder: Conv2d weights are (O, I, K, K)
    w1 = u(ks[0], (6, 3, K, K), 3 * K * K);   b1 = u(ks[1], (6,), 3 * K * K)
    w2 = u(ks[2], (16, 6, K, K), 6 * K * K);  b2 = u(ks[3], (16,), 6 * K * K)
    # decoder: ConvTranspose2d weights are (I, O, K, K)
    w3 = u(ks[4], (16, 6, K, K), 6 * K * K);  b3 = u(ks[5], (6,), 6 * K * K)
    w4 = u(ks[6], (6, 3, K, K), 3 * K * K);   b4 = u(ks[7], (3,), 3 * K * K)
    return dict(w1=w1, b1=b1, w2=w2, b2=b2, w3=w3, b3=b3, w4=w4, b4=b4)


# ----------------------------- pure-JAX reference ------------------------------
def _ref_forward(x_nchw, tp):
    dn = ("NCHW", "OIHW", "NCHW")

    def conv(x, w, b):
        y = lax.conv_general_dilated(x, w, (1, 1), "VALID", dimension_numbers=dn)
        return jnp.maximum(y + b.reshape(1, -1, 1, 1), 0.0)

    def deconv(x, w, b):
        w_eq = jnp.transpose(w[:, :, ::-1, ::-1], (1, 0, 2, 3))  # (O, I, K, K)
        y = lax.conv_general_dilated(x, w_eq, (1, 1),
                                     [(PAD, PAD), (PAD, PAD)], dimension_numbers=dn)
        return jnp.maximum(y + b.reshape(1, -1, 1, 1), 0.0)

    x = conv(x_nchw.astype(jnp.float32), tp["w1"], tp["b1"])
    x = conv(x, tp["w2"], tp["b2"])
    x = deconv(x, tp["w3"], tp["b3"])
    x = deconv(x, tp["w4"], tp["b4"])
    return jax.nn.sigmoid(x)    # Sigmoid(ReLU(.)) -- matches the PyTorch module


# ------------------------------------ main -------------------------------------
if __name__ == "__main__":
    key = jax.random.PRNGKey(0)
    k_x, k_p = jax.random.split(key)

    x = jax.random.normal(k_x, (2, 3, 16, 16), dtype=jnp.float32)   # NCHW, batch=2
    torch_params = init_params(k_p)
    params = pack_params(torch_params)

    out = jax.block_until_ready(autoencoder2_forward(x, params))
    assert out.shape == (2, 3, 16, 16) and out.dtype == jnp.float32

    ref = jax.block_until_ready(_ref_forward(x, torch_params))
    np.testing.assert_allclose(np.asarray(out), np.asarray(ref), rtol=1e-4, atol=1e-4)

    print("KERNEL_OK")
</pallas_src>

<mosaic_0001>
module attributes {stable_mosaic.version = 11 : i64} {
  func.func @kernel(%arg0: i32, %arg1: memref<1x3x256xf32, #tpu.memory_space<vmem>>, %arg2: memref<1x256xf32, #tpu.memory_space<vmem>>, %arg3: memref<1x256xf32, #tpu.memory_space<vmem>>, %arg4: memref<6x75xf32, #tpu.memory_space<vmem>>, %arg5: memref<6x1xf32, #tpu.memory_space<vmem>>, %arg6: memref<16x150xf32, #tpu.memory_space<vmem>>, %arg7: memref<16x1xf32, #tpu.memory_space<vmem>>, %arg8: memref<6x400xf32, #tpu.memory_space<vmem>>, %arg9: memref<6x1xf32, #tpu.memory_space<vmem>>, %arg10: memref<3x150xf32, #tpu.memory_space<vmem>>, %arg11: memref<3x1xf32, #tpu.memory_space<vmem>>, %arg12: memref<1x3x256xf32, #tpu.memory_space<vmem>>, %arg13: memref<400x256xf32, #tpu.memory_space<vmem>>) attributes {dimension_semantics = [#tpu.dimension_semantics<parallel>], iteration_bounds = array<i64: 2>, scalar_prefetch = 0 : i64, scratch_operands = 1 : i64, tpu.core_type = #tpu.core_type<tc>, window_params = [{transform_indices = @transform_0, window_bounds = array<i64: 1, 3, 256>}, {pipeline_mode = #tpu.pipeline_mode<synchronous>, transform_indices = @transform_1, window_bounds = array<i64: 1, 256>}, {pipeline_mode = #tpu.pipeline_mode<synchronous>, transform_indices = @transform_2, window_bounds = array<i64: 1, 256>}, {pipeline_mode = #tpu.pipeline_mode<synchronous>, transform_indices = @transform_3, window_bounds = array<i64: 6, 75>}, {pipeline_mode = #tpu.pipeline_mode<synchronous>, transform_indices = @transform_4, window_bounds = array<i64: 6, 1>}, {pipeline_mode = #tpu.pipeline_mode<synchronous>, transform_indices = @transform_5, window_bounds = array<i64: 16, 150>}, {pipeline_mode = #tpu.pipeline_mode<synchronous>, transform_indices = @transform_6, window_bounds = array<i64: 16, 1>}, {pipeline_mode = #tpu.pipeline_mode<synchronous>, transform_indices = @transform_7, window_bounds = array<i64: 6, 400>}, {pipeline_mode = #tpu.pipeline_mode<synchronous>, transform_indices = @transform_8, window_bounds = array<i64: 6, 1>}, {pipeline_mode = #tpu.pipeline_mode<synchronous>, transform_indices = @transform_9, window_bounds = array<i64: 3, 150>}, {pipeline_mode = #tpu.pipeline_mode<synchronous>, transform_indices = @transform_10, window_bounds = array<i64: 3, 1>}, {transform_indices = @transform_11, window_bounds = array<i64: 1, 3, 256>}]} {
    %c0 = arith.constant 0 : index
    %c0_0 = arith.constant 0 : index
    %0 = vector.load %arg2[%c0, %c0_0] : memref<1x256xf32, #tpu.memory_space<vmem>>, vector<1x256xf32>
    %c0_1 = arith.constant 0 : index
    %c0_2 = arith.constant 0 : index
    %1 = vector.load %arg3[%c0_1, %c0_2] : memref<1x256xf32, #tpu.memory_space<vmem>>, vector<1x256xf32>
    %c0_3 = arith.constant 0 : index
    %c0_4 = arith.constant 0 : index
    %c0_5 = arith.constant 0 : index
    %2 = vector.load %arg1[%c0_3, %c0_4, %c0_5] : memref<1x3x256xf32, #tpu.memory_space<vmem>>, vector<1x3x256xf32>
    %3 = vector.shape_cast %2 : vector<1x3x256xf32> to vector<3x256xf32>
    %cst = arith.constant 0.000000e+00 : f32
    %4 = vector.broadcast %cst : f32 to vector<75x68xf32>
    %c0_6 = arith.constant 0 : index
    %c188 = arith.constant 188 : index
    %5 = vector.load %arg13[%c0_6, %c188] : memref<400x256xf32, #tpu.memory_space<vmem>>, vector<75x68xf32>
    tpu.vector_store %arg13[%c0_6, %c188], %4 {strides = array<i32>} : memref<400x256xf32, #tpu.memory_space<vmem>>, vector<75x68xf32>,
    %c0_7 = arith.constant 0 : index
    %c0_8 = arith.constant 0 : index
    %6 = vector.load %arg13[%c0_7, %c0_8] : memref<400x256xf32, #tpu.memory_space<vmem>>, vector<3x256xf32>
    tpu.vector_store %arg13[%c0_7, %c0_8], %3 {strides = array<i32>} : memref<400x256xf32, #tpu.memory_space<vmem>>, vector<3x256xf32>,
    %7 = vector.extract_strided_slice %3 {offsets = [0, 1], sizes = [3, 255], strides = [1, 1]} : vector<3x256xf32> to vector<3x255xf32>
    %c3 = arith.constant 3 : index
    %c0_9 = arith.constant 0 : index
    %8 = vector.load %arg13[%c3, %c0_9] : memref<400x256xf32, #tpu.memory_space<vmem>>, vector<3x255xf32>
    tpu.vector_store %arg13[%c3, %c0_9], %7 {strides = array<i32>} : memref<400x256xf32, #tpu.memory_space<vmem>>, vector<3x255xf32>,
    %9 = vector.extract_strided_slice %3 {offsets = [0, 2], sizes = [3, 254], strides = [1, 1]} : vector<3x256xf32> to vector<3x254xf32>
    %c6 = arith.constant 6 : index
    %c0_10 = arith.constant 0 : index
    %10 = vector.load %arg13[%c6, %c0_10] : memref<400x256xf32, #tpu.memory_space<vmem>>, vector<3x254xf32>
    tpu.vector_store %arg13[%c6, %c0_10], %9 {strides = array<i32>} : memref<400x256xf32, #tpu.memory_space<vmem>>, vector<3x254xf32>,
    %11 = vector.extract_strided_slice %3 {offsets = [0, 3], sizes = [3, 253], strides = [1, 1]} : vector<3x256xf32> to vector<3x253xf32>
    %c9 = arith.constant 9 : index
    %c0_11 = arith.constant 0 : index
    %12 = vector.load %arg13[%c9, %c0_11] : memref<400x256xf32, #tpu.memory_space<vmem>>, vector<3x253xf32>
    tpu.vector_store %arg13[%c9, %c0_11], %11 {strides = array<i32>} : memref<400x256xf32, #tpu.memory_space<vmem>>, vector<3x253xf32>,
    %13 = vector.extract_strided_slice %3 {offsets = [0, 4], sizes = [3, 252], strides = [1, 1]} : vector<3x256xf32> to vector<3x252xf32>
    %c12 = arith.constant 12 : index
    %c0_12 = arith.constant 0 : index
    %14 = vector.load %arg13[%c12, %c0_12] : memref<400x256xf32, #tpu.memory_space<vmem>>, vector<3x252xf32>
    tpu.vector_store %arg13[%c12, %c0_12], %13 {strides = array<i32>} : memref<400x256xf32, #tpu.memory_space<vmem>>, vector<3x252xf32>,
    %15 = vector.extract_strided_slice %3 {offsets = [0, 16], sizes = [3, 240], strides = [1, 1]} : vector<3x256xf32> to vector<3x240xf32>
    %c15 = arith.constant 15 : index
    %c0_13 = arith.constant 0 : index
    %16 = vector.load %arg13[%c15, %c0_13] : memref<400x256xf32, #tpu.memory_space<vmem>>, vector<3x240xf32>
    tpu.vector_store %arg13[%c15, %c0_13], %15 {strides = array<i32>} : memref<400x256xf32, #tpu.memory_space<vmem>>, vector<3x240xf32>,
    %17 = vector.extract_strided_slice %3 {offsets = [0, 17], sizes = [3, 239], strides = [1, 1]} : vector<3x256xf32> to vector<3x239xf32>
    %c18 = arith.constant 18 : index
    %c0_14 = arith.constant 0 : index
    %18 = vector.load %arg13[%c18, %c0_14] : memref<400x256xf32, #tpu.memory_space<vmem>>, vector<3x239xf32>
    tpu.vector_store %arg13[%c18, %c0_14], %17 {strides = array<i32>} : memref<400x256xf32, #tpu.memory_space<vmem>>, vector<3x239xf32>,
    %19 = vector.extract_strided_slice %3 {offsets = [0, 18], sizes = [3, 238], strides = [1, 1]} : vector<3x256xf32> to vector<3x238xf32>
    %c21 = arith.constant 21 : index
    %c0_15 = arith.constant 0 : index
    %20 = vector.load %arg13[%c21, %c0_15] : memref<400x256xf32, #tpu.memory_space<vmem>>, vector<3x238xf32>
    tpu.vector_store %arg13[%c21, %c0_15], %19 {strides = array<i32>} : memref<400x256xf32, #tpu.memory_space<vmem>>, vector<3x238xf32>,
    %21 = vector.extract_strided_slice %3 {offsets = [0, 19], sizes = [3, 237], strides = [1, 1]} : vector<3x256xf32> to vector<3x237xf32>
    %c24 = arith.constant 24 : index
    %c0_16 = arith.constant 0 : index
    %22 = vector.load %arg13[%c24, %c0_16] : memref<400x256xf32, #tpu.memory_space<vmem>>, vector<3x237xf32>
    tpu.vector_store %arg13[%c24, %c0_16], %21 {strides = array<i32>} : memref<400x256xf32, #tpu.memory_space<vmem>>, vector<3x237xf32>,
    %23 = vector.extract_strided_slice %3 {offsets = [0, 20], sizes = [3, 236], strides = [1, 1]} : vector<3x256xf32> to vector<3x236xf32>
    %c27 = arith.constant 27 : index
    %c0_17 = arith.constant 0 : index
    %24 = vector.load %arg13[%c27, %c0_17] : memref<400x256xf32, #tpu.memory_space<vmem>>, vector<3x236xf32>
    tpu.vector_store %arg13[%c27, %c0_17], %23 {strides = array<i32>} : memref<400x256xf32, #tpu.memory_space<vmem>>, vector<3x236xf32>,
    %25 = vector.extract_strided_slice %3 {offsets = [0, 32], sizes = [3, 224], strides = [1, 1]} : vector<3x256xf32> to vector<3x224xf32>
    %c30 = arith.constant 30 : index
    %c0_18 = arith.constant 0 : index
    %26 = vector.load %arg13[%c30, %c0_18] : memref<400x256xf32, #tpu.memory_space<vmem>>, vector<3x224xf32>
    tpu.vector_store %arg13[%c30, %c0_18], %25 {strides = array<i32>} : memref<400x256xf32, #tpu.memory_space<vmem>>, vector<3x224xf32>,
    %27 = vector.extract_strided_slice %3 {offsets = [0, 33], sizes = [3, 223], strides = [1, 1]} : vector<3x256xf32> to vector<3x223xf32>
    %c33 = arith.constant 33 : index
    %c0_19 = arith.constant 0 : index
    %28 = vector.load %arg13[%c33, %c0_19] : memref<400x256xf32, #tpu.memory_space<vmem>>, vector<3x223xf32>
    tpu.vector_store %arg13[%c33, %c0_19], %27 {strides = array<i32>} : memref<400x256xf32, #tpu.memory_space<vmem>>, vector<3x223xf32>,
    %29 = vector.extract_strided_slice %3 {offsets = [0, 34], sizes = [3, 222], strides = [1, 1]} : vector<3x256xf32> to vector<3x222xf32>
    %c36 = arith.constant 36 : index
    %c0_20 = arith.constant 0 : index
    %30 = vector.load %arg13[%c36, %c0_20] : memref<400x256xf32, #tpu.memory_space<vmem>>, vector<3x222xf32>
    tpu.vector_store %arg13[%c36, %c0_20], %29 {strides = array<i32>} : memref<400x256xf32, #tpu.memory_space<vmem>>, vector<3x222xf32>,
    %31 = vector.extract_strided_slice %3 {offsets = [0, 35], sizes = [3, 221], strides = [1, 1]} : vector<3x256xf32> to vector<3x221xf32>
    %c39 = arith.constant 39 : index
    %c0_21 = arith.constant 0 : index
    %32 = vector.load %arg13[%c39, %c0_21] : memref<400x256xf32, #tpu.memory_space<vmem>>, vector<3x221xf32>
    tpu.vector_store %arg13[%c39, %c0_21], %31 {strides = array<i32>} : memref<400x256xf32, #tpu.memory_space<vmem>>, vector<3x221xf32>,
    %33 = vector.extract_strided_slice %3 {offsets = [0, 36], sizes = [3, 220], strides = [1, 1]} : vector<3x256xf32> to vector<3x220xf32>
    %c42 = arith.constant 42 : index
    %c0_22 = arith.constant 0 : index
    %34 = vector.load %arg13[%c42, %c0_22] : memref<400x256xf32, #tpu.memory_space<vmem>>, vector<3x220xf32>
    tpu.vector_store %arg13[%c42, %c0_22], %33 {strides = array<i32>} : memref<400x256xf32, #tpu.memory_space<vmem>>, vector<3x220xf32>,
    %35 = vector.extract_strided_slice %3 {offsets = [0, 48], sizes = [3, 208], strides = [1, 1]} : vector<3x256xf32> to vector<3x208xf32>
    %c45 = arith.constant 45 : index
    %c0_23 = arith.constant 0 : index
    %36 = vector.load %arg13[%c45, %c0_23] : memref<400x256xf32, #tpu.memory_space<vmem>>, vector<3x208xf32>
    tpu.vector_store %arg13[%c45, %c0_23], %35 {strides = array<i32>} : memref<400x256xf32, #tpu.memory_space<vmem>>, vector<3x208xf32>,
    %37 = vector.extract_strided_slice %3 {offsets = [0, 49], sizes = [3, 207], strides = [1, 1]} : vector<3x256xf32> to vector<3x207xf32>
    %c48 = arith.constant 48 : index
    %c0_24 = arith.constant 0 : index
    %38 = vector.load %arg13[%c48, %c0_24] : memref<400x256xf32, #tpu.memory_space<vmem>>, vector<3x207xf32>
    tpu.vector_store %arg13[%c48, %c0_24], %37 {strides = array<i32>} : memref<400x256xf32, #tpu.memory_space<vmem>>, vector<3x207xf32>,
    %39 = vector.extract_strided_slice %3 {offsets = [0, 50], sizes = [3, 206], strides = [1, 1]} : vector<3x256xf32> to vector<3x206xf32>
    %c51 = arith.constant 51 : index
    %c0_25 = arith.constant 0 : index
    %40 = vector.load %arg13[%c51, %c0_25] : memref<400x256xf32, #tpu.memory_space<vmem>>, vector<3x206xf32>
    tpu.vector_store %arg13[%c51, %c0_25], %39 {strides = array<i32>} : memref<400x256xf32, #tpu.memory_space<vmem>>, vector<3x206xf32>,
    %41 = vector.extract_strided_slice %3 {offsets = [0, 51], sizes = [3, 205], strides = [1, 1]} : vector<3x256xf32> to vector<3x205xf32>
    %c54 = arith.constant 54 : index
    %c0_26 = arith.constant 0 : index
    %42 = vector.load %arg13[%c54, %c0_26] : memref<400x256xf32, #tpu.memory_space<vmem>>, vector<3x205xf32>
    tpu.vector_store %arg13[%c54, %c0_26], %41 {strides = array<i32>} : memref<400x256xf32, #tpu.memory_space<vmem>>, vector<3x205xf32>,
    %43 = vector.extract_strided_slice %3 {offsets = [0, 52], sizes = [3, 204], strides = [1, 1]} : vector<3x256xf32> to vector<3x204xf32>
    %c57 = arith.constant 57 : index
    %c0_27 = arith.constant 0 : index
    %44 = vector.load %arg13[%c57, %c0_27] : memref<400x256xf32, #tpu.memory_space<vmem>>, vector<3x204xf32>
    tpu.vector_store %arg13[%c57, %c0_27], %43 {strides = array<i32>} : memref<400x256xf32, #tpu.memory_space<vmem>>, vector<3x204xf32>,
    %45 = vector.extract_strided_slice %3 {offsets = [0, 64], sizes = [3, 192], strides = [1, 1]} : vector<3x256xf32> to vector<3x192xf32>
    %c60 = arith.constant 60 : index
    %c0_28 = arith.constant 0 : index
    %46 = vector.load %arg13[%c60, %c0_28] : memref<400x256xf32, #tpu.memory_space<vmem>>, vector<3x192xf32>
    tpu.vector_store %arg13[%c60, %c0_28], %45 {strides = array<i32>} : memref<400x256xf32, #tpu.memory_space<vmem>>, vector<3x192xf32>,
    %47 = vector.extract_strided_slice %3 {offsets = [0, 65], sizes = [3, 191], strides = [1, 1]} : vector<3x256xf32> to vector<3x191xf32>
    %c63 = arith.constant 63 : index
    %c0_29 = arith.constant 0 : index
    %48 = vector.load %arg13[%c63, %c0_29] : memref<400x256xf32, #tpu.memory_space<vmem>>, vector<3x191xf32>
    tpu.vector_store %arg13[%c63, %c0_29], %47 {strides = array<i32>} : memref<400x256xf32, #tpu.memory_space<vmem>>, vector<3x191xf32>,
    %49 = vector.extract_strided_slice %3 {offsets = [0, 66], sizes = [3, 190], strides = [1, 1]} : vector<3x256xf32> to vector<3x190xf32>
    %c66 = arith.constant 66 : index
    %c0_30 = arith.constant 0 : index
    %50 = vector.load %arg13[%c66, %c0_30] : memref<400x256xf32, #tpu.memory_space<vmem>>, vector<3x190xf32>
    tpu.vector_store %arg13[%c66, %c0_30], %49 {strides = array<i32>} : memref<400x256xf32, #tpu.memory_space<vmem>>, vector<3x190xf32>,
    %51 = vector.extract_strided_slice %3 {offsets = [0, 67], sizes = [3, 189], strides = [1, 1]} : vector<3x256xf32> to vector<3x189xf32>
    %c69 = arith.constant 69 : index
    %c0_31 = arith.constant 0 : index
    %52 = vector.load %arg13[%c69, %c0_31] : memref<400x256xf32, #tpu.memory_space<vmem>>, vector<3x189xf32>
    tpu.vector_store %arg13[%c69, %c0_31], %51 {strides = array<i32>} : memref<400x256xf32, #tpu.memory_space<vmem>>, vector<3x189xf32>,
    %53 = vector.extract_strided_slice %3 {offsets = [0, 68], sizes = [3, 188], strides = [1, 1]} : vector<3x256xf32> to vector<3x188xf32>
    %c72 = arith.constant 72 : index
    %c0_32 = arith.constant 0 : index
    %54 = vector.load %arg13[%c72, %c0_32] : memref<400x256xf32, #tpu.memory_space<vmem>>, vector<3x188xf32>
    tpu.vector_store %arg13[%c72, %c0_32], %53 {strides = array<i32>} : memref<400x256xf32, #tpu.memory_space<vmem>>, vector<3x188xf32>,
    %c0_33 = arith.constant 0 : index
    %c0_34 = arith.constant 0 : index
    %55 = vector.load %arg4[%c0_33, %c0_34] : memref<6x75xf32, #tpu.memory_space<vmem>>, vector<6x75xf32>
    %c0_35 = arith.constant 0 : index
    %c0_36 = arith.constant 0 : index
    %56 = vector.load %arg13[%c0_35, %c0_36] : memref<400x256xf32, #tpu.memory_space<vmem>>, vector<75x256xf32>
    %cst_37 = arith.constant dense<0.000000e+00> : vector<6x256xf32>
    %57 = tpu.matmul %55, %56, %cst_37 {dimension_numbers = #tpu.dot_dimension_numbers<[1], [0], [0], [1], [0, 0, 1, 1], [], []>} : vector<6x75xf32>, vector<75x256xf32>, vector<6x256xf32> -> vector<6x256xf32>
    %c0_38 = arith.constant 0 : index
    %c0_39 = arith.constant 0 : index
    %58 = vector.load %arg5[%c0_38, %c0_39] : memref<6x1xf32, #tpu.memory_space<vmem>>, vector<6x1xf32>
    %59 = vector.broadcast %58 : vector<6x1xf32> to vector<6x256xf32>
    %60 = arith.addf %57, %59 : vector<6x256xf32>
    %cst_40 = arith.constant 0.000000e+00 : f32
    %61 = vector.broadcast %cst_40 : f32 to vector<6x256xf32>
    %62 = arith.maximumf %60, %61 : vector<6x256xf32>
    %cst_41 = arith.constant 0.000000e+00 : f32
    %63 = vector.broadcast %cst_41 : f32 to vector<1x256xf32>
    %64 = arith.cmpf one, %0, %63 : vector<1x256xf32>
    %cst_42 = arith.constant 0.000000e+00 : f32
    %65 = vector.shape_cast %64 : vector<1x256xi1> to vector<1x256xi1>
    %66 = vector.broadcast %65 : vector<1x256xi1> to vector<6x256xi1>
    %67 = vector.broadcast %cst_42 : f32 to vector<6x256xf32>
    %68 = arith.select %66, %62, %67 : vector<6x256xi1>, vector<6x256xf32>
    %cst_43 = arith.constant 0.000000e+00 : f32
    %69 = vector.broadcast %cst_43 : f32 to vector<150x68xf32>
    %c0_44 = arith.constant 0 : index
    %c188_45 = arith.constant 188 : index
    %70 = vector.load %arg13[%c0_44, %c188_45] : memref<400x256xf32, #tpu.memory_space<vmem>>, vector<150x68xf32>
    tpu.vector_store %arg13[%c0_44, %c188_45], %69 {strides = array<i32>} : memref<400x256xf32, #tpu.memory_space<vmem>>, vector<150x68xf32>,
    %c0_46 = arith.constant 0 : index
    %c0_47 = arith.constant 0 : index
    %71 = vector.load %arg13[%c0_46, %c0_47] : memref<400x256xf32, #tpu.memory_space<vmem>>, vector<6x256xf32>
    tpu.vector_store %arg13[%c0_46, %c0_47], %68 {strides = array<i32>} : memref<400x256xf32, #tpu.memory_space<vmem>>, vector<6x256xf32>,
    %72 = vector.extract_strided_slice %68 {offsets = [0, 1], sizes = [6, 255], strides = [1, 1]} : vector<6x256xf32> to vector<6x255xf32>
    %c6_48 = arith.constant 6 : index
    %c0_49 = arith.constant 0 : index
    %73 = vector.load %arg13[%c6_48, %c0_49] : memref<400x256xf32, #tpu.memory_space<vmem>>, vector<6x255xf32>
    tpu.vector_store %arg13[%c6_48, %c0_49], %72 {strides = array<i32>} : memref<400x256xf32, #tpu.memory_space<vmem>>, vector<6x255xf32>,
    %74 = vector.extract_strided_slice %68 {offsets = [0, 2], sizes = [6, 254], strides = [1, 1]} : vector<6x256xf32> to vector<6x254xf32>
    %c12_50 = arith.constant 12 : index
    %c0_51 = arith.constant 0 : index
    %75 = vector.load %arg13[%c12_50, %c0_51] : memref<400x256xf32, #tpu.memory_space<vmem>>, vector<6x254xf32>
    tpu.vector_store %arg13[%c12_50, %c0_51], %74 {strides = array<i32>} : memref<400x256xf32, #tpu.memory_space<vmem>>, vector<6x254xf32>,
    %76 = vector.extract_strided_slice %68 {offsets = [0, 3], sizes = [6, 253], strides = [1, 1]} : vector<6x256xf32> to vector<6x253xf32>
    %c18_52 = arith.constant 18 : index
    %c0_53 = arith.constant 0 : index
    %77 = vector.load %arg13[%c18_52, %c0_53] : memref<400x256xf32, #tpu.memory_space<vmem>>, vector<6x253xf32>
    tpu.vector_store %arg13[%c18_52, %c0_53], %76 {strides = array<i32>} : memref<400x256xf32, #tpu.memory_space<vmem>>, vector<6x253xf32>,
    %78 = vector.extract_strided_slice %68 {offsets = [0, 4], sizes = [6, 252], strides = [1, 1]} : vector<6x256xf32> to vector<6x252xf32>
    %c24_54 = arith.constant 24 : index
    %c0_55 = arith.constant 0 : index
    %79 = vector.load %arg13[%c24_54, %c0_55] : memref<400x256xf32, #tpu.memory_space<vmem>>, vector<6x252xf32>
    tpu.vector_store %arg13[%c24_54, %c0_55], %78 {strides = array<i32>} : memref<400x256xf32, #tpu.memory_space<vmem>>, vector<6x252xf32>,
    %80 = vector.extract_strided_slice %68 {offsets = [0, 16], sizes = [6, 240], strides = [1, 1]} : vector<6x256xf32> to vector<6x240xf32>
    %c30_56 = arith.constant 30 : index
    %c0_57 = arith.constant 0 : index
    %81 = vector.load %arg13[%c30_56, %c0_57] : memref<400x256xf32, #tpu.memory_space<vmem>>, vector<6x240xf32>
    tpu.vector_store %arg13[%c30_56, %c0_57], %80 {strides = array<i32>} : memref<400x256xf32, #tpu.memory_space<vmem>>, vector<6x240xf32>,
    %82 = vector.extract_strided_slice %68 {offsets = [0, 17], sizes = [6, 239], strides = [1, 1]} : vector<6x256xf32> to vector<6x239xf32>
    %c36_58 = arith.constant 36 : index
    %c0_59 = arith.constant 0 : index
    %83 = vector.load %arg13[%c36_58, %c0_59] : memref<400x256xf32, #tpu.memory_space<vmem>>, vector<6x239xf32>
    tpu.vector_store %arg13[%c36_58, %c0_59], %82 {strides = array<i32>} : memref<400x256xf32, #tpu.memory_space<vmem>>, vector<6x239xf32>,
    %84 = vector.extract_strided_slice %68 {offsets = [0, 18], sizes = [6, 238], strides = [1, 1]} : vector<6x256xf32> to vector<6x238xf32>
    %c42_60 = arith.constant 42 : index
    %c0_61 = arith.constant 0 : index
    %85 = vector.load %arg13[%c42_60, %c0_61] : memref<400x256xf32, #tpu.memory_space<vmem>>, vector<6x238xf32>
    tpu.vector_store %arg13[%c42_60, %c0_61], %84 {strides = array<i32>} : memref<400x256xf32, #tpu.memory_space<vmem>>, vector<6x238xf32>,
    %86 = vector.extract_strided_slice %68 {offsets = [0, 19], sizes = [6, 237], strides = [1, 1]} : vector<6x256xf32> to vector<6x237xf32>
    %c48_62 = arith.constant 48 : index
    %c0_63 = arith.constant 0 : index
    %87 = vector.load %arg13[%c48_62, %c0_63] : memref<400x256xf32, #tpu.memory_space<vmem>>, vector<6x237xf32>
    tpu.vector_store %arg13[%c48_62, %c0_63], %86 {strides = array<i32>} : memref<400x256xf32, #tpu.memory_space<vmem>>, vector<6x237xf32>,
    %88 = vector.extract_strided_slice %68 {offsets = [0, 20], sizes = [6, 236], strides = [1, 1]} : vector<6x256xf32> to vector<6x236xf32>
    %c54_64 = arith.constant 54 : index
    %c0_65 = arith.constant 0 : index
    %89 = vector.load %arg13[%c54_64, %c0_65] : memref<400x256xf32, #tpu.memory_space<vmem>>, vector<6x236xf32>
    tpu.vector_store %arg13[%c54_64, %c0_65], %88 {strides = array<i32>} : memref<400x256xf32, #tpu.memory_space<vmem>>, vector<6x236xf32>,
    %90 = vector.extract_strided_slice %68 {offsets = [0, 32], sizes = [6, 224], strides = [1, 1]} : vector<6x256xf32> to vector<6x224xf32>
    %c60_66 = arith.constant 60 : index
    %c0_67 = arith.constant 0 : index
    %91 = vector.load %arg13[%c60_66, %c0_67] : memref<400x256xf32, #tpu.memory_space<vmem>>, vector<6x224xf32>
    tpu.vector_store %arg13[%c60_66, %c0_67], %90 {strides = array<i32>} : memref<400x256xf32, #tpu.memory_space<vmem>>, vector<6x224xf32>,
    %92 = vector.extract_strided_slice %68 {offsets = [0, 33], sizes = [6, 223], strides = [1, 1]} : vector<6x256xf32> to vector<6x223xf32>
    %c66_68 = arith.constant 66 : index
    %c0_69 = arith.constant 0 : index
    %93 = vector.load %arg13[%c66_68, %c0_69] : memref<400x256xf32, #tpu.memory_space<vmem>>, vector<6x223xf32>
    tpu.vector_store %arg13[%c66_68, %c0_69], %92 {strides = array<i32>} : memref<400x256xf32, #tpu.memory_space<vmem>>, vector<6x223xf32>,
    %94 = vector.extract_strided_slice %68 {offsets = [0, 34], sizes = [6, 222], strides = [1, 1]} : vector<6x256xf32> to vector<6x222xf32>
    %c72_70 = arith.constant 72 : index
    %c0_71 = arith.constant 0 : index
    %95 = vector.load %arg13[%c72_70, %c0_71] : memref<400x256xf32, #tpu.memory_space<vmem>>, vector<6x222xf32>
    tpu.vector_store %arg13[%c72_70, %c0_71], %94 {strides = array<i32>} : memref<400x256xf32, #tpu.memory_space<vmem>>, vector<6x222xf32>,
    %96 = vector.extract_strided_slice %68 {offsets = [0, 35], sizes = [6, 221], strides = [1, 1]} : vector<6x256xf32> to vector<6x221xf32>
    %c78 = arith.constant 78 : index
    %c0_72 = arith.constant 0 : index
    %97 = vector.load %arg13[%c78, %c0_72] : memref<400x256xf32, #tpu.memory_space<vmem>>, vector<6x221xf32>
    tpu.vector_store %arg13[%c78, %c0_72], %96 {strides = array<i32>} : memref<400x256xf32, #tpu.memory_space<vmem>>, vector<6x221xf32>,
    %98 = vector.extract_strided_slice %68 {offsets = [0, 36], sizes = [6, 220], strides = [1, 1]} : vector<6x256xf32> to vector<6x220xf32>
    %c84 = arith.constant 84 : index
    %c0_73 = arith.constant 0 : index
    %99 = vector.load %arg13[%c84, %c0_73] : memref<400x256xf32, #tpu.memory_space<vmem>>, vector<6x220xf32>
    tpu.vector_store %arg13[%c84, %c0_73], %98 {strides = array<i32>} : memref<400x256xf32, #tpu.memory_space<vmem>>, vector<6x220xf32>,
    %100 = vector.extract_strided_slice %68 {offsets = [0, 48], sizes = [6, 208], strides = [1, 1]} : vector<6x256xf32> to vector<6x208xf32>
    %c90 = arith.constant 90 : index
    %c0_74 = arith.constant 0 : index
    %101 = vector.load %arg13[%c90, %c0_74] : memref<400x256xf32, #tpu.memory_space<vmem>>, vector<6x208xf32>
    tpu.vector_store %arg13[%c90, %c0_74], %100 {strides = array<i32>} : memref<400x256xf32, #tpu.memory_space<vmem>>, vector<6x208xf32>,
    %102 = vector.extract_strided_slice %68 {offsets = [0, 49], sizes = [6, 207], strides = [1, 1]} : vector<6x256xf32> to vector<6x207xf32>
    %c96 = arith.constant 96 : index
    %c0_75 = arith.constant 0 : index
    %103 = vector.load %arg13[%c96, %c0_75] : memref<400x256xf32, #tpu.memory_space<vmem>>, vector<6x207xf32>
    tpu.vector_store %arg13[%c96, %c0_75], %102 {strides = array<i32>} : memref<400x256xf32, #tpu.memory_space<vmem>>, vector<6x207xf32>,
    %104 = vector.extract_strided_slice %68 {offsets = [0, 50], sizes = [6, 206], strides = [1, 1]} : vector<6x256xf32> to vector<6x206xf32>
    %c102 = arith.constant 102 : index
    %c0_76 = arith.constant 0 : index
    %105 = vector.load %arg13[%c102, %c0_76] : memref<400x256xf32, #tpu.memory_space<vmem>>, vector<6x206xf32>
    tpu.vector_store %arg13[%c102, %c0_76], %104 {strides = array<i32>} : memref<400x256xf32, #tpu.memory_space<vmem>>, vector<6x206xf32>,
    %106 = vector.extract_strided_slice %68 {offsets = [0, 51], sizes = [6, 205], strides = [1, 1]} : vector<6x256xf32> to vector<6x205xf32>
    %c108 = arith.constant 108 : index
    %c0_77 = arith.constant 0 : index
    %107 = vector.load %arg13[%c108, %c0_77] : memref<400x256xf32, #tpu.memory_space<vmem>>, vector<6x205xf32>
    tpu.vector_store %arg13[%c108, %c0_77], %106 {strides = array<i32>} : memref<400x256xf32, #tpu.memory_space<vmem>>, vector<6x205xf32>,
    %108 = vector.extract_strided_slice %68 {offsets = [0, 52], sizes = [6, 204], strides = [1, 1]} : vector<6x256xf32> to vector<6x204xf32>
    %c114 = arith.constant 114 : index
    %c0_78 = arith.constant 0 : index
    %109 = vector.load %arg13[%c114, %c0_78] : memref<400x256xf32, #tpu.memory_space<vmem>>, vector<6x204xf32>
    tpu.vector_store %arg13[%c114, %c0_78], %108 {strides = array<i32>} : memref<400x256xf32, #tpu.memory_space<vmem>>, vector<6x204xf32>,
    %110 = vector.extract_strided_slice %68 {offsets = [0, 64], sizes = [6, 192], strides = [1, 1]} : vector<6x256xf32> to vector<6x192xf32>
    %c120 = arith.constant 120 : index
    %c0_79 = arith.constant 0 : index
    %111 = vector.load %arg13[%c120, %c0_79] : memref<400x256xf32, #tpu.memory_space<vmem>>, vector<6x192xf32>
    tpu.vector_store %arg13[%c120, %c0_79], %110 {strides = array<i32>} : memref<400x256xf32, #tpu.memory_space<vmem>>, vector<6x192xf32>,
    %112 = vector.extract_strided_slice %68 {offsets = [0, 65], sizes = [6, 191], strides = [1, 1]} : vector<6x256xf32> to vector<6x191xf32>
    %c126 = arith.constant 126 : index
    %c0_80 = arith.constant 0 : index
    %113 = vector.load %arg13[%c126, %c0_80] : memref<400x256xf32, #tpu.memory_space<vmem>>, vector<6x191xf32>
    tpu.vector_store %arg13[%c126, %c0_80], %112 {strides = array<i32>} : memref<400x256xf32, #tpu.memory_space<vmem>>, vector<6x191xf32>,
    %114 = vector.extract_strided_slice %68 {offsets = [0, 66], sizes = [6, 190], strides = [1, 1]} : vector<6x256xf32> to vector<6x190xf32>
    %c132 = arith.constant 132 : index
    %c0_81 = arith.constant 0 : index
    %115 = vector.load %arg13[%c132, %c0_81] : memref<400x256xf32, #tpu.memory_space<vmem>>, vector<6x190xf32>
    tpu.vector_store %arg13[%c132, %c0_81], %114 {strides = array<i32>} : memref<400x256xf32, #tpu.memory_space<vmem>>, vector<6x190xf32>,
    %116 = vector.extract_strided_slice %68 {offsets = [0, 67], sizes = [6, 189], strides = [1, 1]} : vector<6x256xf32> to vector<6x189xf32>
    %c138 = arith.constant 138 : index
    %c0_82 = arith.constant 0 : index
    %117 = vector.load %arg13[%c138, %c0_82] : memref<400x256xf32, #tpu.memory_space<vmem>>, vector<6x189xf32>
    tpu.vector_store %arg13[%c138, %c0_82], %116 {strides = array<i32>} : memref<400x256xf32, #tpu.memory_space<vmem>>, vector<6x189xf32>,
    %118 = vector.extract_strided_slice %68 {offsets = [0, 68], sizes = [6, 188], strides = [1, 1]} : vector<6x256xf32> to vector<6x188xf32>
    %c144 = arith.constant 144 : index
    %c0_83 = arith.constant 0 : index
    %119 = vector.load %arg13[%c144, %c0_83] : memref<400x256xf32, #tpu.memory_space<vmem>>, vector<6x188xf32>
    tpu.vector_store %arg13[%c144, %c0_83], %118 {strides = array<i32>} : memref<400x256xf32, #tpu.memory_space<vmem>>, vector<6x188xf32>,
    %c0_84 = arith.constant 0 : index
    %c0_85 = arith.constant 0 : index
    %120 = vector.load %arg6[%c0_84, %c0_85] : memref<16x150xf32, #tpu.memory_space<vmem>>, vector<16x150xf32>
    %c0_86 = arith.constant 0 : index
    %c0_87 = arith.constant 0 : index
    %121 = vector.load %arg13[%c0_86, %c0_87] : memref<400x256xf32, #tpu.memory_space<vmem>>, vector<150x256xf32>
    %cst_88 = arith.constant dense<0.000000e+00> : vector<16x256xf32>
    %122 = tpu.matmul %120, %121, %cst_88 {dimension_numbers = #tpu.dot_dimension_numbers<[1], [0], [0], [1], [0, 0, 1, 1], [], []>} : vector<16x150xf32>, vector<150x256xf32>, vector<16x256xf32> -> vector<16x256xf32>
    %c0_89 = arith.constant 0 : index
    %c0_90 = arith.constant 0 : index
    %123 = vector.load %arg7[%c0_89, %c0_90] : memref<16x1xf32, #tpu.memory_space<vmem>>, vector<16x1xf32>
    %124 = vector.broadcast %123 : vector<16x1xf32> to vector<16x256xf32>
    %125 = arith.addf %122, %124 : vector<16x256xf32>
    %cst_91 = arith.constant 0.000000e+00 : f32
    %126 = vector.broadcast %cst_91 : f32 to vector<16x256xf32>
    %127 = arith.maximumf %125, %126 : vector<16x256xf32>
    %cst_92 = arith.constant 0.000000e+00 : f32
    %128 = vector.broadcast %cst_92 : f32 to vector<1x256xf32>
    %129 = arith.cmpf one, %1, %128 : vector<1x256xf32>
    %cst_93 = arith.constant 0.000000e+00 : f32
    %130 = vector.shape_cast %129 : vector<1x256xi1> to vector<1x256xi1>
    %131 = vector.broadcast %130 : vector<1x256xi1> to vector<16x256xi1>
    %132 = vector.broadcast %cst_93 : f32 to vector<16x256xf32>
    %133 = arith.select %131, %127, %132 : vector<16x256xi1>, vector<16x256xf32>
    %cst_94 = arith.constant 0.000000e+00 : f32
    %134 = vector.broadcast %cst_94 : f32 to vector<400x68xf32>
    %c0_95 = arith.constant 0 : index
    %c0_96 = arith.constant 0 : index
    %135 = vector.load %arg13[%c0_95, %c0_96] : memref<400x256xf32, #tpu.memory_space<vmem>>, vector<400x68xf32>
    tpu.vector_store %arg13[%c0_95, %c0_96], %134 {strides = array<i32>} : memref<400x256xf32, #tpu.memory_space<vmem>>, vector<400x68xf32>,
    %136 = vector.extract_strided_slice %133 {offsets = [0, 0], sizes = [16, 188], strides = [1, 1]} : vector<16x256xf32> to vector<16x188xf32>
    %c0_97 = arith.constant 0 : index
    %c68 = arith.constant 68 : index
    %137 = vector.load %arg13[%c0_97, %c68] : memref<400x256xf32, #tpu.memory_space<vmem>>, vector<16x188xf32>
    tpu.vector_store %arg13[%c0_97, %c68], %136 {strides = array<i32>} : memref<400x256xf32, #tpu.memory_space<vmem>>, vector<16x188xf32>,
    %138 = vector.extract_strided_slice %133 {offsets = [0, 0], sizes = [16, 189], strides = [1, 1]} : vector<16x256xf32> to vector<16x189xf32>
    %c16 = arith.constant 16 : index
    %c67 = arith.constant 67 : index
    %139 = vector.load %arg13[%c16, %c67] : memref<400x256xf32, #tpu.memory_space<vmem>>, vector<16x189xf32>
    tpu.vector_store %arg13[%c16, %c67], %138 {strides = array<i32>} : memref<400x256xf32, #tpu.memory_space<vmem>>, vector<16x189xf32>,
    %140 = vector.extract_strided_slice %133 {offsets = [0, 0], sizes = [16, 190], strides = [1, 1]} : vector<16x256xf32> to vector<16x190xf32>
    %c32 = arith.constant 32 : index
    %c66_98 = arith.constant 66 : index
    %141 = vector.load %arg13[%c32, %c66_98] : memref<400x256xf32, #tpu.memory_space<vmem>>, vector<16x190xf32>
    tpu.vector_store %arg13[%c32, %c66_98], %140 {strides = array<i32>} : memref<400x256xf32, #tpu.memory_space<vmem>>, vector<16x190xf32>,
    %142 = vector.extract_strided_slice %133 {offsets = [0, 0], sizes = [16, 191], strides = [1, 1]} : vector<16x256xf32> to vector<16x191xf32>
    %c48_99 = arith.constant 48 : index
    %c65 = arith.constant 65 : index
    %143 = vector.load %arg13[%c48_99, %c65] : memref<400x256xf32, #tpu.memory_space<vmem>>, vector<16x191xf32>
    tpu.vector_store %arg13[%c48_99, %c65], %142 {strides = array<i32>} : memref<400x256xf32, #tpu.memory_space<vmem>>, vector<16x191xf32>,
    %144 = vector.extract_strided_slice %133 {offsets = [0, 0], sizes = [16, 192], strides = [1, 1]} : vector<16x256xf32> to vector<16x192xf32>
    %c64 = arith.constant 64 : index
    %c64_100 = arith.constant 64 : index
    %145 = vector.load %arg13[%c64, %c64_100] : memref<400x256xf32, #tpu.memory_space<vmem>>, vector<16x192xf32>
    tpu.vector_store %arg13[%c64, %c64_100], %144 {strides = array<i32>} : memref<400x256xf32, #tpu.memory_space<vmem>>, vector<16x192xf32>,
    %146 = vector.extract_strided_slice %133 {offsets = [0, 0], sizes = [16, 204], strides = [1, 1]} : vector<16x256xf32> to vector<16x204xf32>
    %c80 = arith.constant 80 : index
    %c52 = arith.constant 52 : index
    %147 = vector.load %arg13[%c80, %c52] : memref<400x256xf32, #tpu.memory_space<vmem>>, vector<16x204xf32>
    tpu.vector_store %arg13[%c80, %c52], %146 {strides = array<i32>} : memref<400x256xf32, #tpu.memory_space<vmem>>, vector<16x204xf32>,
    %148 = vector.extract_strided_slice %133 {offsets = [0, 0], sizes = [16, 205], strides = [1, 1]} : vector<16x256xf32> to vector<16x205xf32>
    %c96_101 = arith.constant 96 : index
    %c51_102 = arith.constant 51 : index
    %149 = vector.load %arg13[%c96_101, %c51_102] : memref<400x256xf32, #tpu.memory_space<vmem>>, vector<16x205xf32>
    tpu.vector_store %arg13[%c96_101, %c51_102], %148 {strides = array<i32>} : memref<400x256xf32, #tpu.memory_space<vmem>>, vector<16x205xf32>,
    %150 = vector.extract_strided_slice %133 {offsets = [0, 0], sizes = [16, 206], strides = [1, 1]} : vector<16x256xf32> to vector<16x206xf32>
    %c112 = arith.constant 112 : index
    %c50 = arith.constant 50 : index
    %151 = vector.load %arg13[%c112, %c50] : memref<400x256xf32, #tpu.memory_space<vmem>>, vector<16x206xf32>
    tpu.vector_store %arg13[%c112, %c50], %150 {strides = array<i32>} : memref<400x256xf32, #tpu.memory_space<vmem>>, vector<16x206xf32>,
    %152 = vector.extract_strided_slice %133 {offsets = [0, 0], sizes = [16, 207], strides = [1, 1]} : vector<16x256xf32> to vector<16x207xf32>
    %c128 = arith.constant 128 : index
    %c49 = arith.constant 49 : index
    %153 = vector.load %arg13[%c128, %c49] : memref<400x256xf32, #tpu.memory_space<vmem>>, vector<16x207xf32>
    tpu.vector_store %arg13[%c128, %c49], %152 {strides = array<i32>} : memref<400x256xf32, #tpu.memory_space<vmem>>, vector<16x207xf32>,
    %154 = vector.extract_strided_slice %133 {offsets = [0, 0], sizes = [16, 208], strides = [1, 1]} : vector<16x256xf32> to vector<16x208xf32>
    %c144_103 = arith.constant 144 : index
    %c48_104 = arith.constant 48 : index
    %155 = vector.load %arg13[%c144_103, %c48_104] : memref<400x256xf32, #tpu.memory_space<vmem>>, vector<16x208xf32>
    tpu.vector_store %arg13[%c144_103, %c48_104], %154 {strides = array<i32>} : memref<400x256xf32, #tpu.memory_space<vmem>>, vector<16x208xf32>,
    %156 = vector.extract_strided_slice %133 {offsets = [0, 0], sizes = [16, 220], strides = [1, 1]} : vector<16x256xf32> to vector<16x220xf32>
    %c160 = arith.constant 160 : index
    %c36_105 = arith.constant 36 : index
    %157 = vector.load %arg13[%c160, %c36_105] : memref<400x256xf32, #tpu.memory_space<vmem>>, vector<16x220xf32>
    tpu.vector_store %arg13[%c160, %c36_105], %156 {strides = array<i32>} : memref<400x256xf32, #tpu.memory_space<vmem>>, vector<16x220xf32>,
    %158 = vector.extract_strided_slice %133 {offsets = [0, 0], sizes = [16, 221], strides = [1, 1]} : vector<16x256xf32> to vector<16x221xf32>
    %c176 = arith.constant 176 : index
    %c35 = arith.constant 35 : index
    %159 = vector.load %arg13[%c176, %c35] : memref<400x256xf32, #tpu.memory_space<vmem>>, vector<16x221xf32>
    tpu.vector_store %arg13[%c176, %c35], %158 {strides = array<i32>} : memref<400x256xf32, #tpu.memory_space<vmem>>, vector<16x221xf32>,
    %160 = vector.extract_strided_slice %133 {offsets = [0, 0], sizes = [16, 222], strides = [1, 1]} : vector<16x256xf32> to vector<16x222xf32>
    %c192 = arith.constant 192 : index
    %c34 = arith.constant 34 : index
    %161 = vector.load %arg13[%c192, %c34] : memref<400x256xf32, #tpu.memory_space<vmem>>, vector<16x222xf32>
    tpu.vector_store %arg13[%c192, %c34], %160 {strides = array<i32>} : memref<400x256xf32, #tpu.memory_space<vmem>>, vector<16x222xf32>,
    %162 = vector.extract_strided_slice %133 {offsets = [0, 0], sizes = [16, 223], strides = [1, 1]} : vector<16x256xf32> to vector<16x223xf32>
    %c208 = arith.constant 208 : index
    %c33_106 = arith.constant 33 : index
    %163 = vector.load %arg13[%c208, %c33_106] : memref<400x256xf32, #tpu.memory_space<vmem>>, vector<16x223xf32>
    tpu.vector_store %arg13[%c208, %c33_106], %162 {strides = array<i32>} : memref<400x256xf32, #tpu.memory_space<vmem>>, vector<16x223xf32>,
    %164 = vector.extract_strided_slice %133 {offsets = [0, 0], sizes = [16, 224], strides = [1, 1]} : vector<16x256xf32> to vector<16x224xf32>
    %c224 = arith.constant 224 : index
    %c32_107 = arith.constant 32 : index
    %165 = vector.load %arg13[%c224, %c32_107] : memref<400x256xf32, #tpu.memory_space<vmem>>, vector<16x224xf32>
    tpu.vector_store %arg13[%c224, %c32_107], %164 {strides = array<i32>} : memref<400x256xf32, #tpu.memory_space<vmem>>, vector<16x224xf32>,
    %166 = vector.extract_strided_slice %133 {offsets = [0, 0], sizes = [16, 236], strides = [1, 1]} : vector<16x256xf32> to vector<16x236xf32>
    %c240 = arith.constant 240 : index
    %c20 = arith.constant 20 : index
    %167 = vector.load %arg13[%c240, %c20] : memref<400x256xf32, #tpu.memory_space<vmem>>, vector<16x236xf32>
    tpu.vector_store %arg13[%c240, %c20], %166 {strides = array<i32>} : memref<400x256xf32, #tpu.memory_space<vmem>>, vector<16x236xf32>,
    %168 = vector.extract_strided_slice %133 {offsets = [0, 0], sizes = [16, 237], strides = [1, 1]} : vector<16x256xf32> to vector<16x237xf32>
    %c256 = arith.constant 256 : index
    %c19 = arith.constant 19 : index
    %169 = vector.load %arg13[%c256, %c19] : memref<400x256xf32, #tpu.memory_space<vmem>>, vector<16x237xf32>
    tpu.vector_store %arg13[%c256, %c19], %168 {strides = array<i32>} : memref<400x256xf32, #tpu.memory_space<vmem>>, vector<16x237xf32>,
    %170 = vector.extract_strided_slice %133 {offsets = [0, 0], sizes = [16, 238], strides = [1, 1]} : vector<16x256xf32> to vector<16x238xf32>
    %c272 = arith.constant 272 : index
    %c18_108 = arith.constant 18 : index
    %171 = vector.load %arg13[%c272, %c18_108] : memref<400x256xf32, #tpu.memory_space<vmem>>, vector<16x238xf32>
    tpu.vector_store %arg13[%c272, %c18_108], %170 {strides = array<i32>} : memref<400x256xf32, #tpu.memory_space<vmem>>, vector<16x238xf32>,
    %172 = vector.extract_strided_slice %133 {offsets = [0, 0], sizes = [16, 239], strides = [1, 1]} : vector<16x256xf32> to vector<16x239xf32>
    %c288 = arith.constant 288 : index
    %c17 = arith.constant 17 : index
    %173 = vector.load %arg13[%c288, %c17] : memref<400x256xf32, #tpu.memory_space<vmem>>, vector<16x239xf32>
    tpu.vector_store %arg13[%c288, %c17], %172 {strides = array<i32>} : memref<400x256xf32, #tpu.memory_space<vmem>>, vector<16x239xf32>,
    %174 = vector.extract_strided_slice %133 {offsets = [0, 0], sizes = [16, 240], strides = [1, 1]} : vector<16x256xf32> to vector<16x240xf32>
    %c304 = arith.constant 304 : index
    %c16_109 = arith.constant 16 : index
    %175 = vector.load %arg13[%c304, %c16_109] : memref<400x256xf32, #tpu.memory_space<vmem>>, vector<16x240xf32>
    tpu.vector_store %arg13[%c304, %c16_109], %174 {strides = array<i32>} : memref<400x256xf32, #tpu.memory_space<vmem>>, vector<16x240xf32>,
    %176 = vector.extract_strided_slice %133 {offsets = [0, 0], sizes = [16, 252], strides = [1, 1]} : vector<16x256xf32> to vector<16x252xf32>
    %c320 = arith.constant 320 : index
    %c4 = arith.constant 4 : index
    %177 = vector.load %arg13[%c320, %c4] : memref<400x256xf32, #tpu.memory_space<vmem>>, vector<16x252xf32>
    tpu.vector_store %arg13[%c320, %c4], %176 {strides = array<i32>} : memref<400x256xf32, #tpu.memory_space<vmem>>, vector<16x252xf32>,
    %178 = vector.extract_strided_slice %133 {offsets = [0, 0], sizes = [16, 253], strides = [1, 1]} : vector<16x256xf32> to vector<16x253xf32>
    %c336 = arith.constant 336 : index
    %c3_110 = arith.constant 3 : index
    %179 = vector.load %arg13[%c336, %c3_110] : memref<400x256xf32, #tpu.memory_space<vmem>>, vector<16x253xf32>
    tpu.vector_store %arg13[%c336, %c3_110], %178 {strides = array<i32>} : memref<400x256xf32, #tpu.memory_space<vmem>>, vector<16x253xf32>,
    %180 = vector.extract_strided_slice %133 {offsets = [0, 0], sizes = [16, 254], strides = [1, 1]} : vector<16x256xf32> to vector<16x254xf32>
    %c352 = arith.constant 352 : index
    %c2 = arith.constant 2 : index
    %181 = vector.load %arg13[%c352, %c2] : memref<400x256xf32, #tpu.memory_space<vmem>>, vector<16x254xf32>
    tpu.vector_store %arg13[%c352, %c2], %180 {strides = array<i32>} : memref<400x256xf32, #tpu.memory_space<vmem>>, vector<16x254xf32>,
    %182 = vector.extract_strided_slice %133 {offsets = [0, 0], sizes = [16, 255], strides = [1, 1]} : vector<16x256xf32> to vector<16x255xf32>
    %c368 = arith.constant 368 : index
    %c1 = arith.constant 1 : index
    %183 = vector.load %arg13[%c368, %c1] : memref<400x256xf32, #tpu.memory_space<vmem>>, vector<16x255xf32>
    tpu.vector_store %arg13[%c368, %c1], %182 {strides = array<i32>} : memref<400x256xf32, #tpu.memory_space<vmem>>, vector<16x255xf32>,
    %c384 = arith.constant 384 : index
    %c0_111 = arith.constant 0 : index
    %184 = vector.load %arg13[%c384, %c0_111] : memref<400x256xf32, #tpu.memory_space<vmem>>, vector<16x256xf32>
    tpu.vector_store %arg13[%c384, %c0_111], %133 {strides = array<i32>} : memref<400x256xf32, #tpu.memory_space<vmem>>, vector<16x256xf32>,
    %c0_112 = arith.constant 0 : index
    %c0_113 = arith.constant 0 : index
    %185 = vector.load %arg8[%c0_112, %c0_113] : memref<6x400xf32, #tpu.memory_space<vmem>>, vector<6x400xf32>
    %c0_114 = arith.constant 0 : index
    %c0_115 = arith.constant 0 : index
    %186 = vector.load %arg13[%c0_114, %c0_115] : memref<400x256xf32, #tpu.memory_space<vmem>>, vector<400x256xf32>
    %cst_116 = arith.constant dense<0.000000e+00> : vector<6x256xf32>
    %187 = tpu.matmul %185, %186, %cst_116 {dimension_numbers = #tpu.dot_dimension_numbers<[1], [0], [0], [1], [0, 0, 1, 1], [], []>} : vector<6x400xf32>, vector<400x256xf32>, vector<6x256xf32> -> vector<6x256xf32>
    %c0_117 = arith.constant 0 : index
    %c0_118 = arith.constant 0 : index
    %188 = vector.load %arg9[%c0_117, %c0_118] : memref<6x1xf32, #tpu.memory_space<vmem>>, vector<6x1xf32>
    %189 = vector.broadcast %188 : vector<6x1xf32> to vector<6x256xf32>
    %190 = arith.addf %187, %189 : vector<6x256xf32>
    %cst_119 = arith.constant 0.000000e+00 : f32
    %191 = vector.broadcast %cst_119 : f32 to vector<6x256xf32>
    %192 = arith.maximumf %190, %191 : vector<6x256xf32>
    %cst_120 = arith.constant 0.000000e+00 : f32
    %193 = vector.broadcast %cst_120 : f32 to vector<1x256xf32>
    %194 = arith.cmpf one, %0, %193 : vector<1x256xf32>
    %cst_121 = arith.constant 0.000000e+00 : f32
    %195 = vector.shape_cast %194 : vector<1x256xi1> to vector<1x256xi1>
    %196 = vector.broadcast %195 : vector<1x256xi1> to vector<6x256xi1>
    %197 = vector.broadcast %cst_121 : f32 to vector<6x256xf32>
    %198 = arith.select %196, %192, %197 : vector<6x256xi1>, vector<6x256xf32>
    %cst_122 = arith.constant 0.000000e+00 : f32
    %199 = vector.broadcast %cst_122 : f32 to vector<150x68xf32>
    %c0_123 = arith.constant 0 : index
    %c0_124 = arith.constant 0 : index
    %200 = vector.load %arg13[%c0_123, %c0_124] : memref<400x256xf32, #tpu.memory_space<vmem>>, vector<150x68xf32>
    tpu.vector_store %arg13[%c0_123, %c0_124], %199 {strides = array<i32>} : memref<400x256xf32, #tpu.memory_space<vmem>>, vector<150x68xf32>,
    %201 = vector.extract_strided_slice %198 {offsets = [0, 0], sizes = [6, 188], strides = [1, 1]} : vector<6x256xf32> to vector<6x188xf32>
    %c0_125 = arith.constant 0 : index
    %c68_126 = arith.constant 68 : index
    %202 = vector.load %arg13[%c0_125, %c68_126] : memref<400x256xf32, #tpu.memory_space<vmem>>, vector<6x188xf32>
    tpu.vector_store %arg13[%c0_125, %c68_126], %201 {strides = array<i32>} : memref<400x256xf32, #tpu.memory_space<vmem>>, vector<6x188xf32>,
    %203 = vector.extract_strided_slice %198 {offsets = [0, 0], sizes = [6, 189], strides = [1, 1]} : vector<6x256xf32> to vector<6x189xf32>
    %c6_127 = arith.constant 6 : index
    %c67_128 = arith.constant 67 : index
    %204 = vector.load %arg13[%c6_127, %c67_128] : memref<400x256xf32, #tpu.memory_space<vmem>>, vector<6x189xf32>
    tpu.vector_store %arg13[%c6_127, %c67_128], %203 {strides = array<i32>} : memref<400x256xf32, #tpu.memory_space<vmem>>, vector<6x189xf32>,
    %205 = vector.extract_strided_slice %198 {offsets = [0, 0], sizes = [6, 190], strides = [1, 1]} : vector<6x256xf32> to vector<6x190xf32>
    %c12_129 = arith.constant 12 : index
    %c66_130 = arith.constant 66 : index
    %206 = vector.load %arg13[%c12_129, %c66_130] : memref<400x256xf32, #tpu.memory_space<vmem>>, vector<6x190xf32>
    tpu.vector_store %arg13[%c12_129, %c66_130], %205 {strides = array<i32>} : memref<400x256xf32, #tpu.memory_space<vmem>>, vector<6x190xf32>,
    %207 = vector.extract_strided_slice %198 {offsets = [0, 0], sizes = [6, 191], strides = [1, 1]} : vector<6x256xf32> to vector<6x191xf32>
    %c18_131 = arith.constant 18 : index
    %c65_132 = arith.constant 65 : index
    %208 = vector.load %arg13[%c18_131, %c65_132] : memref<400x256xf32, #tpu.memory_space<vmem>>, vector<6x191xf32>
    tpu.vector_store %arg13[%c18_131, %c65_132], %207 {strides = array<i32>} : memref<400x256xf32, #tpu.memory_space<vmem>>, vector<6x191xf32>,
    %209 = vector.extract_strided_slice %198 {offsets = [0, 0], sizes = [6, 192], strides = [1, 1]} : vector<6x256xf32> to vector<6x192xf32>
    %c24_133 = arith.constant 24 : index
    %c64_134 = arith.constant 64 : index
    %210 = vector.load %arg13[%c24_133, %c64_134] : memref<400x256xf32, #tpu.memory_space<vmem>>, vector<6x192xf32>
    tpu.vector_store %arg13[%c24_133, %c64_134], %209 {strides = array<i32>} : memref<400x256xf32, #tpu.memory_space<vmem>>, vector<6x192xf32>,
    %211 = vector.extract_strided_slice %198 {offsets = [0, 0], sizes = [6, 204], strides = [1, 1]} : vector<6x256xf32> to vector<6x204xf32>
    %c30_135 = arith.constant 30 : index
    %c52_136 = arith.constant 52 : index
    %212 = vector.load %arg13[%c30_135, %c52_136] : memref<400x256xf32, #tpu.memory_space<vmem>>, vector<6x204xf32>
    tpu.vector_store %arg13[%c30_135, %c52_136], %211 {strides = array<i32>} : memref<400x256xf32, #tpu.memory_space<vmem>>, vector<6x204xf32>,
    %213 = vector.extract_strided_slice %198 {offsets = [0, 0], sizes = [6, 205], strides = [1, 1]} : vector<6x256xf32> to vector<6x205xf32>
    %c36_137 = arith.constant 36 : index
    %c51_138 = arith.constant 51 : index
    %214 = vector.load %arg13[%c36_137, %c51_138] : memref<400x256xf32, #tpu.memory_space<vmem>>, vector<6x205xf32>
    tpu.vector_store %arg13[%c36_137, %c51_138], %213 {strides = array<i32>} : memref<400x256xf32, #tpu.memory_space<vmem>>, vector<6x205xf32>,
    %215 = vector.extract_strided_slice %198 {offsets = [0, 0], sizes = [6, 206], strides = [1, 1]} : vector<6x256xf32> to vector<6x206xf32>
    %c42_139 = arith.constant 42 : index
    %c50_140 = arith.constant 50 : index
    %216 = vector.load %arg13[%c42_139, %c50_140] : memref<400x256xf32, #tpu.memory_space<vmem>>, vector<6x206xf32>
    tpu.vector_store %arg13[%c42_139, %c50_140], %215 {strides = array<i32>} : memref<400x256xf32, #tpu.memory_space<vmem>>, vector<6x206xf32>,
    %217 = vector.extract_strided_slice %198 {offsets = [0, 0], sizes = [6, 207], strides = [1, 1]} : vector<6x256xf32> to vector<6x207xf32>
    %c48_141 = arith.constant 48 : index
    %c49_142 = arith.constant 49 : index
    %218 = vector.load %arg13[%c48_141, %c49_142] : memref<400x256xf32, #tpu.memory_space<vmem>>, vector<6x207xf32>
    tpu.vector_store %arg13[%c48_141, %c49_142], %217 {strides = array<i32>} : memref<400x256xf32, #tpu.memory_space<vmem>>, vector<6x207xf32>,
    %219 = vector.extract_strided_slice %198 {offsets = [0, 0], sizes = [6, 208], strides = [1, 1]} : vector<6x256xf32> to vector<6x208xf32>
    %c54_143 = arith.constant 54 : index
    %c48_144 = arith.constant 48 : index
    %220 = vector.load %arg13[%c54_143, %c48_144] : memref<400x256xf32, #tpu.memory_space<vmem>>, vector<6x208xf32>
    tpu.vector_store %arg13[%c54_143, %c48_144], %219 {strides = array<i32>} : memref<400x256xf32, #tpu.memory_space<vmem>>, vector<6x208xf32>,
    %221 = vector.extract_strided_slice %198 {offsets = [0, 0], sizes = [6, 220], strides = [1, 1]} : vector<6x256xf32> to vector<6x220xf32>
    %c60_145 = arith.constant 60 : index
    %c36_146 = arith.constant 36 : index
    %222 = vector.load %arg13[%c60_145, %c36_146] : memref<400x256xf32, #tpu.memory_space<vmem>>, vector<6x220xf32>
    tpu.vector_store %arg13[%c60_145, %c36_146], %221 {strides = array<i32>} : memref<400x256xf32, #tpu.memory_space<vmem>>, vector<6x220xf32>,
    %223 = vector.extract_strided_slice %198 {offsets = [0, 0], sizes = [6, 221], strides = [1, 1]} : vector<6x256xf32> to vector<6x221xf32>
    %c66_147 = arith.constant 66 : index
    %c35_148 = arith.constant 35 : index
    %224 = vector.load %arg13[%c66_147, %c35_148] : memref<400x256xf32, #tpu.memory_space<vmem>>, vector<6x221xf32>
    tpu.vector_store %arg13[%c66_147, %c35_148], %223 {strides = array<i32>} : memref<400x256xf32, #tpu.memory_space<vmem>>, vector<6x221xf32>,
    %225 = vector.extract_strided_slice %198 {offsets = [0, 0], sizes = [6, 222], strides = [1, 1]} : vector<6x256xf32> to vector<6x222xf32>
    %c72_149 = arith.constant 72 : index
    %c34_150 = arith.constant 34 : index
    %226 = vector.load %arg13[%c72_149, %c34_150] : memref<400x256xf32, #tpu.memory_space<vmem>>, vector<6x222xf32>
    tpu.vector_store %arg13[%c72_149, %c34_150], %225 {strides = array<i32>} : memref<400x256xf32, #tpu.memory_space<vmem>>, vector<6x222xf32>,
    %227 = vector.extract_strided_slice %198 {offsets = [0, 0], sizes = [6, 223], strides = [1, 1]} : vector<6x256xf32> to vector<6x223xf32>
    %c78_151 = arith.constant 78 : index
    %c33_152 = arith.constant 33 : index
    %228 = vector.load %arg13[%c78_151, %c33_152] : memref<400x256xf32, #tpu.memory_space<vmem>>, vector<6x223xf32>
    tpu.vector_store %arg13[%c78_151, %c33_152], %227 {strides = array<i32>} : memref<400x256xf32, #tpu.memory_space<vmem>>, vector<6x223xf32>,
    %229 = vector.extract_strided_slice %198 {offsets = [0, 0], sizes = [6, 224], strides = [1, 1]} : vector<6x256xf32> to vector<6x224xf32>
    %c84_153 = arith.constant 84 : index
    %c32_154 = arith.constant 32 : index
    %230 = vector.load %arg13[%c84_153, %c32_154] : memref<400x256xf32, #tpu.memory_space<vmem>>, vector<6x224xf32>
    tpu.vector_store %arg13[%c84_153, %c32_154], %229 {strides = array<i32>} : memref<400x256xf32, #tpu.memory_space<vmem>>, vector<6x224xf32>,
    %231 = vector.extract_strided_slice %198 {offsets = [0, 0], sizes = [6, 236], strides = [1, 1]} : vector<6x256xf32> to vector<6x236xf32>
    %c90_155 = arith.constant 90 : index
    %c20_156 = arith.constant 20 : index
    %232 = vector.load %arg13[%c90_155, %c20_156] : memref<400x256xf32, #tpu.memory_space<vmem>>, vector<6x236xf32>
    tpu.vector_store %arg13[%c90_155, %c20_156], %231 {strides = array<i32>} : memref<400x256xf32, #tpu.memory_space<vmem>>, vector<6x236xf32>,
    %233 = vector.extract_strided_slice %198 {offsets = [0, 0], sizes = [6, 237], strides = [1, 1]} : vector<6x256xf32> to vector<6x237xf32>
    %c96_157 = arith.constant 96 : index
    %c19_158 = arith.constant 19 : index
    %234 = vector.load %arg13[%c96_157, %c19_158] : memref<400x256xf32, #tpu.memory_space<vmem>>, vector<6x237xf32>
    tpu.vector_store %arg13[%c96_157, %c19_158], %233 {strides = array<i32>} : memref<400x256xf32, #tpu.memory_space<vmem>>, vector<6x237xf32>,
    %235 = vector.extract_strided_slice %198 {offsets = [0, 0], sizes = [6, 238], strides = [1, 1]} : vector<6x256xf32> to vector<6x238xf32>
    %c102_159 = arith.constant 102 : index
    %c18_160 = arith.constant 18 : index
    %236 = vector.load %arg13[%c102_159, %c18_160] : memref<400x256xf32, #tpu.memory_space<vmem>>, vector<6x238xf32>
    tpu.vector_store %arg13[%c102_159, %c18_160], %235 {strides = array<i32>} : memref<400x256xf32, #tpu.memory_space<vmem>>, vector<6x238xf32>,
    %237 = vector.extract_strided_slice %198 {offsets = [0, 0], sizes = [6, 239], strides = [1, 1]} : vector<6x256xf32> to vector<6x239xf32>
    %c108_161 = arith.constant 108 : index
    %c17_162 = arith.constant 17 : index
    %238 = vector.load %arg13[%c108_161, %c17_162] : memref<400x256xf32, #tpu.memory_space<vmem>>, vector<6x239xf32>
    tpu.vector_store %arg13[%c108_161, %c17_162], %237 {strides = array<i32>} : memref<400x256xf32, #tpu.memory_space<vmem>>, vector<6x239xf32>,
    %239 = vector.extract_strided_slice %198 {offsets = [0, 0], sizes = [6, 240], strides = [1, 1]} : vector<6x256xf32> to vector<6x240xf32>
    %c114_163 = arith.constant 114 : index
    %c16_164 = arith.constant 16 : index
    %240 = vector.load %arg13[%c114_163, %c16_164] : memref<400x256xf32, #tpu.memory_space<vmem>>, vector<6x240xf32>
    tpu.vector_store %arg13[%c114_163, %c16_164], %239 {strides = array<i32>} : memref<400x256xf32, #tpu.memory_space<vmem>>, vector<6x240xf32>,
    %241 = vector.extract_strided_slice %198 {offsets = [0, 0], sizes = [6, 252], strides = [1, 1]} : vector<6x256xf32> to vector<6x252xf32>
    %c120_165 = arith.constant 120 : index
    %c4_166 = arith.constant 4 : index
    %242 = vector.load %arg13[%c120_165, %c4_166] : memref<400x256xf32, #tpu.memory_space<vmem>>, vector<6x252xf32>
    tpu.vector_store %arg13[%c120_165, %c4_166], %241 {strides = array<i32>} : memref<400x256xf32, #tpu.memory_space<vmem>>, vector<6x252xf32>,
    %243 = vector.extract_strided_slice %198 {offsets = [0, 0], sizes = [6, 253], strides = [1, 1]} : vector<6x256xf32> to vector<6x253xf32>
    %c126_167 = arith.constant 126 : index
    %c3_168 = arith.constant 3 : index
    %244 = vector.load %arg13[%c126_167, %c3_168] : memref<400x256xf32, #tpu.memory_space<vmem>>, vector<6x253xf32>
    tpu.vector_store %arg13[%c126_167, %c3_168], %243 {strides = array<i32>} : memref<400x256xf32, #tpu.memory_space<vmem>>, vector<6x253xf32>,
    %245 = vector.extract_strided_slice %198 {offsets = [0, 0], sizes = [6, 254], strides = [1, 1]} : vector<6x256xf32> to vector<6x254xf32>
    %c132_169 = arith.constant 132 : index
    %c2_170 = arith.constant 2 : index
    %246 = vector.load %arg13[%c132_169, %c2_170] : memref<400x256xf32, #tpu.memory_space<vmem>>, vector<6x254xf32>
    tpu.vector_store %arg13[%c132_169, %c2_170], %245 {strides = array<i32>} : memref<400x256xf32, #tpu.memory_space<vmem>>, vector<6x254xf32>,
    %247 = vector.extract_strided_slice %198 {offsets = [0, 0], sizes = [6, 255], strides = [1, 1]} : vector<6x256xf32> to vector<6x255xf32>
    %c138_171 = arith.constant 138 : index
    %c1_172 = arith.constant 1 : index
    %248 = vector.load %arg13[%c138_171, %c1_172] : memref<400x256xf32, #tpu.memory_space<vmem>>, vector<6x255xf32>
    tpu.vector_store %arg13[%c138_171, %c1_172], %247 {strides = array<i32>} : memref<400x256xf32, #tpu.memory_space<vmem>>, vector<6x255xf32>,
    %c144_173 = arith.constant 144 : index
    %c0_174 = arith.constant 0 : index
    %249 = vector.load %arg13[%c144_173, %c0_174] : memref<400x256xf32, #tpu.memory_space<vmem>>, vector<6x256xf32>
    tpu.vector_store %arg13[%c144_173, %c0_174], %198 {strides = array<i32>} : memref<400x256xf32, #tpu.memory_space<vmem>>, vector<6x256xf32>,
    %c0_175 = arith.constant 0 : index
    %c0_176 = arith.constant 0 : index
    %250 = vector.load %arg10[%c0_175, %c0_176] : memref<3x150xf32, #tpu.memory_space<vmem>>, vector<3x150xf32>
    %c0_177 = arith.constant 0 : index
    %c0_178 = arith.constant 0 : index
    %251 = vector.load %arg13[%c0_177, %c0_178] : memref<400x256xf32, #tpu.memory_space<vmem>>, vector<150x256xf32>
    %cst_179 = arith.constant dense<0.000000e+00> : vector<3x256xf32>
    %252 = tpu.matmul %250, %251, %cst_179 {dimension_numbers = #tpu.dot_dimension_numbers<[1], [0], [0], [1], [0, 0, 1, 1], [], []>} : vector<3x150xf32>, vector<150x256xf32>, vector<3x256xf32> -> vector<3x256xf32>
    %c0_180 = arith.constant 0 : index
    %c0_181 = arith.constant 0 : index
    %253 = vector.load %arg11[%c0_180, %c0_181] : memref<3x1xf32, #tpu.memory_space<vmem>>, vector<3x1xf32>
    %254 = vector.broadcast %253 : vector<3x1xf32> to vector<3x256xf32>
    %255 = arith.addf %252, %254 : vector<3x256xf32>
    %cst_182 = arith.constant 0.000000e+00 : f32
    %256 = vector.broadcast %cst_182 : f32 to vector<3x256xf32>
    %257 = arith.maximumf %255, %256 : vector<3x256xf32>
    %cst_183 = arith.constant 0.000000e+00 : f32
    %258 = vector.broadcast %cst_183 : f32 to vector<3x256xf32>
    %259 = arith.subf %258, %257 : vector<3x256xf32>
    %260 = math.exp %259 : vector<3x256xf32>
    %cst_184 = arith.constant 1.000000e+00 : f32
    %261 = vector.broadcast %cst_184 : f32 to vector<3x256xf32>
    %262 = arith.addf %261, %260 : vector<3x256xf32>
    %cst_185 = arith.constant 1.000000e+00 : f32
    %263 = vector.broadcast %cst_185 : f32 to vector<3x256xf32>
    %264 = arith.divf %263, %262 : vector<3x256xf32>
    %c0_186 = arith.constant 0 : index
    %c0_187 = arith.constant 0 : index
    %c0_188 = arith.constant 0 : index
    %265 = vector.load %arg12[%c0_186, %c0_187, %c0_188] : memref<1x3x256xf32, #tpu.memory_space<vmem>>, vector<1x3x256xf32>
    %266 = vector.shape_cast %265 : vector<1x3x256xf32> to vector<3x256xf32>
    %267 = vector.shape_cast %264 : vector<3x256xf32> to vector<1x3x256xf32>
    tpu.vector_store %arg12[%c0_186, %c0_187, %c0_188], %267 {strides = array<i32>} : memref<1x3x256xf32, #tpu.memory_space<vmem>>, vector<1x3x256xf32>,
    return
  }
  func.func @transform_0(%arg0: i32) -> (i32, i32, i32) {
    %c0_i32 = arith.constant 0 : i32
    %c0_i32_0 = arith.constant 0 : i32
    %c0_i32_1 = arith.constant 0 : i32
    return %arg0, %c0_i32, %c0_i32_0 : i32, i32, i32
  }
  func.func @transform_1(%arg0: i32) -> (i32, i32) {
    %c0_i32 = arith.constant 0 : i32
    %c0_i32_0 = arith.constant 0 : i32
    %c0_i32_1 = arith.constant 0 : i32
    return %c0_i32, %c0_i32_0 : i32, i32
  }
  func.func @transform_2(%arg0: i32) -> (i32, i32) {
    %c0_i32 = arith.constant 0 : i32
    %c0_i32_0 = arith.constant 0 : i32
    %c0_i32_1 = arith.constant 0 : i32
    return %c0_i32, %c0_i32_0 : i32, i32
  }
  func.func @transform_3(%arg0: i32) -> (i32, i32) {
    %c0_i32 = arith.constant 0 : i32
    %c0_i32_0 = arith.constant 0 : i32
    %c0_i32_1 = arith.constant 0 : i32
    return %c0_i32, %c0_i32_0 : i32, i32
  }
  func.func @transform_4(%arg0: i32) -> (i32, i32) {
    %c0_i32 = arith.constant 0 : i32
    %c0_i32_0 = arith.constant 0 : i32
    %c0_i32_1 = arith.constant 0 : i32
    return %c0_i32, %c0_i32_0 : i32, i32
  }
  func.func @transform_5(%arg0: i32) -> (i32, i32) {
    %c0_i32 = arith.constant 0 : i32
    %c0_i32_0 = arith.constant 0 : i32
    %c0_i32_1 = arith.constant 0 : i32
    return %c0_i32, %c0_i32_0 : i32, i32
  }
  func.func @transform_6(%arg0: i32) -> (i32, i32) {
    %c0_i32 = arith.constant 0 : i32
    %c0_i32_0 = arith.constant 0 : i32
    %c0_i32_1 = arith.constant 0 : i32
    return %c0_i32, %c0_i32_0 : i32, i32
  }
  func.func @transform_7(%arg0: i32) -> (i32, i32) {
    %c0_i32 = arith.constant 0 : i32
    %c0_i32_0 = arith.constant 0 : i32
    %c0_i32_1 = arith.constant 0 : i32
    return %c0_i32, %c0_i32_0 : i32, i32
  }
  func.func @transform_8(%arg0: i32) -> (i32, i32) {
    %c0_i32 = arith.constant 0 : i32
    %c0_i32_0 = arith.constant 0 : i32
    %c0_i32_1 = arith.constant 0 : i32
    return %c0_i32, %c0_i32_0 : i32, i32
  }
  func.func @transform_9(%arg0: i32) -> (i32, i32) {
    %c0_i32 = arith.constant 0 : i32
    %c0_i32_0 = arith.constant 0 : i32
    %c0_i32_1 = arith.constant 0 : i32
    return %c0_i32, %c0_i32_0 : i32, i32
  }
  func.func @transform_10(%arg0: i32) -> (i32, i32) {
    %c0_i32 = arith.constant 0 : i32
    %c0_i32_0 = arith.constant 0 : i32
    %c0_i32_1 = arith.constant 0 : i32
    return %c0_i32, %c0_i32_0 : i32, i32
  }
  func.func @transform_11(%arg0: i32) -> (i32, i32, i32) {
    %c0_i32 = arith.constant 0 : i32
    %c0_i32_0 = arith.constant 0 : i32
    %c0_i32_1 = arith.constant 0 : i32
    return %arg0, %c0_i32, %c0_i32_0 : i32, i32, i32
  }
}

</mosaic_0001>

<bundles_post_ra>
// kernel: autoencoder2_forward.1
= control target key start
LH: loop header
LB: loop body
LE: loop exit
PB: predicated region body
PF: predicated region fallthrough
CT: control target
= control target key end

     0   :  { %s2811_s17 = smov 0   ;;  %s3772_s0 = inlined_call_operand.vmem [shape: f32[2,3,256], index: 0, kind: input, shape index: {}]   ;;  %s3773_s1 = inlined_call_operand.vmem [shape: f32[1,256], index: 1, kind: input, shape index: {}]   ;;  %s3774_s2 = inlined_call_operand.vmem [shape: f32[1,256], index: 2, kind: input, shape index: {}]   ;;  %s3775_s3 = inlined_call_operand.vmem [shape: f32[6,75], index: 3, kind: input, shape index: {}]   ;;  %s3776_s4 = inlined_call_operand.vmem [shape: f32[6,1], index: 4, kind: input, shape index: {}]   ;;  %s3777_s5 = inlined_call_operand.vmem [shape: f32[16,150], index: 5, kind: input, shape index: {}]   ;;  %s3778_s6 = inlined_call_operand.vmem [shape: f32[16,1], index: 6, kind: input, shape index: {}]   ;;  %s3779_s7 = inlined_call_operand.vmem [shape: f32[6,400], index: 7, kind: input, shape index: {}]   ;;  %s3780_s8 = inlined_call_operand.vmem [shape: f32[6,1], index: 8, kind: input, shape index: {}]   ;;  %s3781_s9 = inlined_call_operand.vmem [shape: f32[3,150], index: 9, kind: input, shape index: {}]   ;;  %s3782_s10 = inlined_call_operand.vmem [shape: f32[3,1], index: 10, kind: input, shape index: {}]   ;;  %s3783_s11 = inlined_call_operand.vmem [shape: f32[2,3,256], index: 11, kind: output, shape index: {}]  }
   0x1 LB: > { %s2600_s18 = sadd.s32 4294967295, %s2700_s17   ;;  %p2604_p0 = scmp.ge.s32.totalorder %s2700_s17, 1  ;;  %s2700_s17 = sphi %s2811_s17, %s21_s17  }
   0x2   : > { %p337_p1 = scmp.lt.s32.totalorder %s2700_s17, 3 }
   0x4   : > { %p338_p2 = pnand %p2604_p0, %p337_p1 }
   0x5   : > { %p377_p3 = scmp.lt.s32.totalorder (!%p338_p2), %s2600_s18, 1  ;;  %s2703_s23 = smov (!%p338_p2), 60  }
   0x6   : > { %341 = sbr.rel (%p338_p2) target bundleno = 1823 (0x71f), region = 64  ;;  %s2704_s24 = smov (!%p338_p2), 63  }
   0x7   : > { %s3787_s25 = smov (!%p338_p2), 62   ;;  %s3785_s26 = smov (!%p338_p2), 61  }
   0x8   : > { %s2707_s27 = smov (!%p338_p2), 77   ;;  %s2708_s28 = smov (!%p338_p2), 76  }
   0x9   : > { %s2709_s29 = smov (!%p338_p2), 64   ;;  %s2710_s30 = smov (!%p338_p2), 79  }
   0xa   : > { %s2711_s12 = smov (!%p338_p2), 78   ;;  %s2712_s13 = smov (!%p338_p2), 93  }
   0xb   : > { %vm400_vm0 = vcmask 1042912   ;;  %v2702_v0 = vmov 0.0   ;;  %vm390_vm1 = vcmask 1048032   ;;  %s3982_s18 = smov (!%p377_p3, %s2600_s18), 1  ;;  %s2713_s14 = smov 92   ;;  %v2727_v16 = vmov 0  }
   0xc   : > { %401 = vst.msk [vmem:[#allocation2 + $0x98] sm:$0x7] %vm400_vm0, %v2702_v0  ;;  %804 = vmatprep.mubr.f32.mxu0 %v2702_v0  ;;  %s3784_s19 = sshll.u32 %s3982_s18, 3  ;;  %s2714_s15 = smov 80   ;;  %2682 = vset.pattern.permute.xlu1 %v2727_v16  ;;  %v723_v17 = vld [vmem:[%s3776_s4] sm:$0x3f] }
   0xd   : > { %398 = vst.msk [vmem:[#allocation2 + $0x78] sm:$0xff] %vm390_vm1, %v2702_v0  ;;  %399 = vst.msk [vmem:[#allocation2 + $0x88] sm:$0xff] %vm390_vm1, %v2702_v0  ;;  %s381_s22 = scalar_lea.vmem %s3772_s0, %s3784_s19  ;;  %s3791_s16 = smov 96   ;;  %2681 = vset.pattern.permute.xlu0 %v2727_v16  ;;  %vm695_vm2 = vcmask 490496   ;;  %vm700_vm3 = vcmask 485376   ;;  %vm659_vm4 = vcmask 515072  }
   0xe   : > { %391 = vst.msk [vmem:[#allocation2 + $0x8] sm:$0xff] %vm390_vm1, %v2702_v0  ;;  %392 = vst.msk [vmem:[#allocation2 + $0x18] sm:$0xff] %vm390_vm1, %v2702_v0  ;;  %v2863_v1 = vld [vmem:[%s381_s22] sm:$0x77]  ;;  %s3789_s20 = smov 95   ;;  %s2717_s21 = smov 94  }
   0xf   : > { %393 = vst.msk [vmem:[#allocation2 + $0x28] sm:$0xff] %vm390_vm1, %v2702_v0  ;;  %394 = vst.msk [vmem:[#allocation2 + $0x38] sm:$0xff] %vm390_vm1, %v2702_v0  ;;  %691 = vrot.lane.b32.xlu0 %v2863_v1, %s2703_s23  ;;  %v2869_v2 = vrot.slane %v2863_v1, 1  ;;  %v403_v3 = vcombine.high %v2863_v1, %v2863_v1  ;;  %v477_v5 = vrot.slane %v2863_v1, 6  ;;  %v490_v7 = vrot.slane %v2863_v1, 3  ;;  %s2718_s22 = smov 109  }
  0x10   : > { %395 = vst.msk [vmem:[#allocation2 + $0x48] sm:$0xff] %vm390_vm1, %v2702_v0  ;;  %396 = vst.msk [vmem:[#allocation2 + $0x58] sm:$0xff] %vm390_vm1, %v2702_v0  ;;  %v420_v9 = vrot.slane %v2863_v1, 2  ;;  %v436_v11 = vrot.slane %v2863_v1, 7  ;;  %v449_v13 = vcombine.low %v2863_v1, %v2863_v1  ;;  %v407_v14 = vrot.slane %v2863_v1, 5  ;;  %s3793_s19 = smov 108  }
  0x11   : > { %397 = vst.msk [vmem:[#allocation2 + $0x68] sm:$0xff] %vm390_vm1, %v2702_v0  ;;  %837 = vst.msk [vmem:[#allocation2 + $0xa8] sm:$0xff] %vm390_vm1, %v2702_v0  ;;  %655 = vrot.lane.b32.xlu1 %v2869_v2, %s2704_s24  ;;  %v462_v4 = vrot.slane %v403_v3, 1  ;;  %v478_v6 = vrot.slane %v403_v3, 6  ;;  %v491_v8 = vrot.slane %v403_v3, 3  ;;  %v421_v10 = vrot.slane %v403_v3, 2 }
  0x12   : > { %838 = vst.msk [vmem:[#allocation2 + $0xb8] sm:$0xff] %vm390_vm1, %v2702_v0  ;;  %839 = vst.msk [vmem:[#allocation2 + $0xc8] sm:$0xff] %vm390_vm1, %v2702_v0  ;;  %v437_v12 = vrot.slane %v403_v3, 7  ;;  %v408_v15 = vrot.slane %v403_v3, 5  ;;  %vm664_vm5 = vcmask 515079   ;;  %vm667_vm6 = vcmask 508928  }
  0x13   : > { %840 = vst.msk [vmem:[#allocation2 + $0xd8] sm:$0xff] %vm390_vm1, %v2702_v0  ;;  %841 = vst.msk [vmem:[#allocation2 + $0xe8] sm:$0xff] %vm390_vm1, %v2702_v0  ;;  %693 = vrot.lane.b32.xlu0 %v403_v3, %s2703_s23  ;;  %vm3804_vm7 = vcmask 506880   ;;  %vm678_vm8 = vcmask 503810   ;;  %vm733_vm9 = vcmask 1042432   ;;  %vm3803_vm10 = vcmask 498688  }
  0x14   : > { %842 = vst.msk [vmem:[#allocation2 + $0xf8] sm:$0xff] %vm390_vm1, %v2702_v0  ;;  %843 = vst.msk [vmem:[#allocation2 + $0x108] sm:$0xff] %vm390_vm1, %v2702_v0  ;;  %vm689_vm11 = vcmask 498693   ;;  %vm623_vm12 = vcmask 629760   ;;  %vm628_vm13 = vcmask 629766   ;;  %vm631_vm14 = vcmask 622592  }
  0x15   : > { %844 = vst.msk [vmem:[#allocation2 + $0x118] sm:$0xff] %vm390_vm1, %v2702_v0  ;;  %405 = vst [vmem:[#allocation2] sm:$0x7] %v2863_v1  ;;  %657 = vrot.lane.b32.xlu1 %v462_v4, %s2704_s24  ;;  %vm637_vm15 = vcmask 621568   ;;  %vm642_vm0 = vcmask 617473  }
  0x16   : > { %406 = vst [vmem:[#allocation2 + $0x8] sm:$0x7] %v403_v3 }
  0x17   : > { %669 = vrot.lane.b32.xlu0 %v477_v5, %s3787_s25 }
  0x19   : > { %671 = vrot.lane.b32.xlu1 %v478_v6, %s3787_s25  ;;  %s3797_s25 = smov 111  }
  0x1b   : > { %680 = vrot.lane.b32.xlu0 %v490_v7, %s3785_s26 }
  0x1d   : > { %682 = vrot.lane.b32.xlu1 %v491_v8, %s3785_s26  ;;  %s3795_s26 = smov 112  }
  0x1f   : > { %619 = vrot.lane.b32.xlu0 %v420_v9, %s2707_s27 }
  0x21   : > { %621 = vrot.lane.b32.xlu1 %v421_v10, %s2707_s27 }
  0x23   : > { %633 = vrot.lane.b32.xlu0 %v436_v11, %s2708_s28 }
  0x25   : > { %635 = vrot.lane.b32.xlu1 %v437_v12, %s2708_s28 }
  0x27   : > { %644 = vrot.lane.b32.xlu0 %v449_v13, %s2709_s29 }
  0x29   : > { %646 = vrot.lane.b32.xlu1 %v2863_v1, %s2709_s29 }
  0x2b   : > { %597 = vrot.lane.b32.xlu0 %v2863_v1, %s2710_s30 }
  0x2d   : > { %599 = vrot.lane.b32.xlu1 %v403_v3, %s2710_s30 }
  0x2f   : > { %608 = vrot.lane.b32.xlu0 %v407_v14, %s2711_s12 }
  0x31   : > { %610 = vrot.lane.b32.xlu1 %v408_v15, %s2711_s12 }
  0x33   : > { %561 = vrot.lane.b32.xlu0 %v2869_v2, %s2712_s13 }
  0x35   : > { %563 = vrot.lane.b32.xlu1 %v462_v4, %s2712_s13 }
  0x37   : > { %575 = vrot.lane.b32.xlu0 %v477_v5, %s2713_s14 }
  0x39   : > { %577 = vrot.lane.b32.xlu1 %v478_v6, %s2713_s14 }
  0x3b   : > { %586 = vrot.lane.b32.xlu0 %v490_v7, %s2714_s15 }
  0x3d   : > { %588 = vrot.lane.b32.xlu1 %v491_v8, %s2714_s15 }
  0x3f   : > { %525 = vrot.lane.b32.xlu0 %v420_v9, %s3791_s16 }
  0x41   : > { %527 = vrot.lane.b32.xlu1 %v421_v10, %s3791_s16  ;;  %s3799_s16 = smov 126  }
  0x43   : > { %539 = vrot.lane.b32.xlu0 %v436_v11, %s3789_s20 }
  0x45   : > { %541 = vrot.lane.b32.xlu1 %v437_v12, %s3789_s20  ;;  %s3801_s20 = smov 110  }
  0x47   : > { %550 = vrot.lane.b32.xlu0 %v449_v13, %s2717_s21 }
  0x49   : > { %552 = vrot.lane.b32.xlu1 %v2863_v1, %s2717_s21 }
  0x4b   : > { %503 = vrot.lane.b32.xlu0 %v2863_v1, %s2718_s22 }
  0x4d   : > { %505 = vrot.lane.b32.xlu1 %v403_v3, %s2718_s22 }
  0x4f   : > { %514 = vrot.lane.b32.xlu0 %v407_v14, %s3793_s19 }
  0x51   : > { %516 = vrot.lane.b32.xlu1 %v408_v15, %s3793_s19  ;;  %s3817_s19 = smov 125  }
  0x53   : > { %463 = vrot.lane.b32.xlu0 %v2869_v2, %s3795_s26 }
  0x55   : > { %465 = vrot.lane.b32.xlu1 %v462_v4, %s3795_s26  ;;  %s2725_s26 = smov 124  }
  0x57   : > { %479 = vrot.lane.b32.xlu0 %v477_v5, %s3797_s25 }
  0x59   : > { %481 = vrot.lane.b32.xlu1 %v478_v6, %s3797_s25  ;;  %s3815_s25 = smov 127  }
  0x5b   : > { %492 = vrot.lane.b32.xlu0 %v490_v7, %s3801_s20 }
  0x5d   : > { %494 = vrot.lane.b32.xlu1 %v491_v8, %s3801_s20  ;;  %s2734_s20 = smov 68  }
  0x5f   : > { %422 = vrot.lane.b32.xlu0 %v420_v9, %s3799_s16 }
  0x61   : > { %424 = vrot.lane.b32.xlu1 %v421_v10, %s3799_s16  ;;  %s3843_s16 = smov 67  }
  0x63   : > { %438 = vrot.lane.b32.xlu0 %v436_v11, %s3817_s19 }
  0x65   : > { %440 = vrot.lane.b32.xlu1 %v437_v12, %s3817_s19  ;;  %s3888_s19 = smov 96  }
  0x67   : > { %450 = vrot.lane.b32.xlu0 %v449_v13, %s2725_s26 }
  0x69   : > { %452 = vrot.lane.b32.xlu1 %v2863_v1, %s2725_s26 }
  0x6b   : > { %409 = vrot.lane.b32.xlu0 %v407_v14, %s3815_s25 }
  0x6d   : > { %411 = vrot.lane.b32.xlu1 %v408_v15, %s3815_s25  ;;  %s3891_s25 = smov 111  }
  0x6f   : > { %726 = vperm.xlu0 %2681, %v723_v17  }
  0x81   : > { %v692_v18 = vpop.permute.xlu0 %691 }
  0x83   : > { %v656_v19 = vpop.permute.xlu1 %655 }
  0x85   : > { %v694_v20 = vpop.permute.xlu0 %693 }
  0x86   : > { %v696_v21 = vsel %vm695_vm2, %v692_v18, %v694_v20  ;;  %701 = vst.msk [vmem:[#allocation2 + $0x98] sm:$0x7] %vm700_vm3, %v694_v20  ;;  %vm648_vm3 = vcmask 523264  }
  0x87   : > { %699 = vst [vmem:[#allocation2 + $0x90] sm:$0x7] %v696_v21  ;;  %v658_v22 = vpop.permute.xlu1 %657 }
  0x88   : > { %v660_v23 = vsel %vm659_vm4, %v656_v19, %v658_v22  ;;  %665 = vst.msk [vmem:[#allocation2 + $0x78] sm:$0x80] %vm664_vm5, %v658_v22  ;;  %vm653_vm5 = vcmask 522244  }
  0x89   : > { %668 = vst.msk [vmem:[#allocation2 + $0x88] sm:$0x3] %vm667_vm6, %v658_v22  ;;  %663 = vst [vmem:[#allocation2 + $0x80] ss:$-12 sps:$4 sm:$0x83] %v660_v23   ;;  %v670_v24 = vpop.permute.xlu0 %669  ;;  %vm601_vm6 = vcmask 646144  }
  0x8b   : > { %v672_v25 = vpop.permute.xlu1 %671 }
  0x8c   : > { %v674_v26 = vsel %vm3804_vm7, %v670_v24, %v672_v25  ;;  %679 = vst.msk [vmem:[#allocation2 + $0x88] sm:$0x1c] %vm678_vm8, %v672_v25  ;;  %vm606_vm8 = vcmask 641024   ;;  %vm537_vm7 = vcmask 778240  }
  0x8d   : > { %677 = vst [vmem:[#allocation2 + $0x80] sm:$0x1c] %v674_v26  ;;  %v722_v27 = vld [vmem:[#allocation2 + $0x98] sm:$0x7]  ;;  %v681_v28 = vpop.permute.xlu0 %680 }
  0x8e   : > { %2609 = vmatprep.subr.msk.mxu0 %vm733_vm9, %v722_v27  ;;  %836 = vst.msk [vmem:[#allocation2 + $0x98] sm:$0xff] %vm390_vm1, %v2702_v0  ;;  %v721_v29 = vld [vmem:[#allocation2 + $0x90] sm:$0x7] }
  0x8f   : > { %2610 = vmatpush1.msk.msra.mxu0 %vm733_vm9, %v721_v29  ;;  %v683_v30 = vpop.permute.xlu1 %682  ;;  %vm3813_vm9 = vcmask 637952  }
  0x90   : > { %v685_v31 = vsel %vm3803_vm10, %v681_v28, %v683_v30  ;;  %690 = vst.msk [vmem:[#allocation2 + $0x88] sm:$0xe0] %vm689_vm11, %v683_v30  ;;  %vm617_vm11 = vcmask 635907   ;;  %vm534_vm10 = vcmask 785414  }
  0x91   : > { %688 = vst [vmem:[#allocation2 + $0x80] sm:$0xe0] %v685_v31  ;;  %v620_v32 = vpop.permute.xlu0 %619 }
  0x93   : > { %v622_v33 = vpop.permute.xlu1 %621 }
  0x94   : > { %v624_v34 = vsel %vm623_vm12, %v620_v32, %v622_v33  ;;  %629 = vst.msk [vmem:[#allocation2 + $0x68] sm:$0xc0] %vm628_vm13, %v622_v33  ;;  %vm3805_vm13 = vcmask 760832  }
  0x95   : > { %632 = vst.msk [vmem:[#allocation2 + $0x78] sm:$0x1] %vm631_vm14, %v622_v33  ;;  %627 = vst [vmem:[#allocation2 + $0x70] ss:$-12 sps:$4 sm:$0xc1] %v624_v34   ;;  %v634_v35 = vpop.permute.xlu0 %633  ;;  %vm570_vm14 = vcmask 760839  }
  0x97   : > { %v636_v36 = vpop.permute.xlu1 %635  ;;  %v720_v37 = vld [vmem:[#allocation2 + $0x88] sm:$0xff] }
  0x98   : > { %v638_v38 = vsel %vm637_vm15, %v634_v35, %v636_v36  ;;  %643 = vst.msk [vmem:[#allocation2 + $0x78] sm:$0xe] %vm642_vm0, %v636_v36  ;;  %754 = vmatprep.subr.mxu0 %v720_v37  ;;  %v719_v39 = vld [vmem:[#allocation2 + $0x80] sm:$0xff]  ;;  %vm573_vm0 = vcmask 754688  }
  0x99   : > { %835 = vst.msk [vmem:[#allocation2 + $0x88] sm:$0xff] %vm390_vm1, %v2702_v0  ;;  %641 = vst [vmem:[#allocation2 + $0x70] sm:$0xe] %v638_v38  ;;  %755 = vmatpush1.msra.mxu0 %v719_v39  ;;  %v645_v40 = vpop.permute.xlu0 %644 }
  0x9b   : > { %v647_v41 = vpop.permute.xlu1 %646 }
  0x9c   : > { %v649_v42 = vsel %vm648_vm3, %v645_v40, %v647_v41  ;;  %654 = vst.msk [vmem:[#allocation2 + $0x78] sm:$0x70] %vm653_vm5, %v647_v41  ;;  %vm3811_vm5 = vcmask 752640  }
  0x9d   : > { %652 = vst [vmem:[#allocation2 + $0x70] sm:$0x70] %v649_v42  ;;  %v598_v43 = vpop.permute.xlu0 %597 }
  0x9f   : > { %v600_v44 = vpop.permute.xlu1 %599 }
  0xa0   : > { %v602_v45 = vsel %vm601_vm6, %v598_v43, %v600_v44  ;;  %607 = vst.msk [vmem:[#allocation2 + $0x68] sm:$0x7] %vm606_vm8, %v600_v44  ;;  %vm584_vm8 = vcmask 749570  }
  0xa1   : > { %605 = vst [vmem:[#allocation2 + $0x60] sm:$0x7] %v602_v45  ;;  %v609_v46 = vpop.permute.xlu0 %608 }
  0xa3   : > { %v611_v47 = vpop.permute.xlu1 %610  ;;  %v718_v48 = vld [vmem:[#allocation2 + $0x78] sm:$0xff] }
  0xa4   : > { %v613_v49 = vsel %vm3813_vm9, %v609_v46, %v611_v47  ;;  %618 = vst.msk [vmem:[#allocation2 + $0x68] sm:$0x38] %vm617_vm11, %v611_v47  ;;  %756 = vmatprep.subr.mxu0 %v718_v48  ;;  %v717_v50 = vld [vmem:[#allocation2 + $0x70] sm:$0xff]  ;;  %vm3808_vm11 = vcmask 654336   ;;  %vm447_vm9 = vcmask 1018881  }
  0xa5   : > { %834 = vst.msk [vmem:[#allocation2 + $0x78] sm:$0xff] %vm390_vm1, %v2702_v0  ;;  %616 = vst [vmem:[#allocation2 + $0x60] sm:$0x38] %v613_v49  ;;  %757 = vmatpush1.msra.mxu0 %v717_v50  ;;  %v562_v51 = vpop.permute.xlu0 %561  ;;  %v702_v47 = vld [vmem:[%s3775_s3] sm:$0x3f]  ;;  %v815_v49 = vlaneseq }
  0xa6   : > { %v387_v50 = vld [vmem:[%s3773_s1] sm:$0x3] }
  0xa7   : > { %v564_v52 = vpop.permute.xlu1 %563 }
  0xa8   : > { %v566_v53 = vsel %vm3805_vm13, %v562_v51, %v564_v52  ;;  %571 = vst.msk [vmem:[#allocation2 + $0x48] sm:$0x80] %vm570_vm14, %v564_v52  ;;  %vm595_vm14 = vcmask 654341   ;;  %vm548_vm13 = vcmask 773121   ;;  %v2990_v51 = vshrl.u32 %v815_v49, 7 }
  0xa9   : > { %574 = vst.msk [vmem:[#allocation2 + $0x58] sm:$0x3] %vm573_vm0, %v564_v52  ;;  %569 = vst [vmem:[#allocation2 + $0x50] ss:$-12 sps:$4 sm:$0x83] %v566_v53   ;;  %v576_v54 = vpop.permute.xlu0 %575  ;;  %vm3806_vm0 = vcmask 785408  }
  0xaa   : > { %v817_v52 = vsub.s32 0, %v2990_v51 }
  0xab   : > { %v578_v55 = vpop.permute.xlu1 %577  ;;  %v716_v56 = vld [vmem:[#allocation2 + $0x68] sm:$0xff] }
  0xac   : > { %v580_v57 = vsel %vm3811_vm5, %v576_v54, %v578_v55  ;;  %585 = vst.msk [vmem:[#allocation2 + $0x58] sm:$0x1c] %vm584_vm8, %v578_v55  ;;  %758 = vmatprep.subr.mxu0 %v716_v56  ;;  %v715_v58 = vld [vmem:[#allocation2 + $0x60] sm:$0xff]  ;;  %vm3807_vm8 = vcmask 777216   ;;  %vm431_vm5 = vcmask 1031174   ;;  %v821_v54 = vsub.s32 1, %v2990_v51 }
  0xad   : > { %833 = vst.msk [vmem:[#allocation2 + $0x68] sm:$0xff] %vm390_vm1, %v2702_v0  ;;  %583 = vst [vmem:[#allocation2 + $0x50] sm:$0x1c] %v580_v57  ;;  %759 = vmatpush1.msra.mxu0 %v715_v58  ;;  %v587_v59 = vpop.permute.xlu0 %586 }
  0xaf   : > { %v589_v60 = vpop.permute.xlu1 %588 }
  0xb0   : > { %v591_v61 = vsel %vm3808_vm11, %v587_v59, %v589_v60  ;;  %596 = vst.msk [vmem:[#allocation2 + $0x58] sm:$0xe0] %vm595_vm14, %v589_v60  ;;  %vm554_vm14 = vcmask 769024   ;;  %vm472_vm11 = vcmask 916487  }
  0xb1   : > { %594 = vst [vmem:[#allocation2 + $0x50] sm:$0xe0] %v591_v61  ;;  %v526_v62 = vpop.permute.xlu0 %525 }
  0xb3   : > { %v528_v63 = vpop.permute.xlu1 %527 }
  0xb4   : > { %v530_v1 = vsel %vm3806_vm0, %v526_v62, %v528_v63  ;;  %535 = vst.msk [vmem:[#allocation2 + $0x38] sm:$0xc0] %vm534_vm10, %v528_v63  ;;  %vm559_vm10 = vcmask 768004   ;;  %vm512_vm0 = vcmask 886784  }
  0xb5   : > { %538 = vst.msk [vmem:[#allocation2 + $0x48] sm:$0x1] %vm537_vm7, %v528_v63  ;;  %533 = vst [vmem:[#allocation2 + $0x40] ss:$-12 sps:$4 sm:$0xc1] %v530_v1   ;;  %v540_v2 = vpop.permute.xlu0 %539  ;;  %vm507_vm7 = vcmask 891904  }
  0xb7   : > { %v542_v3 = vpop.permute.xlu1 %541  ;;  %v714_v4 = vld [vmem:[#allocation2 + $0x58] sm:$0xff] }
  0xb8   : > { %v544_v5 = vsel %vm3807_vm8, %v540_v2, %v542_v3  ;;  %549 = vst.msk [vmem:[#allocation2 + $0x48] sm:$0xe] %vm548_vm13, %v542_v3  ;;  %760 = vmatprep.subr.mxu0 %v714_v4  ;;  %v713_v6 = vld [vmem:[#allocation2 + $0x50] sm:$0xff]  ;;  %vm3809_vm13 = vcmask 883712   ;;  %vm523_vm8 = vcmask 881667  }
  0xb9   : > { %832 = vst.msk [vmem:[#allocation2 + $0x58] sm:$0xff] %vm390_vm1, %v2702_v0  ;;  %547 = vst [vmem:[#allocation2 + $0x40] sm:$0xe] %v544_v5  ;;  %761 = vmatpush1.msra.mxu0 %v713_v6  ;;  %v551_v7 = vpop.permute.xlu0 %550 }
  0xbb   : > { %v553_v8 = vpop.permute.xlu1 %552 }
  0xbc   : > { %v555_v9 = vsel %vm554_vm14, %v551_v7, %v553_v8  ;;  %560 = vst.msk [vmem:[#allocation2 + $0x48] sm:$0x70] %vm559_vm10, %v553_v8  ;;  %vm3810_vm10 = vcmask 916480  }
  0xbd   : > { %558 = vst [vmem:[#allocation2 + $0x40] sm:$0x70] %v555_v9  ;;  %v504_v10 = vpop.permute.xlu0 %503  ;;  %v1176_v9 = vld [vmem:[%s3778_s6 + $0x8] sm:$0xff] }
  0xbf   : > { %v506_v11 = vpop.permute.xlu1 %505 }
  0xc0   : > { %v508_v12 = vsel %vm507_vm7, %v504_v10, %v506_v11  ;;  %513 = vst.msk [vmem:[#allocation2 + $0x38] sm:$0x7] %vm512_vm0, %v506_v11  ;;  %vm475_vm0 = vcmask 910336   ;;  %v1134_v10 = vld [vmem:[%s3777_s5 + $0x8] sm:$0xff]  ;;  %v1175_v11 = vld [vmem:[%s3778_s6] sm:$0xff] }
  0xc1   : > { %511 = vst [vmem:[#allocation2 + $0x30] sm:$0x7] %v508_v12  ;;  %v515_v13 = vpop.permute.xlu0 %514 }
  0xc3   : > { %v517_v14 = vpop.permute.xlu1 %516  ;;  %v712_v15 = vld [vmem:[#allocation2 + $0x48] sm:$0xff] }
  0xc4   : > { %v519_v17 = vsel %vm3809_vm13, %v515_v13, %v517_v14  ;;  %524 = vst.msk [vmem:[#allocation2 + $0x38] sm:$0x38] %vm523_vm8, %v517_v14  ;;  %762 = vmatprep.subr.mxu0 %v712_v15  ;;  %v711_v18 = vld [vmem:[#allocation2 + $0x40] sm:$0xff]  ;;  %vm3812_vm13 = vcmask 908288   ;;  %vm488_vm8 = vcmask 905218  }
  0xc5   : > { %831 = vst.msk [vmem:[#allocation2 + $0x48] sm:$0xff] %vm390_vm1, %v2702_v0  ;;  %522 = vst [vmem:[#allocation2 + $0x30] sm:$0x38] %v519_v17  ;;  %763 = vmatpush1.msra.mxu0 %v711_v18  ;;  %v464_v19 = vpop.permute.xlu0 %463 }
  0xc7   : > { %v466_v20 = vpop.permute.xlu1 %465 }
  0xc8   : > { %v468_v21 = vsel %vm3810_vm10, %v464_v19, %v466_v20  ;;  %473 = vst.msk [vmem:[#allocation2 + $0x18] sm:$0x80] %vm472_vm11, %v466_v20  ;;  %vm496_vm10 = vcmask 900096   ;;  %vm501_vm11 = vcmask 900101  }
  0xc9   : > { %476 = vst.msk [vmem:[#allocation2 + $0x28] sm:$0x3] %vm475_vm0, %v466_v20  ;;  %471 = vst [vmem:[#allocation2 + $0x20] ss:$-12 sps:$4 sm:$0x83] %v468_v21   ;;  %v480_v22 = vpop.permute.xlu0 %479  ;;  %vm3814_vm0 = vcmask 1031168  }
  0xcb   : > { %v482_v23 = vpop.permute.xlu1 %481  ;;  %v710_v24 = vld [vmem:[#allocation2 + $0x38] sm:$0xff] }
  0xcc   : > { %v484_v25 = vsel %vm3812_vm13, %v480_v22, %v482_v23  ;;  %489 = vst.msk [vmem:[#allocation2 + $0x28] sm:$0x1c] %vm488_vm8, %v482_v23  ;;  %764 = vmatprep.subr.mxu0 %v710_v24  ;;  %v709_v26 = vld [vmem:[#allocation2 + $0x30] sm:$0xff]  ;;  %vm434_vm13 = vcmask 1024000   ;;  %vm442_vm8 = vcmask 1022976  }
  0xcd   : > { %830 = vst.msk [vmem:[#allocation2 + $0x38] sm:$0xff] %vm390_vm1, %v2702_v0  ;;  %487 = vst [vmem:[#allocation2 + $0x20] sm:$0x1c] %v484_v25  ;;  %765 = vmatpush1.msra.mxu0 %v709_v26  ;;  %v493_v27 = vpop.permute.xlu0 %492 }
  0xcf   : > { %v495_v28 = vpop.permute.xlu1 %494 }
  0xd0   : > { %v497_v29 = vsel %vm496_vm10, %v493_v27, %v495_v28  ;;  %502 = vst.msk [vmem:[#allocation2 + $0x28] sm:$0xe0] %vm501_vm11, %v495_v28  ;;  %vm454_vm11 = vcmask 1014784  }
  0xd1   : > { %500 = vst [vmem:[#allocation2 + $0x20] sm:$0xe0] %v497_v29  ;;  %v423_v30 = vpop.permute.xlu0 %422 }
  0xd3   : > { %v425_v31 = vpop.permute.xlu1 %424 }
  0xd4   : > { %v427_v32 = vsel %vm3814_vm0, %v423_v30, %v425_v31  ;;  %432 = vst.msk [vmem:[#allocation2 + $0x8] sm:$0xc0] %vm431_vm5, %v425_v31  ;;  %vm459_vm5 = vcmask 1013764   ;;  %vm418_vm0 = vcmask 1037315  }
  0xd5   : > { %435 = vst.msk [vmem:[#allocation2 + $0x18] sm:$0x1] %vm434_vm13, %v425_v31  ;;  %430 = vst [vmem:[#allocation2 + $0x10] ss:$-12 sps:$4 sm:$0xc1] %v427_v32   ;;  %v439_v33 = vpop.permute.xlu0 %438  ;;  %vm413_vm13 = vcmask 1039360  }
  0xd7   : > { %v441_v34 = vpop.permute.xlu1 %440  ;;  %v708_v35 = vld [vmem:[#allocation2 + $0x28] sm:$0xff] }
  0xd8   : > { %v443_v36 = vsel %vm442_vm8, %v439_v33, %v441_v34  ;;  %448 = vst.msk [vmem:[#allocation2 + $0x18] sm:$0xe] %vm447_vm9, %v441_v34  ;;  %766 = vmatprep.subr.mxu0 %v708_v35  ;;  %v707_v37 = vld [vmem:[#allocation2 + $0x20] sm:$0xff]  ;;  %vm729_vm9 = vcmask 613376  }
  0xd9   : > { %829 = vst.msk [vmem:[#allocation2 + $0x28] sm:$0xff] %vm390_vm1, %v2702_v0  ;;  %446 = vst [vmem:[#allocation2 + $0x10] sm:$0xe] %v443_v36  ;;  %767 = vmatpush1.msra.mxu0 %v707_v37  ;;  %v451_v38 = vpop.permute.xlu0 %450 }
  0xdb   : > { %v453_v39 = vpop.permute.xlu1 %452 }
  0xdc   : > { %v455_v40 = vsel %vm454_vm11, %v451_v38, %v453_v39  ;;  %460 = vst.msk [vmem:[#allocation2 + $0x18] sm:$0x70] %vm459_vm5, %v453_v39 }
  0xdd   : > { %458 = vst [vmem:[#allocation2 + $0x10] sm:$0x70] %v455_v40  ;;  %v410_v41 = vpop.permute.xlu0 %409 }
  0xdf   : > { %v412_v42 = vpop.permute.xlu1 %411 }
  0xe0   : > { %v414_v43 = vsel %vm413_vm13, %v410_v41, %v412_v42  ;;  %419 = vst.msk [vmem:[#allocation2 + $0x8] sm:$0x38] %vm418_vm0, %v412_v42  ;;  %vm813_vm0 = vcmp.ne.f32.partialorder %v387_v50, 0.0 }
  0xe1   : > { %417 = vst [vmem:[#allocation2] sm:$0x38] %v414_v43  ;;  %v814_v53 = vsel %vm813_vm0, 1, %v2727_v16  ;;  %vm3821_vm0 = vcmask 179200  }
  0xe2   : > { %v2997_v56 = vrot.slane %v814_v53, %v817_v52  ;;  %v3001_v58 = vrot.slane %v814_v53, %v821_v54  ;;  %2614 = vmatprep.mubr.msk.f32.mxu1 %vm3821_vm0, %v1134_v10  ;;  %vm947_vm0 = vcmask 889856  }
  0xe3   : > { %v706_v44 = vld [vmem:[#allocation2 + $0x18] sm:$0xff] }
  0xe4   : > { %768 = vmatprep.subr.mxu0 %v706_v44  ;;  %828 = vst.msk [vmem:[#allocation2 + $0x18] sm:$0xff] %vm390_vm1, %v2702_v0  ;;  %v705_v45 = vld [vmem:[#allocation2 + $0x10] sm:$0xff]  ;;  %vm3819_vm5 = vcmp.eq.s32.totalorder %v3001_v58, 1 }
  0xe5   : > { %769 = vmatpush1.msra.mxu0 %v705_v45 }
  0xe7   : > { %v704_v46 = vld [vmem:[#allocation2 + $0x8] sm:$0xff] }
  0xe8   : > { %770 = vmatprep.subr.mxu0 %v704_v46  ;;  %827 = vst.msk [vmem:[#allocation2 + $0x8] sm:$0xff] %vm390_vm1, %v2702_v0  ;;  %v703_v48 = vld [vmem:[#allocation2] sm:$0xff]  ;;  %vm3820_vm1 = vcmp.eq.s32.totalorder %v2997_v56, 1 }
  0xe9   : > { %771 = vmatpush1.msra.mxu0 %v703_v48 }
  0xea   : > { %2611 = vmatmul.mubr.msk.f32.vlgmr.msra.gmra.mxu0 %vm729_vm9, %v702_v47  ;;  %v727_v55 = vpop.permute.xlu0 %726  ;;  %vm845_vm9 = vcmask 1045984  }
  0xeb   : > { %846 = vst.msk [vmem:[#allocation2 + $0x128] sm:$0x3f] %vm845_vm9, %v2702_v0  ;;  %vm1085_vm9 = vcmask 521216  }
 0x1aa   : > { %v806_v57 = vpop.f32.mrf.mxu0 }
 0x1ab   : > { %v807_v59 = vadd.f32 %v806_v57, %v727_v55 }
 0x1ac   : > { %v808_v60 = vpop.f32.mrf.mxu0 }
 0x1ad   : > { %v811_v61 = vmax.f32 %v807_v59, 0.0  ;;  %v809_v62 = vadd.f32 %v808_v60, %v727_v55 }
 0x1af   : > { %v825_v63 = vsel %vm3820_vm1, %v811_v61, 0.0  ;;  %v812_v1 = vmax.f32 %v809_v62, 0.0  ;;  %vm993_vm1 = vcmask 766976  }
 0x1b0   : > { %847 = vst [vmem:[#allocation2] sm:$0x3f] %v825_v63  ;;  %1031 = vrot.lane.b32.xlu0 %v825_v63, %s2710_s30  ;;  %1077 = vrot.lane.b32.xlu1 %v825_v63, %s2709_s29  ;;  %v851_v3 = vrot.slane %v825_v63, 2  ;;  %v866_v4 = vrot.slane %v825_v63, 4  ;;  %v881_v6 = vrot.slane %v825_v63, 6 }
 0x1b1   : > { %v826_v2 = vsel %vm3819_vm5, %v812_v1, 0.0  ;;  %vm1039_vm5 = vcmask 644096  }
 0x1b2   : > { %848 = vst [vmem:[#allocation2 + $0x8] sm:$0x3f] %v826_v2  ;;  %v852_v5 = vrot.slane %v826_v2, 2  ;;  %v867_v7 = vrot.slane %v826_v2, 4  ;;  %v882_v8 = vrot.slane %v826_v2, 6 }
 0x1b4   : > { %985 = vrot.lane.b32.xlu0 %v825_v63, %s2717_s21  ;;  %1079 = vrot.lane.b32.xlu1 %v826_v2, %s2709_s29 }
 0x1b8   : > { %939 = vrot.lane.b32.xlu0 %v825_v63, %s2718_s22  ;;  %1033 = vrot.lane.b32.xlu1 %v826_v2, %s2710_s30  ;;  %s3895_s30 = smov 125  }
 0x1bc   : > { %893 = vrot.lane.b32.xlu0 %v825_v63, %s2725_s26  ;;  %987 = vrot.lane.b32.xlu1 %v826_v2, %s2717_s21  ;;  %s3847_s21 = smov 65  }
 0x1c0   : > { %1123 = vrot.lane.b32.xlu0 %v825_v63, %s2703_s23  ;;  %941 = vrot.lane.b32.xlu1 %v826_v2, %s2718_s22  ;;  %s3851_s22 = smov 66  }
 0x1c4   : > { %895 = vrot.lane.b32.xlu1 %v826_v2, %s2725_s26  ;;  %1087 = vrot.lane.b32.xlu0 %v851_v3, %s2704_s24  ;;  %s3892_s26 = smov 110  }
 0x1c8   : > { %1125 = vrot.lane.b32.xlu1 %v826_v2, %s2703_s23  ;;  %1054 = vrot.lane.b32.xlu0 %v866_v4, %s2707_s27  ;;  %s3889_s23 = smov 95  }
 0x1cc   : > { %1089 = vrot.lane.b32.xlu1 %v852_v5, %s2704_s24  ;;  %1067 = vrot.lane.b32.xlu0 %v881_v6, %s2708_s28  ;;  %s3890_s24 = smov 108  }
 0x1d0   : > { %1056 = vrot.lane.b32.xlu1 %v867_v7, %s2707_s27  ;;  %1041 = vrot.lane.b32.xlu0 %v851_v3, %s2711_s12  ;;  %s3893_s27 = smov 112  }
 0x1d4   : > { %1069 = vrot.lane.b32.xlu1 %v882_v8, %s2708_s28  ;;  %1008 = vrot.lane.b32.xlu0 %v866_v4, %s2713_s14  ;;  %s3894_s28 = smov 126  }
 0x1d8   : > { %1043 = vrot.lane.b32.xlu1 %v852_v5, %s2711_s12  ;;  %1021 = vrot.lane.b32.xlu0 %v881_v6, %s2714_s15  ;;  %s3896_s12 = smov 127  }
 0x1dc   : > { %1010 = vrot.lane.b32.xlu1 %v867_v7, %s2713_s14  ;;  %995 = vrot.lane.b32.xlu0 %v851_v3, %s2712_s13  ;;  %s3898_s14 = smov 61  }
 0x1e0   : > { %1023 = vrot.lane.b32.xlu1 %v882_v8, %s2714_s15  ;;  %962 = vrot.lane.b32.xlu0 %v866_v4, %s3888_s19  ;;  %s3855_s15 = smov 52  }
 0x1e4   : > { %997 = vrot.lane.b32.xlu1 %v852_v5, %s2712_s13  ;;  %975 = vrot.lane.b32.xlu0 %v881_v6, %s3889_s23  ;;  %s3897_s13 = smov 62  }
 0x1e8   : > { %964 = vrot.lane.b32.xlu1 %v867_v7, %s3888_s19  ;;  %949 = vrot.lane.b32.xlu0 %v851_v3, %s3890_s24  ;;  %s3835_s19 = smov 1  }
 0x1ec   : > { %977 = vrot.lane.b32.xlu1 %v882_v8, %s3889_s23  ;;  %916 = vrot.lane.b32.xlu0 %v866_v4, %s3891_s25  ;;  %s3875_s23 = smov 20  }
 0x1f0   : > { %951 = vrot.lane.b32.xlu1 %v852_v5, %s3890_s24  ;;  %929 = vrot.lane.b32.xlu0 %v881_v6, %s3892_s26  ;;  %s3839_s24 = smov 2  }
 0x1f4   : > { %918 = vrot.lane.b32.xlu1 %v867_v7, %s3891_s25  ;;  %903 = vrot.lane.b32.xlu0 %v851_v3, %s3893_s27  ;;  %s2738_s25 = smov 32  }
 0x1f8   : > { %931 = vrot.lane.b32.xlu1 %v882_v8, %s3892_s26  ;;  %868 = vrot.lane.b32.xlu0 %v866_v4, %s3894_s28  ;;  %s2739_s26 = smov 3  }
 0x1fc   : > { %905 = vrot.lane.b32.xlu1 %v852_v5, %s3893_s27  ;;  %883 = vrot.lane.b32.xlu0 %v881_v6, %s3895_s30  ;;  %s3822_s27 = smov 33  }
 0x200   : > { %870 = vrot.lane.b32.xlu1 %v867_v7, %s3894_s28  ;;  %853 = vrot.lane.b32.xlu0 %v851_v3, %s3896_s12  ;;  %s3824_s28 = smov 4  }
 0x204   : > { %885 = vrot.lane.b32.xlu1 %v882_v8, %s3895_s30  ;;  %1100 = vrot.lane.b32.xlu0 %v866_v4, %s3897_s13  ;;  %s3826_s30 = smov 34  }
 0x208   : > { %855 = vrot.lane.b32.xlu1 %v852_v5, %s3896_s12  ;;  %1113 = vrot.lane.b32.xlu0 %v881_v6, %s3898_s14  ;;  %s3828_s12 = smov 16  }
 0x20c   : > { %1102 = vrot.lane.b32.xlu1 %v867_v7, %s3897_s13  ;;  %1184 = vperm.xlu0 %2681, %v1176_v9   ;;  %s3867_s13 = smov 50  }
 0x210   : > { %1115 = vrot.lane.b32.xlu1 %v882_v8, %s3898_s14  ;;  %s3869_s14 = smov 51  }
 0x214   : > { %1179 = vperm.xlu1 %2682, %v1175_v11  }
 0x222   : > { %v1032_v12 = vpop.permute.xlu0 %1031  ;;  %v1078_v13 = vpop.permute.xlu1 %1077 }
 0x226   : > { %v986_v14 = vpop.permute.xlu0 %985  ;;  %v1080_v15 = vpop.permute.xlu1 %1079 }
 0x227   : > { %v1081_v17 = vsel %vm648_vm3, %v1078_v13, %v1080_v15  ;;  %1086 = vst.msk [vmem:[#allocation2 + $0xf8] sm:$0x3f] %vm1085_vm9, %v1080_v15  ;;  %vm901_vm9 = vcmask 1012736  }
 0x228   : > { %1084 = vst [vmem:[#allocation2 + $0xf0] sm:$0x3f] %v1081_v17 }
 0x22a   : > { %v940_v18 = vpop.permute.xlu0 %939  ;;  %v1034_v19 = vpop.permute.xlu1 %1033 }
 0x22b   : > { %v1035_v20 = vsel %vm601_vm6, %v1032_v12, %v1034_v19  ;;  %1040 = vst.msk [vmem:[#allocation2 + $0xc8] sm:$0x3f] %vm1039_vm5, %v1034_v19  ;;  %vm1131_vm6 = vcmask 488448   ;;  %vm1052_vm5 = vcmask 633856  }
 0x22c   : > { %1038 = vst [vmem:[#allocation2 + $0xc0] sm:$0x3f] %v1035_v20 }
 0x22e   : > { %v894_v21 = vpop.permute.xlu0 %893  ;;  %v988_v22 = vpop.permute.xlu1 %987 }
 0x22f   : > { %v989_v23 = vsel %vm554_vm14, %v986_v14, %v988_v22  ;;  %994 = vst.msk [vmem:[#allocation2 + $0x98] sm:$0x3f] %vm993_vm1, %v988_v22  ;;  %vm1095_vm14 = vcmask 515078   ;;  %vm1098_vm1 = vcmask 510976  }
 0x230   : > { %992 = vst [vmem:[#allocation2 + $0x90] sm:$0x3f] %v989_v23 }
 0x232   : > { %v1124_v24 = vpop.permute.xlu0 %1123  ;;  %v942_v25 = vpop.permute.xlu1 %941 }
 0x233   : > { %v943_v26 = vsel %vm507_vm7, %v940_v18, %v942_v25  ;;  %948 = vst.msk [vmem:[#allocation2 + $0x68] sm:$0x3f] %vm947_vm0, %v942_v25  ;;  %vm1062_vm7 = vcmask 629764   ;;  %vm3899_vm0 = vcmask 637952  }
 0x234   : > { %946 = vst [vmem:[#allocation2 + $0x60] sm:$0x3f] %v943_v26 }
 0x236   : > { %v896_v27 = vpop.permute.xlu1 %895  ;;  %v1088_v28 = vpop.permute.xlu0 %1087 }
 0x237   : > { %v897_v29 = vsel %vm454_vm11, %v894_v21, %v896_v27  ;;  %902 = vst.msk [vmem:[#allocation2 + $0x38] sm:$0x3f] %vm901_vm9, %v896_v27  ;;  %vm1065_vm11 = vcmask 623616   ;;  %vm1019_vm9 = vcmask 746496  }
 0x238   : > { %900 = vst [vmem:[#allocation2 + $0x30] sm:$0x3f] %v897_v29 }
 0x23a   : > { %v1126_v30 = vpop.permute.xlu1 %1125  ;;  %v1055_v31 = vpop.permute.xlu0 %1054 }
 0x23b   : > { %v1127_v32 = vsel %vm695_vm2, %v1124_v24, %v1126_v30  ;;  %1132 = vst.msk [vmem:[#allocation2 + $0x128] sm:$0x3f] %vm1131_vm6, %v1126_v30  ;;  %vm1075_vm2 = vcmask 621570   ;;  %vm1029_vm6 = vcmask 654338  }
 0x23c   : > { %1130 = vst [vmem:[#allocation2 + $0x120] sm:$0x3f] %v1127_v32 }
 0x23e   : > { %v1090_v33 = vpop.permute.xlu1 %1089  ;;  %v1068_v34 = vpop.permute.xlu0 %1067 }
 0x23f   : > { %v1091_v35 = vsel %vm659_vm4, %v1088_v28, %v1090_v33  ;;  %1096 = vst.msk [vmem:[#allocation2 + $0xf8] sm:$0xc0] %vm1095_vm14, %v1090_v33  ;;  %vm1049_vm4 = vcmask 637958   ;;  %vm3901_vm14 = vcmask 654336  }
 0x240   : > { %1099 = vst.msk [vmem:[#allocation2 + $0x108] sm:$0xf] %vm1098_vm1, %v1090_v33  ;;  %1094 = vst [vmem:[#allocation2 + $0x100] ss:$-12 sps:$4 sm:$0xcf] %v1091_v35   ;;  %vm1003_vm1 = vcmask 760838  }
 0x242   : > { %v1057_v36 = vpop.permute.xlu1 %1056  ;;  %v1042_v37 = vpop.permute.xlu0 %1041 }
 0x243   : > { %v1058_v38 = vsel %vm623_vm12, %v1055_v31, %v1057_v36  ;;  %1063 = vst.msk [vmem:[#allocation2 + $0xd8] sm:$0xf0] %vm1062_vm7, %v1057_v36  ;;  %vm1016_vm12 = vcmask 752644   ;;  %vm1006_vm7 = vcmask 756736  }
 0x244   : > { %1066 = vst.msk [vmem:[#allocation2 + $0xe8] sm:$0x3] %vm1065_vm11, %v1057_v36  ;;  %1061 = vst [vmem:[#allocation2 + $0xe0] ss:$-12 sps:$4 sm:$0xf3] %v1058_v38   ;;  %vm3902_vm11 = vcmask 760832  }
 0x246   : > { %v1070_v39 = vpop.permute.xlu1 %1069  ;;  %v1009_v40 = vpop.permute.xlu0 %1008  ;;  %v1168_v41 = vld [vmem:[#allocation2 + $0xf8] sm:$0xff] }
 0x247   : > { %v1071_v42 = vsel %vm637_vm15, %v1068_v34, %v1070_v39  ;;  %1076 = vst.msk [vmem:[#allocation2 + $0xe8] sm:$0xfc] %vm1075_vm2, %v1070_v39  ;;  %1201 = vmatprep.subr.mxu1 %v1168_v41  ;;  %v1167_v43 = vld [vmem:[#allocation2 + $0xf0] sm:$0xff]  ;;  %vm3900_vm15 = vcmask 752640   ;;  %vm970_vm2 = vcmask 785412  }
 0x248   : > { %1074 = vst [vmem:[#allocation2 + $0xe0] sm:$0xfc] %v1071_v42  ;;  %1202 = vmatpush1.msra.mxu1 %v1167_v43 }
 0x24a   : > { %v1044_v44 = vpop.permute.xlu1 %1043  ;;  %v1022_v45 = vpop.permute.xlu0 %1021 }
 0x24b   : > { %v1045_v46 = vsel %vm3899_vm0, %v1042_v37, %v1044_v44  ;;  %1050 = vst.msk [vmem:[#allocation2 + $0xc8] sm:$0xc0] %vm1049_vm4, %v1044_v44  ;;  %vm973_vm4 = vcmask 779264   ;;  %vm983_vm0 = vcmask 777218  }
 0x24c   : > { %1053 = vst.msk [vmem:[#allocation2 + $0xd8] sm:$0xf] %vm1052_vm5, %v1044_v44  ;;  %1048 = vst [vmem:[#allocation2 + $0xd0] ss:$-12 sps:$4 sm:$0xcf] %v1045_v46   ;;  %vm3903_vm5 = vcmask 785408  }
 0x24e   : > { %v1011_v47 = vpop.permute.xlu1 %1010  ;;  %v996_v48 = vpop.permute.xlu0 %995  ;;  %v1166_v49 = vld [vmem:[#allocation2 + $0xe8] sm:$0xff] }
 0x24f   : > { %v1012_v50 = vsel %vm3900_vm15, %v1009_v40, %v1011_v47  ;;  %1017 = vst.msk [vmem:[#allocation2 + $0xa8] sm:$0xf0] %vm1016_vm12, %v1011_v47  ;;  %1203 = vmatprep.subr.mxu1 %v1166_v49  ;;  %v1165_v53 = vld [vmem:[#allocation2 + $0xe0] sm:$0xff]  ;;  %vm3904_vm12 = vcmask 777216   ;;  %vm960_vm15 = vcmask 879616  }
 0x250   : > { %1020 = vst.msk [vmem:[#allocation2 + $0xb8] sm:$0x3] %vm1019_vm9, %v1011_v47  ;;  %1015 = vst [vmem:[#allocation2 + $0xb0] ss:$-12 sps:$4 sm:$0xf3] %v1012_v50   ;;  %1204 = vmatpush1.msra.mxu1 %v1165_v53  ;;  %vm957_vm9 = vcmask 883718  }
 0x252   : > { %v1024_v55 = vpop.permute.xlu1 %1023  ;;  %v963_v57 = vpop.permute.xlu0 %962  ;;  %v1162_v62 = vld [vmem:[#allocation2 + $0xc8] sm:$0xff] }
 0x253   : > { %v1164_v59 = vld [vmem:[#allocation2 + $0xd8] sm:$0xff]  ;;  %v1025_v60 = vsel %vm3901_vm14, %v1022_v45, %v1024_v55  ;;  %1030 = vst.msk [vmem:[#allocation2 + $0xb8] sm:$0xfc] %vm1029_vm6, %v1024_v55  ;;  %v1163_v61 = vld [vmem:[#allocation2 + $0xd0] sm:$0xff]  ;;  %v1161_v63 = vld [vmem:[#allocation2 + $0xc0] sm:$0xff]  ;;  %vm3905_vm6 = vcmask 883712  }
 0x254   : > { %1205 = vmatprep.subr.mxu1 %v1164_v59  ;;  %1028 = vst [vmem:[#allocation2 + $0xb0] sm:$0xfc] %v1025_v60  ;;  %vm924_vm14 = vcmask 908292  }
 0x255   : > { %1206 = vmatpush1.msra.mxu1 %v1163_v61 }
 0x256   : > { %1207 = vmatprep.subr.mxu1 %v1162_v62  ;;  %v998_v1 = vpop.permute.xlu1 %997  ;;  %v976_v2 = vpop.permute.xlu0 %975 }
 0x257   : > { %1208 = vmatpush1.msra.mxu1 %v1161_v63  ;;  %v999_v3 = vsel %vm3902_vm11, %v996_v48, %v998_v1  ;;  %1004 = vst.msk [vmem:[#allocation2 + $0x98] sm:$0xc0] %vm1003_vm1, %v998_v1  ;;  %vm927_vm1 = vcmask 902144   ;;  %vm937_vm11 = vcmask 900098  }
 0x258   : > { %1007 = vst.msk [vmem:[#allocation2 + $0xa8] sm:$0xf] %vm1006_vm7, %v998_v1  ;;  %1002 = vst [vmem:[#allocation2 + $0xa0] ss:$-12 sps:$4 sm:$0xcf] %v999_v3   ;;  %vm3906_vm7 = vcmask 908288  }
 0x259   : > { %v1173_v3 = vld [vmem:[#allocation2 + $0x120] sm:$0x3f] }
 0x25a   : > { %v965_v4 = vpop.permute.xlu1 %964  ;;  %v950_v5 = vpop.permute.xlu0 %949  ;;  %v1160_v6 = vld [vmem:[#allocation2 + $0xb8] sm:$0xff] }
 0x25b   : > { %v966_v7 = vsel %vm3903_vm5, %v963_v57, %v965_v4  ;;  %971 = vst.msk [vmem:[#allocation2 + $0x78] sm:$0xf0] %vm970_vm2, %v965_v4  ;;  %1209 = vmatprep.subr.mxu1 %v1160_v6  ;;  %v1159_v8 = vld [vmem:[#allocation2 + $0xb0] sm:$0xff]  ;;  %vm911_vm2 = vcmask 916486   ;;  %vm3907_vm5 = vcmask 916480  }
 0x25c   : > { %974 = vst.msk [vmem:[#allocation2 + $0x88] sm:$0x3] %vm973_vm4, %v965_v4  ;;  %969 = vst [vmem:[#allocation2 + $0x80] ss:$-12 sps:$4 sm:$0xf3] %v966_v7   ;;  %1210 = vmatpush1.msra.mxu1 %v1159_v8  ;;  %vm914_vm4 = vcmask 912384  }
 0x25d   : > { %v1133_v7 = vld [vmem:[%s3777_s5] sm:$0xff] }
 0x25e   : > { %v978_v9 = vpop.permute.xlu1 %977  ;;  %v917_v10 = vpop.permute.xlu0 %916  ;;  %v1156_v14 = vld [vmem:[#allocation2 + $0x98] sm:$0xff] }
 0x25f   : > { %v1158_v11 = vld [vmem:[#allocation2 + $0xa8] sm:$0xff]  ;;  %v979_v12 = vsel %vm3904_vm12, %v976_v2, %v978_v9  ;;  %984 = vst.msk [vmem:[#allocation2 + $0x88] sm:$0xfc] %vm983_vm0, %v978_v9  ;;  %v1157_v13 = vld [vmem:[#allocation2 + $0xa0] sm:$0xff]  ;;  %v1155_v15 = vld [vmem:[#allocation2 + $0x90] sm:$0xff]  ;;  %vm876_vm0 = vcmask 1031172  }
 0x260   : > { %1211 = vmatprep.subr.mxu1 %v1158_v11  ;;  %982 = vst [vmem:[#allocation2 + $0x80] sm:$0xfc] %v979_v12  ;;  %vm3908_vm12 = vcmask 1031168   ;;  %v1174_v2 = vld [vmem:[#allocation2 + $0x128] sm:$0x3f]  ;;  %v1136_v9 = vld [vmem:[%s3777_s5 + $0x18] sm:$0xff] }
 0x261   : > { %1212 = vmatpush1.msra.mxu1 %v1157_v13  ;;  %v388_v11 = vld [vmem:[%s3774_s2] sm:$0x3] }
 0x262   : > { %1213 = vmatprep.subr.mxu1 %v1156_v14  ;;  %v952_v17 = vpop.permute.xlu1 %951  ;;  %v930_v18 = vpop.permute.xlu0 %929 }
 0x263   : > { %1214 = vmatpush1.msra.mxu1 %v1155_v15  ;;  %v953_v19 = vsel %vm3905_vm6, %v950_v5, %v952_v17  ;;  %958 = vst.msk [vmem:[#allocation2 + $0x68] sm:$0xc0] %vm957_vm9, %v952_v17  ;;  %vm891_vm9 = vcmask 1022978   ;;  %vm864_vm6 = vcmask 1035264  }
 0x264   : > { %961 = vst.msk [vmem:[#allocation2 + $0x78] sm:$0xf] %vm960_vm15, %v952_v17  ;;  %956 = vst [vmem:[#allocation2 + $0x70] ss:$-12 sps:$4 sm:$0xcf] %v953_v19   ;;  %vm861_vm15 = vcmask 1039366  }
 0x266   : > { %v919_v20 = vpop.permute.xlu1 %918  ;;  %v904_v21 = vpop.permute.xlu0 %903  ;;  %v1154_v22 = vld [vmem:[#allocation2 + $0x88] sm:$0xff] }
 0x267   : > { %v920_v23 = vsel %vm3906_vm7, %v917_v10, %v919_v20  ;;  %925 = vst.msk [vmem:[#allocation2 + $0x48] sm:$0xf0] %vm924_vm14, %v919_v20  ;;  %1215 = vmatprep.subr.mxu1 %v1154_v22  ;;  %v1153_v24 = vld [vmem:[#allocation2 + $0x80] sm:$0xff]  ;;  %vm1108_vm14 = vcmask 506884   ;;  %vm1121_vm7 = vcmask 498690   ;;  %v1135_v10 = vld [vmem:[%s3777_s5 + $0x10] sm:$0xff] }
 0x268   : > { %928 = vst.msk [vmem:[#allocation2 + $0x58] sm:$0x3] %vm927_vm1, %v919_v20  ;;  %923 = vst [vmem:[#allocation2 + $0x50] ss:$-12 sps:$4 sm:$0xf3] %v920_v23   ;;  %1216 = vmatpush1.msra.mxu1 %v1153_v24  ;;  %vm3909_vm1 = vcmask 506880  }
 0x26a   : > { %v932_v25 = vpop.permute.xlu1 %931  ;;  %v869_v26 = vpop.permute.xlu0 %868  ;;  %v1150_v30 = vld [vmem:[#allocation2 + $0x68] sm:$0xff] }
 0x26b   : > { %v1152_v27 = vld [vmem:[#allocation2 + $0x78] sm:$0xff]  ;;  %v933_v28 = vsel %vm496_vm10, %v930_v18, %v932_v25  ;;  %938 = vst.msk [vmem:[#allocation2 + $0x58] sm:$0xfc] %vm937_vm11, %v932_v25  ;;  %v1151_v29 = vld [vmem:[#allocation2 + $0x70] sm:$0xff]  ;;  %v1149_v31 = vld [vmem:[#allocation2 + $0x60] sm:$0xff]  ;;  %vm879_vm10 = vcmask 1025024  }
 0x26c   : > { %1217 = vmatprep.subr.mxu1 %v1152_v27  ;;  %936 = vst [vmem:[#allocation2 + $0x50] sm:$0xfc] %v933_v28  ;;  %vm3834_vm11 = vcmask 1045504  }
 0x26d   : > { %1218 = vmatpush1.msra.mxu1 %v1151_v29 }
 0x26e   : > { %1219 = vmatprep.subr.mxu1 %v1150_v30  ;;  %v906_v32 = vpop.permute.xlu1 %905  ;;  %v884_v34 = vpop.permute.xlu0 %883 }
 0x26f   : > { %1220 = vmatpush1.msra.mxu1 %v1149_v31  ;;  %v907_v33 = vsel %vm3907_vm5, %v904_v21, %v906_v32  ;;  %912 = vst.msk [vmem:[#allocation2 + $0x38] sm:$0xc0] %vm911_vm2, %v906_v32  ;;  %vm3911_vm2 = vcmask 179200   ;;  %vm1282_vm5 = vcmp.ne.f32.partialorder %v388_v11, 0.0 }
 0x270   : > { %915 = vst.msk [vmem:[#allocation2 + $0x48] sm:$0xf] %vm914_vm4, %v906_v32  ;;  %910 = vst [vmem:[#allocation2 + $0x40] ss:$-12 sps:$4 sm:$0xcf] %v907_v33   ;;  %vm1298_vm4 = vcmask 556032  }
 0x271   : > { %1313 = vst.msk [vmem:[#allocation2 + $0xe0] sm:$0xff] %vm1298_vm4, %v2702_v0  ;;  %1305 = vst.msk [vmem:[#allocation2 + $0x60] sm:$0xff] %vm1298_vm4, %v2702_v0  ;;  %v1283_v12 = vsel %vm1282_vm5, 1, %v2727_v16  ;;  %vm3842_vm5 = vcmask 539648  }
 0x272   : > { %v871_v35 = vpop.permute.xlu1 %870  ;;  %v1148_v36 = vld [vmem:[#allocation2 + $0x58] sm:$0xff]  ;;  %v854_v39 = vpop.permute.xlu0 %853  ;;  %1306 = vst.msk [vmem:[#allocation2 + $0x70] sm:$0xff] %vm1298_vm4, %v2702_v0  ;;  %1307 = vst.msk [vmem:[#allocation2 + $0x80] sm:$0xff] %vm1298_vm4, %v2702_v0  ;;  %v1287_v14 = vrot.slane %v1283_v12, %v817_v52  ;;  %v1291_v17 = vrot.slane %v1283_v12, %v821_v54 }
 0x273   : > { %v872_v37 = vsel %vm3908_vm12, %v869_v26, %v871_v35  ;;  %877 = vst.msk [vmem:[#allocation2 + $0x18] sm:$0xf0] %vm876_vm0, %v871_v35  ;;  %1221 = vmatprep.subr.mxu1 %v1148_v36  ;;  %v1147_v38 = vld [vmem:[#allocation2 + $0x50] sm:$0xff]  ;;  %vm1506_vm12 = vcmask 1047952  }
 0x274   : > { %880 = vst.msk [vmem:[#allocation2 + $0x28] sm:$0x3] %vm879_vm10, %v871_v35  ;;  %875 = vst [vmem:[#allocation2 + $0x20] ss:$-12 sps:$4 sm:$0xf3] %v872_v37   ;;  %1222 = vmatpush1.msra.mxu1 %v1147_v38  ;;  %vm1292_vm0 = vcmp.eq.s32.totalorder %v1287_v14, 1 }
 0x275   : > { %1304 = vst.msk [vmem:[#allocation2 + $0x50] sm:$0xff] %vm1298_vm4, %v2702_v0  ;;  %1308 = vst.msk [vmem:[#allocation2 + $0x90] sm:$0xff] %vm1298_vm4, %v2702_v0  ;;  %vm1293_vm10 = vcmp.eq.s32.totalorder %v1291_v17, 1 }
 0x276   : > { %v886_v40 = vpop.permute.xlu1 %885  ;;  %v1144_v44 = vld [vmem:[#allocation2 + $0x38] sm:$0xff]  ;;  %v1101_v48 = vpop.permute.xlu0 %1100  ;;  %1309 = vst.msk [vmem:[#allocation2 + $0xa0] sm:$0xff] %vm1298_vm4, %v2702_v0  ;;  %1310 = vst.msk [vmem:[#allocation2 + $0xb0] sm:$0xff] %vm1298_vm4, %v2702_v0 }
 0x277   : > { %v1146_v41 = vld [vmem:[#allocation2 + $0x48] sm:$0xff]  ;;  %v887_v42 = vsel %vm442_vm8, %v884_v34, %v886_v40  ;;  %892 = vst.msk [vmem:[#allocation2 + $0x28] sm:$0xfc] %vm891_vm9, %v886_v40  ;;  %v1145_v43 = vld [vmem:[#allocation2 + $0x40] sm:$0xff]  ;;  %v1143_v45 = vld [vmem:[#allocation2 + $0x30] sm:$0xff]  ;;  %vm1111_vm8 = vcmask 500736  }
 0x278   : > { %1223 = vmatprep.subr.mxu1 %v1146_v41  ;;  %890 = vst [vmem:[#allocation2 + $0x20] sm:$0xfc] %v887_v42  ;;  %1302 = vst.msk [vmem:[#allocation2 + $0x30] sm:$0xff] %vm1298_vm4, %v2702_v0  ;;  %vm1499_vm9 = vcmask 408576  }
 0x279   : > { %1224 = vmatpush1.msra.mxu1 %v1145_v43  ;;  %1303 = vst.msk [vmem:[#allocation2 + $0x40] sm:$0xff] %vm1298_vm4, %v2702_v0  ;;  %1311 = vst.msk [vmem:[#allocation2 + $0xc0] sm:$0xff] %vm1298_vm4, %v2702_v0 }
 0x27a   : > { %1225 = vmatprep.subr.mxu1 %v1144_v44  ;;  %v856_v46 = vpop.permute.xlu1 %855  ;;  %v1114_v57 = vpop.permute.xlu0 %1113  ;;  %1312 = vst.msk [vmem:[#allocation2 + $0xd0] sm:$0xff] %vm1298_vm4, %v2702_v0  ;;  %1314 = vst.msk [vmem:[#allocation2 + $0xf0] sm:$0xff] %vm1298_vm4, %v2702_v0 }
 0x27b   : > { %1226 = vmatpush1.msra.mxu1 %v1143_v45  ;;  %v857_v47 = vsel %vm413_vm13, %v854_v39, %v856_v46  ;;  %862 = vst.msk [vmem:[#allocation2 + $0x8] sm:$0xc0] %vm861_vm15, %v856_v46  ;;  %vm3910_vm13 = vcmask 498688   ;;  %vm1486_vm15 = vcmask 1047960  }
 0x27c   : > { %865 = vst.msk [vmem:[#allocation2 + $0x18] sm:$0xf] %vm864_vm6, %v856_v46  ;;  %860 = vst [vmem:[#allocation2 + $0x10] ss:$-12 sps:$4 sm:$0xcf] %v857_v47   ;;  %vm1479_vm6 = vcmask 416768  }
 0x27d   : > { %1317 = vst.msk [vmem:[#allocation2 + $0x120] sm:$0xff] %vm1298_vm4, %v2702_v0  ;;  %1318 = vst.msk [vmem:[#allocation2 + $0x130] sm:$0xff] %vm1298_vm4, %v2702_v0 }
 0x27e   : > { %v1103_v49 = vpop.permute.xlu1 %1102  ;;  %v1142_v50 = vld [vmem:[#allocation2 + $0x28] sm:$0xff]  ;;  %1319 = vst.msk [vmem:[#allocation2 + $0x140] sm:$0xff] %vm1298_vm4, %v2702_v0  ;;  %1320 = vst.msk [vmem:[#allocation2 + $0x150] sm:$0xff] %vm1298_vm4, %v2702_v0 }
 0x27f   : > { %v1104_v53 = vsel %vm3909_vm1, %v1101_v48, %v1103_v49  ;;  %1109 = vst.msk [vmem:[#allocation2 + $0x108] sm:$0xf0] %vm1108_vm14, %v1103_v49  ;;  %1227 = vmatprep.subr.mxu1 %v1142_v50  ;;  %v1141_v55 = vld [vmem:[#allocation2 + $0x20] sm:$0xff]  ;;  %vm1466_vm14 = vcmask 1047968   ;;  %vm1446_vm1 = vcmask 1048064  }
 0x280   : > { %1112 = vst.msk [vmem:[#allocation2 + $0x118] sm:$0x3] %vm1111_vm8, %v1103_v49  ;;  %1107 = vst [vmem:[#allocation2 + $0x110] ss:$-12 sps:$4 sm:$0xf3] %v1104_v53   ;;  %1228 = vmatpush1.msra.mxu1 %v1141_v55  ;;  %vm1459_vm8 = vcmask 424960  }
 0x281   : > { %1301 = vst.msk [vmem:[#allocation2 + $0x20] sm:$0xff] %vm1298_vm4, %v2702_v0  ;;  %1321 = vst.msk [vmem:[#allocation2 + $0x160] sm:$0xff] %vm1298_vm4, %v2702_v0 }
 0x282   : > { %v1116_v59 = vpop.permute.xlu1 %1115  ;;  %v1138_v63 = vld [vmem:[#allocation2 + $0x8] sm:$0xff]  ;;  %1322 = vst.msk [vmem:[#allocation2 + $0x170] sm:$0xff] %vm1298_vm4, %v2702_v0  ;;  %1323 = vst.msk [vmem:[#allocation2 + $0x180] sm:$0xff] %vm1298_vm4, %v2702_v0 }
 0x283   : > { %v1140_v60 = vld [vmem:[#allocation2 + $0x18] sm:$0xff]  ;;  %v1117_v61 = vsel %vm3910_vm13, %v1114_v57, %v1116_v59  ;;  %1122 = vst.msk [vmem:[#allocation2 + $0x118] sm:$0xfc] %vm1121_vm7, %v1116_v59  ;;  %v1139_v62 = vld [vmem:[#allocation2 + $0x10] sm:$0xff]  ;;  %v1137_v1 = vld [vmem:[#allocation2] sm:$0xff]  ;;  %vm1427_vm7 = vcmask 1048072  }
 0x284   : > { %1229 = vmatprep.subr.mxu1 %v1140_v60  ;;  %1120 = vst [vmem:[#allocation2 + $0x110] sm:$0xfc] %v1117_v61  ;;  %1299 = vst.msk [vmem:[#allocation2] sm:$0xff] %vm1298_vm4, %v2702_v0  ;;  %vm3884_vm13 = vcmask 531456  }
 0x285   : > { %1230 = vmatpush1.msra.mxu1 %v1139_v62  ;;  %1300 = vst.msk [vmem:[#allocation2 + $0x10] sm:$0xff] %vm1298_vm4, %v2702_v0  ;;  %1324 = vst.msk [vmem:[#allocation2 + $0x190] sm:$0xff] %vm1298_vm4, %v2702_v0 }
 0x286   : > { %1231 = vmatprep.subr.mxu1 %v1138_v63  ;;  %v1170_v6 = vld [vmem:[#allocation2 + $0x108] sm:$0xff]  ;;  %1325 = vst.msk [vmem:[#allocation2 + $0x1a0] sm:$0xff] %vm1298_vm4, %v2702_v0  ;;  %1326 = vst.msk [vmem:[#allocation2 + $0x1b0] sm:$0xff] %vm1298_vm4, %v2702_v0 }
 0x287   : > { %1232 = vmatpush1.msra.mxu1 %v1137_v1  ;;  %v1169_v8 = vld [vmem:[#allocation2 + $0x100] sm:$0xff]  ;;  %1327 = vst.msk [vmem:[#allocation2 + $0x1c0] sm:$0xff] %vm1298_vm4, %v2702_v0  ;;  %1328 = vst.msk [vmem:[#allocation2 + $0x1d0] sm:$0xff] %vm1298_vm4, %v2702_v0  ;;  %v1185_v22 = vpop.permute.xlu0 %1184 }
 0x288   : > { %2612 = vmatprep.subr.msk.mxu1 %vm3834_vm11, %v1174_v2  ;;  %1315 = vst.msk [vmem:[#allocation2 + $0x100] sm:$0xff] %vm1298_vm4, %v2702_v0  ;;  %1329 = vst.msk [vmem:[#allocation2 + $0x1e0] sm:$0xff] %vm1298_vm4, %v2702_v0 }
 0x289   : > { %2613 = vmatpush2.msk.msra.mxu1 %vm3834_vm11, %v1173_v3  ;;  %1330 = vst.msk [vmem:[#allocation2 + $0x1f0] sm:$0xff] %vm1298_vm4, %v2702_v0  ;;  %1331 = vst.msk [vmem:[#allocation2 + $0x200] sm:$0xff] %vm1298_vm4, %v2702_v0  ;;  %vm3841_vm11 = vcmask 1048096  }
 0x28a   : > { %v1172_v4 = vld [vmem:[#allocation2 + $0x118] sm:$0xff]  ;;  %1332 = vst.msk [vmem:[#allocation2 + $0x210] sm:$0xff] %vm1298_vm4, %v2702_v0  ;;  %1333 = vst.msk [vmem:[#allocation2 + $0x220] sm:$0xff] %vm1298_vm4, %v2702_v0 }
 0x28b   : > { %1261 = vmatprep.subr.mxu1 %v1172_v4  ;;  %v1171_v5 = vld [vmem:[#allocation2 + $0x110] sm:$0xff]  ;;  %1334 = vst.msk [vmem:[#allocation2 + $0x230] sm:$0xff] %vm1298_vm4, %v2702_v0  ;;  %1335 = vst.msk [vmem:[#allocation2 + $0x240] sm:$0xff] %vm1298_vm4, %v2702_v0 }
 0x28c   : > { %1262 = vmatpush2.msra.mxu1 %v1171_v5  ;;  %1316 = vst.msk [vmem:[#allocation2 + $0x110] sm:$0xff] %vm1298_vm4, %v2702_v0  ;;  %1336 = vst.msk [vmem:[#allocation2 + $0x250] sm:$0xff] %vm1298_vm4, %v2702_v0 }
 0x28d   : > { %1263 = vmatprep.subr.mxu1 %v1170_v6  ;;  %1337 = vst.msk [vmem:[#allocation2 + $0x260] sm:$0xff] %vm1298_vm4, %v2702_v0  ;;  %1338 = vst.msk [vmem:[#allocation2 + $0x270] sm:$0xff] %vm1298_vm4, %v2702_v0 }
 0x28e   : > { %1264 = vmatpush2.msra.mxu1 %v1169_v8  ;;  %1339 = vst.msk [vmem:[#allocation2 + $0x280] sm:$0xff] %vm1298_vm4, %v2702_v0  ;;  %1340 = vst.msk [vmem:[#allocation2 + $0x290] sm:$0xff] %vm1298_vm4, %v2702_v0 }
 0x28f   : > { %1266 = vmatmul.mubr.f32.vlgmr.msra.gmra.mxu1 %v1133_v7  ;;  %1341 = vst.msk [vmem:[#allocation2 + $0x2a0] sm:$0xff] %vm1298_vm4, %v2702_v0  ;;  %1342 = vst.msk [vmem:[#allocation2 + $0x2b0] sm:$0xff] %vm1298_vm4, %v2702_v0  ;;  %v1180_v13 = vpop.permute.xlu1 %1179 }
 0x290   : > { %2615 = vmatprep.mubr.msk.f32.mxu1 %vm3911_vm2, %v1136_v9  ;;  %1343 = vst.msk [vmem:[#allocation2 + $0x2c0] sm:$0xff] %vm1298_vm4, %v2702_v0  ;;  %1344 = vst.msk [vmem:[#allocation2 + $0x2d0] sm:$0xff] %vm1298_vm4, %v2702_v0  ;;  %vm3878_vm2 = vcmask 1048080  }
 0x291   : > { %1345 = vst.msk [vmem:[#allocation2 + $0x2e0] sm:$0xff] %vm1298_vm4, %v2702_v0  ;;  %1346 = vst.msk [vmem:[#allocation2 + $0x2f0] sm:$0xff] %vm1298_vm4, %v2702_v0 }
 0x292   : > { %1347 = vst.msk [vmem:[#allocation2 + $0x300] sm:$0xff] %vm1298_vm4, %v2702_v0  ;;  %1348 = vst.msk [vmem:[#allocation2 + $0x310] sm:$0xff] %vm1298_vm4, %v2702_v0 }
 0x293   : > { %1272 = vmatmul.mubr.f32.gmra.mxu1 %v1135_v10 }
 0x34f   : > { %v1267_v15 = vpop.f32.mrf.mxu1 }
 0x350   : > { %v1268_v18 = vadd.f32 %v1267_v15, %v1180_v13 }
 0x351   : > { %v1269_v19 = vpop.f32.mrf.mxu1 }
 0x352   : > { %v1278_v20 = vmax.f32 %v1268_v18, 0.0  ;;  %v1270_v21 = vadd.f32 %v1269_v19, %v1180_v13 }
 0x353   : > { %v1273_v23 = vpop.f32.mrf.mxu1 }
 0x354   : > { %v3213_v24 = vsel %vm1292_vm0, %v1278_v20, 0.0  ;;  %v1279_v16 = vmax.f32 %v1270_v21, 0.0  ;;  %v1274_v25 = vadd.f32 %v1273_v23, %v1185_v22 }
 0x355   : > { %v1275_v26 = vpop.f32.mrf.mxu1  ;;  %1491 = vrot.lane.b32.xlu0 %v3213_v24, %s3867_s13  ;;  %1831 = vst [vmem:[#allocation2 + $0x300] sm:$0xff] %v3213_v24 }
 0x356   : > { %v3219_v51 = vsel %vm1293_vm10, %v1279_v16, 0.0  ;;  %v1280_v52 = vmax.f32 %v1274_v25, 0.0  ;;  %v1276_v54 = vadd.f32 %v1275_v26, %v1185_v22 }
 0x357   : > { %1832 = vst [vmem:[#allocation2 + $0x308] sm:$0xff] %v3219_v51  ;;  %1493 = vrot.lane.b32.xlu1 %v3219_v51, %s3867_s13 }
 0x358   : > { %v3225_v27 = vsel %vm1292_vm0, %v1280_v52, 0.0  ;;  %v1281_v28 = vmax.f32 %v1276_v54, 0.0  ;;  %vm3837_vm0 = vcmask 1048088  }
 0x359   : > { %1471 = vrot.lane.b32.xlu0 %v3213_v24, %s3869_s14  ;;  %1833 = vst [vmem:[#allocation2 + $0x310] sm:$0xff] %v3225_v27 }
 0x35a   : > { %v3231_v29 = vsel %vm1293_vm10, %v1281_v28, 0.0  ;;  %vm3838_vm10 = vcmask 547840  }
 0x35b   : > { %1834 = vst [vmem:[#allocation2 + $0x318] sm:$0xff] %v3231_v29  ;;  %1473 = vrot.lane.b32.xlu1 %v3219_v51, %s3869_s14 }
 0x35d   : > { %1451 = vrot.lane.b32.xlu0 %v3213_v24, %s3855_s15 }
 0x35f   : > { %1453 = vrot.lane.b32.xlu1 %v3219_v51, %s3855_s15 }
 0x361   : > { %1432 = vrot.lane.b32.xlu0 %v3213_v24, %s2709_s29 }
 0x363   : > { %1434 = vrot.lane.b32.xlu1 %v3219_v51, %s2709_s29 }
 0x365   : > { %1412 = vrot.lane.b32.xlu0 %v3213_v24, %s3847_s21 }
 0x367   : > { %1414 = vrot.lane.b32.xlu1 %v3219_v51, %s3847_s21 }
 0x369   : > { %1392 = vrot.lane.b32.xlu0 %v3213_v24, %s3851_s22 }
 0x36b   : > { %1394 = vrot.lane.b32.xlu1 %v3219_v51, %s3851_s22 }
 0x36d   : > { %1372 = vrot.lane.b32.xlu0 %v3213_v24, %s3843_s16 }
 0x36f   : > { %1374 = vrot.lane.b32.xlu1 %v3219_v51, %s3843_s16 }
 0x371   : > { %1353 = vrot.lane.b32.xlu0 %v3213_v24, %s2734_s20 }
 0x373   : > { %1355 = vrot.lane.b32.xlu1 %v3219_v51, %s2734_s20 }
 0x375   : > { %1811 = vrot.lane.b32.xlu0 %v3213_v24, %s3835_s19 }
 0x377   : > { %1813 = vrot.lane.b32.xlu1 %v3219_v51, %s3835_s19 }
 0x379   : > { %1651 = vrot.lane.b32.xlu0 %v3213_v24, %s3875_s23 }
 0x37b   : > { %1653 = vrot.lane.b32.xlu1 %v3219_v51, %s3875_s23 }
 0x37d   : > { %1791 = vrot.lane.b32.xlu0 %v3213_v24, %s3839_s24 }
 0x37f   : > { %1793 = vrot.lane.b32.xlu1 %v3219_v51, %s3839_s24 }
 0x381   : > { %1631 = vrot.lane.b32.xlu0 %v3213_v24, %s2738_s25 }
 0x383   : > { %1633 = vrot.lane.b32.xlu1 %v3219_v51, %s2738_s25 }
 0x385   : > { %1771 = vrot.lane.b32.xlu0 %v3213_v24, %s2739_s26 }
 0x387   : > { %1773 = vrot.lane.b32.xlu1 %v3219_v51, %s2739_s26 }
 0x389   : > { %1611 = vrot.lane.b32.xlu0 %v3213_v24, %s3822_s27 }
 0x38b   : > { %1613 = vrot.lane.b32.xlu1 %v3219_v51, %s3822_s27  ;;  %s3830_s27 = smov 35  }
 0x38d   : > { %1751 = vrot.lane.b32.xlu0 %v3213_v24, %s3824_s28 }
 0x38f   : > { %1753 = vrot.lane.b32.xlu1 %v3219_v51, %s3824_s28  ;;  %s3832_s28 = smov 17  }
 0x391   : > { %1591 = vrot.lane.b32.xlu0 %v3213_v24, %s3826_s30 }
 0x393   : > { %1593 = vrot.lane.b32.xlu1 %v3219_v51, %s3826_s30  ;;  %s3873_s30 = smov 36  }
 0x395   : > { %1731 = vrot.lane.b32.xlu0 %v3213_v24, %s3828_s12 }
 0x397   : > { %1733 = vrot.lane.b32.xlu1 %v3219_v51, %s3828_s12  ;;  %s2747_s12 = smov 18  }
 0x399   : > { %1571 = vrot.lane.b32.xlu0 %v3213_v24, %s3830_s27 }
 0x39b   : > { %1573 = vrot.lane.b32.xlu1 %v3219_v51, %s3830_s27  ;;  %s3871_s27 = smov 48  }
 0x39d   : > { %1711 = vrot.lane.b32.xlu0 %v3213_v24, %s3832_s28 }
 0x39f   : > { %1713 = vrot.lane.b32.xlu1 %v3219_v51, %s3832_s28  ;;  %s2749_s28 = smov 19  }
 0x3a1   : > { %1551 = vrot.lane.b32.xlu0 %v3213_v24, %s3873_s30 }
 0x3a3   : > { %1553 = vrot.lane.b32.xlu1 %v3219_v51, %s3873_s30 }
 0x3a5   : > { %1691 = vrot.lane.b32.xlu0 %v3213_v24, %s2747_s12 }
 0x3a7   : > { %1693 = vrot.lane.b32.xlu1 %v3219_v51, %s2747_s12 }
 0x3a9   : > { %1531 = vrot.lane.b32.xlu0 %v3213_v24, %s3871_s27 }
 0x3ab   : > { %1533 = vrot.lane.b32.xlu1 %v3219_v51, %s3871_s27 }
 0x3ad   : > { %1671 = vrot.lane.b32.xlu0 %v3213_v24, %s2749_s28 }
 0x3af   : > { %1673 = vrot.lane.b32.xlu1 %v3219_v51, %s2749_s28 }
 0x3b1   : > { %1495 = vrot.lane.b32.xlu0 %v3225_v27, %s3867_s13 }
 0x3b3   : > { %1497 = vrot.lane.b32.xlu1 %v3231_v29, %s3867_s13  ;;  %s3980_s13 = sshll.u32 %s3982_s18, 3 }
 0x3b5   : > { %1475 = vrot.lane.b32.xlu0 %v3225_v27, %s3869_s14 }
 0x3b7   : > { %1477 = vrot.lane.b32.xlu1 %v3231_v29, %s3869_s14 }
 0x3b9   : > { %1455 = vrot.lane.b32.xlu0 %v3225_v27, %s3855_s15 }
 0x3bb   : > { %1457 = vrot.lane.b32.xlu1 %v3231_v29, %s3855_s15  ;;  %s3917_s15 = smov 17  }
 0x3bd   : > { %1436 = vrot.lane.b32.xlu0 %v3225_v27, %s2709_s29 }
 0x3bf   : > { %1438 = vrot.lane.b32.xlu1 %v3231_v29, %s2709_s29 }
 0x3c1   : > { %1416 = vrot.lane.b32.xlu0 %v3225_v27, %s3847_s21 }
 0x3c3   : > { %1418 = vrot.lane.b32.xlu1 %v3231_v29, %s3847_s21  ;;  %s3915_s21 = smov 16  }
 0x3c5   : > { %1396 = vrot.lane.b32.xlu0 %v3225_v27, %s3851_s22 }
 0x3c7   : > { %1398 = vrot.lane.b32.xlu1 %v3231_v29, %s3851_s22  ;;  %v1492_v30 = vpop.permute.xlu0 %1491  ;;  %s3916_s22 = smov 35  }
 0x3c8   : > { %1507 = vst.msk [vmem:[#allocation2 + $0xe0] sm:$0xff] %vm1506_vm12, %v1492_v30 }
 0x3c9   : > { %v1494_v31 = vpop.permute.xlu1 %1493  ;;  %1376 = vrot.lane.b32.xlu0 %v3225_v27, %s3843_s16 }
 0x3ca   : > { %v3348_v32 = vsel %vm1499_vm9, %v1492_v30, %v1494_v31 }
 0x3cb   : > { %1508 = vst [vmem:[#allocation2 + $0xe8] sm:$0xff] %v3348_v32  ;;  %1378 = vrot.lane.b32.xlu1 %v3231_v29, %s3843_s16  ;;  %v1472_v33 = vpop.permute.xlu0 %1471  ;;  %s3914_s16 = smov 34  }
 0x3cc   : > { %1487 = vst.msk [vmem:[#allocation2 + $0xc0] sm:$0xff] %vm1486_vm15, %v1472_v33 }
 0x3cd   : > { %v1474_v34 = vpop.permute.xlu1 %1473  ;;  %1357 = vrot.lane.b32.xlu0 %v3225_v27, %s2734_s20 }
 0x3ce   : > { %v3357_v35 = vsel %vm1479_vm6, %v1472_v33, %v1474_v34  ;;  %v1836_v34 = vld [vmem:[%s3779_s7 + $0x8] sm:$0x3f] }
 0x3cf   : > { %1488 = vst [vmem:[#allocation2 + $0xc8] sm:$0xff] %v3357_v35  ;;  %1359 = vrot.lane.b32.xlu1 %v3231_v29, %s2734_s20  ;;  %v1452_v36 = vpop.permute.xlu0 %1451  ;;  %v3362_v37 = vld [vmem:[#allocation2 + $0xe0] sm:$0xff]  ;;  %2012 = vmatprep.mubr.f32.mxu0 %v1836_v34 }
 0x3d0   : > { %1467 = vst.msk [vmem:[#allocation2 + $0xa0] sm:$0xff] %vm1466_vm14, %v1452_v36 }
 0x3d1   : > { %2108 = vst.msk [vmem:[#allocation2 + $0xe0] sm:$0xff] %vm1298_vm4, %v2702_v0  ;;  %v1454_v38 = vpop.permute.xlu1 %1453  ;;  %1815 = vrot.lane.b32.xlu0 %v3225_v27, %s3835_s19 }
 0x3d2   : > { %v3370_v39 = vsel %vm1459_vm8, %v1452_v36, %v1454_v38  ;;  %v1838_v36 = vld [vmem:[%s3779_s7 + $0x18] sm:$0x3f] }
 0x3d3   : > { %1468 = vst [vmem:[#allocation2 + $0xa8] sm:$0xff] %v3370_v39  ;;  %1817 = vrot.lane.b32.xlu1 %v3231_v29, %s3835_s19  ;;  %v1433_v40 = vpop.permute.xlu0 %1432  ;;  %v3375_v41 = vld [vmem:[#allocation2 + $0xc0] sm:$0xff]  ;;  %s3912_s19 = smov 33  }
 0x3d4   : > { %1447 = vst.msk [vmem:[#allocation2 + $0x80] sm:$0xff] %vm1446_vm1, %v1433_v40 }
 0x3d5   : > { %2106 = vst.msk [vmem:[#allocation2 + $0xc0] sm:$0xff] %vm1298_vm4, %v2702_v0  ;;  %v1435_v42 = vpop.permute.xlu1 %1434  ;;  %1655 = vrot.lane.b32.xlu0 %v3225_v27, %s3875_s23 }
 0x3d6   : > { %v3383_v43 = vsel %vm648_vm3, %v1433_v40, %v1435_v42 }
 0x3d7   : > { %1448 = vst [vmem:[#allocation2 + $0x88] sm:$0xff] %v3383_v43  ;;  %1657 = vrot.lane.b32.xlu1 %v3231_v29, %s3875_s23  ;;  %v1413_v44 = vpop.permute.xlu0 %1412  ;;  %v3388_v45 = vld [vmem:[#allocation2 + $0xa0] sm:$0xff]  ;;  %s2750_s23 = smov 49  }
 0x3d8   : > { %1428 = vst.msk [vmem:[#allocation2 + $0x60] sm:$0xff] %vm1427_vm7, %v1413_v44 }
 0x3d9   : > { %2104 = vst.msk [vmem:[#allocation2 + $0xa0] sm:$0xff] %vm1298_vm4, %v2702_v0  ;;  %v1415_v46 = vpop.permute.xlu1 %1414  ;;  %1795 = vrot.lane.b32.xlu0 %v3225_v27, %s3839_s24 }
 0x3da   : > { %v3396_v47 = vsel %vm3884_vm13, %v1413_v44, %v1415_v46  ;;  %vm1539_vm13 = vcmask 392192  }
 0x3db   : > { %1429 = vst [vmem:[#allocation2 + $0x68] sm:$0xff] %v3396_v47  ;;  %1797 = vrot.lane.b32.xlu1 %v3231_v29, %s3839_s24  ;;  %v1393_v48 = vpop.permute.xlu0 %1392  ;;  %v3401_v49 = vld [vmem:[#allocation2 + $0x80] sm:$0xff]  ;;  %s3913_s24 = smov 4  }
 0x3dc   : > { %1408 = vst.msk [vmem:[#allocation2 + $0x40] sm:$0xff] %vm3878_vm2, %v1393_v48  ;;  %vm3882_vm2 = vcmask 138240  }
 0x3dd   : > { %2102 = vst.msk [vmem:[#allocation2 + $0x80] sm:$0xff] %vm1298_vm4, %v2702_v0  ;;  %v1395_v50 = vpop.permute.xlu1 %1394  ;;  %1635 = vrot.lane.b32.xlu0 %v3225_v27, %s2738_s25 }
 0x3de   : > { %v3409_v53 = vsel %vm3842_vm5, %v1393_v48, %v1395_v50  ;;  %vm3850_vm5 = vcmask 162816  }
 0x3df   : > { %1409 = vst [vmem:[#allocation2 + $0x48] sm:$0xff] %v3409_v53  ;;  %1637 = vrot.lane.b32.xlu1 %v3231_v29, %s2738_s25  ;;  %v1373_v55 = vpop.permute.xlu0 %1372  ;;  %v3414_v57 = vld [vmem:[#allocation2 + $0x60] sm:$0xff] }
 0x3e0   : > { %1388 = vst.msk [vmem:[#allocation2 + $0x20] sm:$0xff] %vm3837_vm0, %v1373_v55  ;;  %vm3845_vm0 = vcmask 1047560  }
 0x3e1   : > { %2100 = vst.msk [vmem:[#allocation2 + $0x60] sm:$0xff] %vm1298_vm4, %v2702_v0  ;;  %v1375_v59 = vpop.permute.xlu1 %1374  ;;  %1775 = vrot.lane.b32.xlu0 %v3225_v27, %s2739_s26 }
 0x3e2   : > { %v3422_v60 = vsel %vm3838_vm10, %v1373_v55, %v1375_v59  ;;  %vm3846_vm10 = vcmask 7168  }
 0x3e3   : > { %1389 = vst [vmem:[#allocation2 + $0x28] sm:$0xff] %v3422_v60  ;;  %1777 = vrot.lane.b32.xlu1 %v3231_v29, %s2739_s26  ;;  %v1354_v61 = vpop.permute.xlu0 %1353  ;;  %v3427_v62 = vld [vmem:[#allocation2 + $0x40] sm:$0xff] }
 0x3e4   : > { %1368 = vst.msk [vmem:[#allocation2] sm:$0xff] %vm3841_vm11, %v1354_v61  ;;  %vm3849_vm11 = vcmask 1047712  }
 0x3e5   : > { %2098 = vst.msk [vmem:[#allocation2 + $0x40] sm:$0xff] %vm1298_vm4, %v2702_v0  ;;  %v1356_v63 = vpop.permute.xlu1 %1355  ;;  %1615 = vrot.lane.b32.xlu0 %v3225_v27, %s3912_s19 }
 0x3e6   : > { %v3435_v1 = vsel %vm1298_vm4, %v1354_v61, %v1356_v63 }
 0x3e7   : > { %1369 = vst [vmem:[#allocation2 + $0x8] sm:$0xff] %v3435_v1  ;;  %1617 = vrot.lane.b32.xlu1 %v3231_v29, %s3912_s19  ;;  %v1812_v2 = vpop.permute.xlu0 %1811  ;;  %v3440_v3 = vld [vmem:[#allocation2 + $0x20] sm:$0xff] }
 0x3e8   : > { %1827 = vst.msk [vmem:[#allocation2 + $0x2e0] sm:$0xff] %vm3845_vm0, %v1812_v2  ;;  %vm3853_vm0 = vcmask 1047568  }
 0x3e9   : > { %2096 = vst.msk [vmem:[#allocation2 + $0x20] sm:$0xff] %vm1298_vm4, %v2702_v0  ;;  %v1814_v4 = vpop.permute.xlu1 %1813  ;;  %1755 = vrot.lane.b32.xlu0 %v3225_v27, %s3913_s24 }
 0x3ea   : > { %v3448_v5 = vsel %vm3846_vm10, %v1812_v2, %v1814_v4  ;;  %vm3854_vm10 = vcmask 15360  }
 0x3eb   : > { %1757 = vrot.lane.b32.xlu1 %v3231_v29, %s3913_s24  ;;  %v1652_v6 = vpop.permute.xlu0 %1651  ;;  %v3452_v7 = vld [vmem:[#allocation2] sm:$0xff] }
 0x3ec   : > { %1667 = vst.msk [vmem:[#allocation2 + $0x1e0] sm:$0xff] %vm3849_vm11, %v1652_v6  ;;  %vm3857_vm11 = vcmask 1047808  }
 0x3ed   : > { %2094 = vst.msk [vmem:[#allocation2] sm:$0xff] %vm1298_vm4, %v2702_v0  ;;  %v1654_v8 = vpop.permute.xlu1 %1653  ;;  %1595 = vrot.lane.b32.xlu0 %v3225_v27, %s3914_s16 }
 0x3ee   : > { %v3460_v9 = vsel %vm3850_vm5, %v1652_v6, %v1654_v8  ;;  %vm3858_vm5 = vcmask 261120  }
 0x3ef   : > { %1597 = vrot.lane.b32.xlu1 %v3231_v29, %s3914_s16  ;;  %v1792_v10 = vpop.permute.xlu0 %1791 }
 0x3f0   : > { %1807 = vst.msk [vmem:[#allocation2 + $0x2c0] sm:$0xff] %vm3853_vm0, %v1792_v10  ;;  %vm3859_vm0 = vcmask 1047576  }
 0x3f1   : > { %v1794_v11 = vpop.permute.xlu1 %1793  ;;  %1735 = vrot.lane.b32.xlu0 %v3225_v27, %s3915_s21 }
 0x3f2   : > { %v3468_v12 = vsel %vm3854_vm10, %v1792_v10, %v1794_v11  ;;  %vm3860_vm10 = vcmask 23552  }
 0x3f3   : > { %1737 = vrot.lane.b32.xlu1 %v3231_v29, %s3915_s21  ;;  %v1632_v13 = vpop.permute.xlu0 %1631 }
 0x3f4   : > { %1647 = vst.msk [vmem:[#allocation2 + $0x1c0] sm:$0xff] %vm3857_vm11, %v1632_v13  ;;  %vm3861_vm11 = vcmask 1047816  }
 0x3f5   : > { %v1634_v14 = vpop.permute.xlu1 %1633  ;;  %1575 = vrot.lane.b32.xlu0 %v3225_v27, %s3916_s22 }
 0x3f6   : > { %v3476_v15 = vsel %vm3858_vm5, %v1632_v13, %v1634_v14  ;;  %vm3862_vm5 = vcmask 269312  }
 0x3f7   : > { %1577 = vrot.lane.b32.xlu1 %v3231_v29, %s3916_s22  ;;  %v1772_v17 = vpop.permute.xlu0 %1771 }
 0x3f8   : > { %1787 = vst.msk [vmem:[#allocation2 + $0x2a0] sm:$0xff] %vm3859_vm0, %v1772_v17  ;;  %vm3863_vm0 = vcmask 1047584  }
 0x3f9   : > { %v1774_v18 = vpop.permute.xlu1 %1773  ;;  %1715 = vrot.lane.b32.xlu0 %v3225_v27, %s3917_s15 }
 0x3fa   : > { %v3484_v19 = vsel %vm3860_vm10, %v1772_v17, %v1774_v18  ;;  %vm3864_vm10 = vcmask 31744  }
 0x3fb   : > { %1717 = vrot.lane.b32.xlu1 %v3231_v29, %s3917_s15  ;;  %v1612_v20 = vpop.permute.xlu0 %1611 }
 0x3fc   : > { %1627 = vst.msk [vmem:[#allocation2 + $0x1a0] sm:$0xff] %vm3861_vm11, %v1612_v20  ;;  %vm3865_vm11 = vcmask 1047824  }
 0x3fd   : > { %v1614_v21 = vpop.permute.xlu1 %1613  ;;  %1555 = vrot.lane.b32.xlu0 %v3225_v27, %s3873_s30 }
 0x3fe   : > { %v3492_v22 = vsel %vm3862_vm5, %v1612_v20, %v1614_v21  ;;  %vm3866_vm5 = vcmask 277504  }
 0x3ff   : > { %1557 = vrot.lane.b32.xlu1 %v3231_v29, %s3873_s30  ;;  %v1752_v23 = vpop.permute.xlu0 %1751 }
 0x400   : > { %1767 = vst.msk [vmem:[#allocation2 + $0x280] sm:$0xff] %vm3863_vm0, %v1752_v23  ;;  %vm3877_vm0 = vcmask 1047680  }
 0x401   : > { %v1754_v16 = vpop.permute.xlu1 %1753  ;;  %1695 = vrot.lane.b32.xlu0 %v3225_v27, %s2747_s12 }
 0x402   : > { %v3500_v25 = vsel %vm3864_vm10, %v1752_v23, %v1754_v16  ;;  %vm3883_vm10 = vcmask 130048  }
 0x403   : > { %1697 = vrot.lane.b32.xlu1 %v3231_v29, %s2747_s12  ;;  %v1592_v26 = vpop.permute.xlu0 %1591  ;;  %2616 = vmatprep.mubr.msk.f32.mxu1 %vm3883_vm10, %v1838_v36 }
 0x404   : > { %1607 = vst.msk [vmem:[#allocation2 + $0x180] sm:$0xff] %vm3865_vm11, %v1592_v26  ;;  %vm3879_vm11 = vcmask 1047832  }
 0x405   : > { %v1594_v52 = vpop.permute.xlu1 %1593  ;;  %1535 = vrot.lane.b32.xlu0 %v3225_v27, %s3871_s27 }
 0x406   : > { %v3508_v54 = vsel %vm3866_vm5, %v1592_v26, %v1594_v52  ;;  %vm3880_vm5 = vcmask 285696  }
 0x407   : > { %1537 = vrot.lane.b32.xlu1 %v3231_v29, %s3871_s27  ;;  %v1732_v28 = vpop.permute.xlu0 %1731 }
 0x408   : > { %1747 = vst.msk [vmem:[#allocation2 + $0x260] sm:$0xff] %vm3877_vm0, %v1732_v28  ;;  %vm3881_vm0 = vcmask 1047688  }
 0x409   : > { %v1734_v30 = vpop.permute.xlu1 %1733  ;;  %1675 = vrot.lane.b32.xlu0 %v3225_v27, %s2749_s28 }
 0x40a   : > { %v3516_v31 = vsel %vm3883_vm10, %v1732_v28, %v1734_v30  ;;  %vm1546_vm10 = vcmask 1047936  }
 0x40b   : > { %1677 = vrot.lane.b32.xlu1 %v3231_v29, %s2749_s28  ;;  %v1572_v33 = vpop.permute.xlu0 %1571 }
 0x40c   : > { %1587 = vst.msk [vmem:[#allocation2 + $0x160] sm:$0xff] %vm3879_vm11, %v1572_v33  ;;  %vm3885_vm11 = vcmask 1047840  }
 0x40d   : > { %v1574_v38 = vpop.permute.xlu1 %1573  ;;  %1515 = vrot.lane.b32.xlu0 %v3225_v27, %s2750_s23  ;;  %v1939_v27 = vld [vmem:[%s3780_s8] sm:$0x3f] }
 0x40e   : > { %v3531_v40 = vsel %vm3880_vm5, %v1572_v33, %v1574_v38  ;;  %vm3886_vm5 = vcmask 293888  }
 0x40f   : > { %1517 = vrot.lane.b32.xlu1 %v3231_v29, %s2750_s23  ;;  %v1712_v42 = vpop.permute.xlu0 %1711 }
 0x410   : > { %1727 = vst.msk [vmem:[#allocation2 + $0x240] sm:$0xff] %vm3881_vm0, %v1712_v42  ;;  %vm3887_vm0 = vcmask 1047696  }
 0x411   : > { %v1714_v44 = vpop.permute.xlu1 %1713  ;;  %1511 = vrot.lane.b32.xlu0 %v3213_v24, %s2750_s23 }
 0x412   : > { %v3539_v46 = vsel %vm3882_vm2, %v1712_v42, %v1714_v44  ;;  %vm1699_vm2 = vcmask 146432  }
 0x413   : > { %1513 = vrot.lane.b32.xlu1 %v3219_v51, %s2750_s23  ;;  %v1552_v29 = vpop.permute.xlu0 %1551 }
 0x414   : > { %1567 = vst.msk [vmem:[#allocation2 + $0x140] sm:$0xff] %vm3885_vm11, %v1552_v29  ;;  %vm1686_vm11 = vcmask 1047704  }
 0x415   : > { %v1554_v48 = vpop.permute.xlu1 %1553  ;;  %1942 = vperm.xlu0 %2681, %v1939_v27  }
 0x416   : > { %v3548_v24 = vsel %vm3886_vm5, %v1552_v29, %v1554_v48  ;;  %vm1679_vm5 = vcmask 154624  }
 0x417   : > { %v1692_v50 = vpop.permute.xlu0 %1691 }
 0x418   : > { %1707 = vst.msk [vmem:[#allocation2 + $0x220] sm:$0xff] %vm3887_vm0, %v1692_v50  ;;  %vm2112_vm0 = vcmask 553984  }
 0x419   : > { %v1694_v55 = vpop.permute.xlu1 %1693 }
 0x41a   : > { %v3552_v59 = vsel %vm1699_vm2, %v1692_v50, %v1694_v55 }
 0x41b   : > { %v1532_v51 = vpop.permute.xlu0 %1531 }
 0x41c   : > { %1547 = vst.msk [vmem:[#allocation2 + $0x120] sm:$0xff] %vm1546_vm10, %v1532_v51 }
 0x41d   : > { %v1534_v61 = vpop.permute.xlu1 %1533 }
 0x41e   : > { %v3556_v63 = vsel %vm1539_vm13, %v1532_v51, %v1534_v61 }
 0x41f   : > { %1548 = vst [vmem:[#allocation2 + $0x128] sm:$0xff] %v3556_v63  ;;  %v1672_v2 = vpop.permute.xlu0 %1671 }
 0x420   : > { %1687 = vst.msk [vmem:[#allocation2 + $0x200] sm:$0xff] %vm1686_vm11, %v1672_v2 }
 0x421   : > { %v1674_v4 = vpop.permute.xlu1 %1673 }
 0x422   : > { %v3561_v6 = vsel %vm1679_vm5, %v1672_v2, %v1674_v4  ;;  %v1931_v2 = vld [vmem:[#allocation2 + $0x2e0] sm:$0xff] }
 0x423   : > { %v1496_v8 = vpop.permute.xlu0 %1495  ;;  %v3563_v10 = vld [vmem:[#allocation2 + $0x120] sm:$0xff] }
 0x424   : > { %1509 = vst.msk [vmem:[#allocation2 + $0xf0] sm:$0xff] %vm1506_vm12, %v1496_v8  ;;  %vm3918_vm12 = vcmask 531456  }
 0x425   : > { %2113 = vst.msk [vmem:[#allocation2 + $0x120] sm:$0x3f] %vm2112_vm0, %v2702_v0  ;;  %v1498_v11 = vpop.permute.xlu1 %1497  ;;  %vm3923_vm0 = vcmask 1048096  }
 0x426   : > { %v1501_v13 = vsel %vm1499_vm9, %v1496_v8, %v1498_v11 }
 0x427   : > { %1510 = vst [vmem:[#allocation2 + $0xf8] sm:$0xff] %v1501_v13  ;;  %v1476_v14 = vpop.permute.xlu0 %1475  ;;  %1948 = vmatprep.subr.mxu0 %v1501_v13 }
 0x428   : > { %1489 = vst.msk [vmem:[#allocation2 + $0xd0] sm:$0xff] %vm1486_vm15, %v1476_v14  ;;  %vm3919_vm15 = vcmask 1048080  }
 0x429   : > { %v1478_v17 = vpop.permute.xlu1 %1477 }
 0x42a   : > { %v1481_v18 = vsel %vm1479_vm6, %v1476_v14, %v1478_v17 }
 0x42b   : > { %1490 = vst [vmem:[#allocation2 + $0xd8] sm:$0xff] %v1481_v18  ;;  %v1456_v20 = vpop.permute.xlu0 %1455  ;;  %v1869_v21 = vld [vmem:[#allocation2 + $0xf0] sm:$0xff] }
 0x42c   : > { %1469 = vst.msk [vmem:[#allocation2 + $0xb0] sm:$0xff] %vm1466_vm14, %v1456_v20  ;;  %1949 = vmatpush1.msra.mxu0 %v1869_v21  ;;  %vm3920_vm14 = vcmask 539648  }
 0x42d   : > { %2109 = vst.msk [vmem:[#allocation2 + $0xf0] sm:$0xff] %vm1298_vm4, %v2702_v0  ;;  %v1458_v23 = vpop.permute.xlu1 %1457  ;;  %1950 = vmatprep.subr.mxu0 %v3348_v32 }
 0x42e   : > { %v1461_v16 = vsel %vm1459_vm8, %v1456_v20, %v1458_v23  ;;  %1951 = vmatpush1.msra.mxu0 %v3362_v37 }
 0x42f   : > { %1470 = vst [vmem:[#allocation2 + $0xb8] sm:$0xff] %v1461_v16  ;;  %v1437_v26 = vpop.permute.xlu0 %1436  ;;  %1952 = vmatprep.subr.mxu0 %v1481_v18  ;;  %v1865_v52 = vld [vmem:[#allocation2 + $0xd0] sm:$0xff]  ;;  %v1927_v18 = vld [vmem:[#allocation2 + $0x2c0] sm:$0xff] }
 0x430   : > { %1449 = vst.msk [vmem:[#allocation2 + $0x90] sm:$0xff] %vm1446_vm1, %v1437_v26  ;;  %1953 = vmatpush1.msra.mxu0 %v1865_v52  ;;  %vm3921_vm1 = vcmask 1048088  }
 0x431   : > { %2107 = vst.msk [vmem:[#allocation2 + $0xd0] sm:$0xff] %vm1298_vm4, %v2702_v0  ;;  %v1439_v28 = vpop.permute.xlu1 %1438  ;;  %1954 = vmatprep.subr.mxu0 %v3357_v35 }
 0x432   : > { %v1441_v30 = vsel %vm648_vm3, %v1437_v26, %v1439_v28  ;;  %1955 = vmatpush1.msra.mxu0 %v3375_v41 }
 0x433   : > { %1450 = vst [vmem:[#allocation2 + $0x98] sm:$0xff] %v1441_v30  ;;  %v1417_v32 = vpop.permute.xlu0 %1416  ;;  %1956 = vmatprep.subr.mxu0 %v1461_v16  ;;  %v1861_v37 = vld [vmem:[#allocation2 + $0xb0] sm:$0xff]  ;;  %v1895_v16 = vld [vmem:[#allocation2 + $0x1c0] sm:$0xff] }
 0x434   : > { %1430 = vst.msk [vmem:[#allocation2 + $0x70] sm:$0xff] %vm1427_vm7, %v1417_v32  ;;  %1957 = vmatpush1.msra.mxu0 %v1861_v37  ;;  %vm3922_vm7 = vcmask 547840  }
 0x435   : > { %2105 = vst.msk [vmem:[#allocation2 + $0xb0] sm:$0xff] %vm1298_vm4, %v2702_v0  ;;  %v1419_v33 = vpop.permute.xlu1 %1418  ;;  %1958 = vmatprep.subr.mxu0 %v3370_v39 }
 0x436   : > { %v1422_v34 = vsel %vm3918_vm12, %v1417_v32, %v1419_v33  ;;  %1959 = vmatpush1.msra.mxu0 %v3388_v45  ;;  %vm3924_vm12 = vcmask 1047560  }
 0x437   : > { %1431 = vst [vmem:[#allocation2 + $0x78] sm:$0xff] %v1422_v34  ;;  %v1397_v35 = vpop.permute.xlu0 %1396  ;;  %1960 = vmatprep.subr.mxu0 %v1441_v30  ;;  %v1857_v41 = vld [vmem:[#allocation2 + $0x90] sm:$0xff]  ;;  %v1923_v30 = vld [vmem:[#allocation2 + $0x2a0] sm:$0xff] }
 0x438   : > { %1410 = vst.msk [vmem:[#allocation2 + $0x50] sm:$0xff] %vm3919_vm15, %v1397_v35  ;;  %1961 = vmatpush1.msra.mxu0 %v1857_v41  ;;  %vm3925_vm15 = vcmask 7168  }
 0x439   : > { %2103 = vst.msk [vmem:[#allocation2 + $0x90] sm:$0xff] %vm1298_vm4, %v2702_v0  ;;  %v1399_v36 = vpop.permute.xlu1 %1398  ;;  %1962 = vmatprep.subr.mxu0 %v3383_v43 }
 0x43a   : > { %v1402_v38 = vsel %vm3920_vm14, %v1397_v35, %v1399_v36  ;;  %1963 = vmatpush1.msra.mxu0 %v3401_v49  ;;  %vm3926_vm14 = vcmask 1047712  }
 0x43b   : > { %1411 = vst [vmem:[#allocation2 + $0x58] sm:$0xff] %v1402_v38  ;;  %v1377_v39 = vpop.permute.xlu0 %1376  ;;  %1964 = vmatprep.subr.mxu0 %v1422_v34  ;;  %v1853_v45 = vld [vmem:[#allocation2 + $0x70] sm:$0xff]  ;;  %v1891_v34 = vld [vmem:[#allocation2 + $0x1a0] sm:$0xff] }
 0x43c   : > { %1390 = vst.msk [vmem:[#allocation2 + $0x30] sm:$0xff] %vm3921_vm1, %v1377_v39  ;;  %1965 = vmatpush1.msra.mxu0 %v1853_v45  ;;  %vm3927_vm1 = vcmask 162816  }
 0x43d   : > { %2101 = vst.msk [vmem:[#allocation2 + $0x70] sm:$0xff] %vm1298_vm4, %v2702_v0  ;;  %v1379_v42 = vpop.permute.xlu1 %1378  ;;  %1966 = vmatprep.subr.mxu0 %v3396_v47 }
 0x43e   : > { %v1382_v44 = vsel %vm3922_vm7, %v1377_v39, %v1379_v42  ;;  %1967 = vmatpush1.msra.mxu0 %v3414_v57  ;;  %vm3928_vm7 = vcmask 1047568  }
 0x43f   : > { %1391 = vst [vmem:[#allocation2 + $0x38] sm:$0xff] %v1382_v44  ;;  %v1358_v43 = vpop.permute.xlu0 %1357  ;;  %1968 = vmatprep.subr.mxu0 %v1402_v38  ;;  %v1849_v49 = vld [vmem:[#allocation2 + $0x50] sm:$0xff]  ;;  %v1919_v38 = vld [vmem:[#allocation2 + $0x280] sm:$0xff] }
 0x440   : > { %1370 = vst.msk [vmem:[#allocation2 + $0x10] sm:$0xff] %vm3923_vm0, %v1358_v43  ;;  %1969 = vmatpush1.msra.mxu0 %v1849_v49  ;;  %vm3929_vm0 = vcmask 15360  }
 0x441   : > { %2099 = vst.msk [vmem:[#allocation2 + $0x50] sm:$0xff] %vm1298_vm4, %v2702_v0  ;;  %v1360_v27 = vpop.permute.xlu1 %1359  ;;  %1970 = vmatprep.subr.mxu0 %v3409_v53 }
 0x442   : > { %v1362_v29 = vsel %vm1298_vm4, %v1358_v43, %v1360_v27  ;;  %1971 = vmatpush1.msra.mxu0 %v3427_v62 }
 0x443   : > { %1371 = vst [vmem:[#allocation2 + $0x18] sm:$0xff] %v1362_v29  ;;  %v1816_v47 = vpop.permute.xlu0 %1815  ;;  %1972 = vmatprep.subr.mxu0 %v1382_v44  ;;  %v1845_v57 = vld [vmem:[#allocation2 + $0x30] sm:$0xff]  ;;  %v1887_v44 = vld [vmem:[#allocation2 + $0x180] sm:$0xff] }
 0x444   : > { %1829 = vst.msk [vmem:[#allocation2 + $0x2f0] sm:$0xff] %vm3924_vm12, %v1816_v47  ;;  %1973 = vmatpush1.msra.mxu0 %v1845_v57  ;;  %vm3930_vm12 = vcmask 1047808  }
 0x445   : > { %2097 = vst.msk [vmem:[#allocation2 + $0x30] sm:$0xff] %vm1298_vm4, %v2702_v0  ;;  %v1818_v48 = vpop.permute.xlu1 %1817  ;;  %1974 = vmatprep.subr.mxu0 %v3422_v60 }
 0x446   : > { %v1821_v50 = vsel %vm3925_vm15, %v1816_v47, %v1818_v48  ;;  %1975 = vmatpush1.msra.mxu0 %v3440_v3  ;;  %vm3931_vm15 = vcmask 261120  }
 0x447   : > { %v1656_v53 = vpop.permute.xlu0 %1655  ;;  %1976 = vmatprep.subr.mxu0 %v1362_v29  ;;  %v1841_v62 = vld [vmem:[#allocation2 + $0x10] sm:$0xff]  ;;  %2019 = vmatprep.subr.mxu1 %v1821_v50  ;;  %v1915_v29 = vld [vmem:[#allocation2 + $0x260] sm:$0xff] }
 0x448   : > { %1669 = vst.msk [vmem:[#allocation2 + $0x1f0] sm:$0xff] %vm3926_vm14, %v1656_v53  ;;  %1977 = vmatpush1.msra.mxu0 %v1841_v62  ;;  %vm3932_vm14 = vcmask 1047576   ;;  %v1883_v50 = vld [vmem:[#allocation2 + $0x160] sm:$0xff] }
 0x449   : > { %2095 = vst.msk [vmem:[#allocation2 + $0x10] sm:$0xff] %vm1298_vm4, %v2702_v0  ;;  %v1658_v55 = vpop.permute.xlu1 %1657  ;;  %1978 = vmatprep.subr.mxu0 %v3435_v1 }
 0x44a   : > { %v1661_v51 = vsel %vm3927_vm1, %v1656_v53, %v1658_v55  ;;  %1979 = vmatpush1.msra.mxu0 %v3452_v7  ;;  %v1899_v7 = vld [vmem:[#allocation2 + $0x1e0] sm:$0xff]  ;;  %vm3933_vm1 = vcmask 23552  }
 0x44b   : > { %v1796_v60 = vpop.permute.xlu0 %1795  ;;  %v1933_v61 = vld [vmem:[#allocation2 + $0x2f0] sm:$0xff]  ;;  %1980 = vmatprep.subr.mxu0 %v1661_v51  ;;  %v1911_v51 = vld [vmem:[#allocation2 + $0x240] sm:$0xff] }
 0x44c   : > { %1809 = vst.msk [vmem:[#allocation2 + $0x2d0] sm:$0xff] %vm3928_vm7, %v1796_v60  ;;  %2020 = vmatpush1.msra.mxu1 %v1933_v61  ;;  %vm3934_vm7 = vcmask 1047816  }
 0x44d   : > { %v1798_v3 = vpop.permute.xlu1 %1797  ;;  %2021 = vmatprep.subr.mxu1 %v3448_v5 }
 0x44e   : > { %v1801_v4 = vsel %vm3929_vm0, %v1796_v60, %v1798_v3  ;;  %2022 = vmatpush1.msra.mxu1 %v1931_v2  ;;  %vm3935_vm0 = vcmask 269312   ;;  %v1879_v2 = vld [vmem:[#allocation2 + $0x140] sm:$0xff] }
 0x44f   : > { %v1636_v8 = vpop.permute.xlu0 %1635  ;;  %v1901_v11 = vld [vmem:[#allocation2 + $0x1f0] sm:$0xff]  ;;  %2023 = vmatprep.subr.mxu1 %v1801_v4 }
 0x450   : > { %1649 = vst.msk [vmem:[#allocation2 + $0x1d0] sm:$0xff] %vm3930_vm12, %v1636_v8  ;;  %1981 = vmatpush2.msra.mxu0 %v1901_v11  ;;  %vm3936_vm12 = vcmask 1047584  }
 0x451   : > { %v1638_v1 = vpop.permute.xlu1 %1637  ;;  %1982 = vmatprep.subr.mxu0 %v3460_v9 }
 0x452   : > { %v1641_v13 = vsel %vm3931_vm15, %v1636_v8, %v1638_v1  ;;  %1983 = vmatpush2.msra.mxu0 %v1899_v7  ;;  %vm3937_vm15 = vcmask 31744   ;;  %v1907_v1 = vld [vmem:[#allocation2 + $0x220] sm:$0xff] }
 0x453   : > { %v1776_v14 = vpop.permute.xlu0 %1775  ;;  %v1929_v17 = vld [vmem:[#allocation2 + $0x2d0] sm:$0xff]  ;;  %1984 = vmatprep.subr.mxu0 %v1641_v13 }
 0x454   : > { %1789 = vst.msk [vmem:[#allocation2 + $0x2b0] sm:$0xff] %vm3932_vm14, %v1776_v14  ;;  %2024 = vmatpush1.msra.mxu1 %v1929_v17  ;;  %vm3938_vm14 = vcmask 1047824  }
 0x455   : > { %v1778_v5 = vpop.permute.xlu1 %1777  ;;  %2025 = vmatprep.subr.mxu1 %v3468_v12 }
 0x456   : > { %v1781_v20 = vsel %vm3933_vm1, %v1776_v14, %v1778_v5  ;;  %2026 = vmatpush1.msra.mxu1 %v1927_v18  ;;  %vm3939_vm1 = vcmask 277504  }
 0x457   : > { %v1616_v21 = vpop.permute.xlu0 %1615  ;;  %v1897_v23 = vld [vmem:[#allocation2 + $0x1d0] sm:$0xff]  ;;  %2027 = vmatprep.subr.mxu1 %v1781_v20  ;;  %v1903_v20 = vld [vmem:[#allocation2 + $0x200] sm:$0xff] }
 0x458   : > { %1629 = vst.msk [vmem:[#allocation2 + $0x1b0] sm:$0xff] %vm3934_vm7, %v1616_v21  ;;  %1985 = vmatpush2.msra.mxu0 %v1897_v23  ;;  %vm3940_vm7 = vcmask 1047680   ;;  %v1938_v23 = vld [vmem:[#allocation2 + $0x318] sm:$0xff] }
 0x459   : > { %v1618_v9 = vpop.permute.xlu1 %1617  ;;  %1986 = vmatprep.subr.mxu0 %v3476_v15 }
 0x45a   : > { %v1621_v26 = vsel %vm3935_vm0, %v1616_v21, %v1618_v9  ;;  %1987 = vmatpush2.msra.mxu0 %v1895_v16  ;;  %vm3941_vm0 = vcmask 130048   ;;  %v1937_v9 = vld [vmem:[#allocation2 + $0x310] sm:$0xff] }
 0x45b   : > { %v1756_v52 = vpop.permute.xlu0 %1755  ;;  %v1925_v28 = vld [vmem:[#allocation2 + $0x2b0] sm:$0xff]  ;;  %1988 = vmatprep.subr.mxu0 %v1621_v26  ;;  %v1835_v26 = vld [vmem:[%s3779_s7] sm:$0x3f] }
 0x45c   : > { %1769 = vst.msk [vmem:[#allocation2 + $0x290] sm:$0xff] %vm3936_vm12, %v1756_v52  ;;  %2028 = vmatpush1.msra.mxu1 %v1925_v28  ;;  %vm3942_vm12 = vcmask 1047832   ;;  %v1837_v16 = vld [vmem:[%s3779_s7 + $0x10] sm:$0x3f] }
 0x45d   : > { %v1758_v12 = vpop.permute.xlu1 %1757  ;;  %2029 = vmatprep.subr.mxu1 %v3484_v19 }
 0x45e   : > { %v1761_v32 = vsel %vm3937_vm15, %v1756_v52, %v1758_v12  ;;  %2030 = vmatpush1.msra.mxu1 %v1923_v30  ;;  %vm3943_vm15 = vcmask 285696  }
 0x45f   : > { %v1596_v37 = vpop.permute.xlu0 %1595  ;;  %v1893_v33 = vld [vmem:[#allocation2 + $0x1b0] sm:$0xff]  ;;  %2031 = vmatprep.subr.mxu1 %v1761_v32 }
 0x460   : > { %1609 = vst.msk [vmem:[#allocation2 + $0x190] sm:$0xff] %vm3938_vm14, %v1596_v37  ;;  %1989 = vmatpush2.msra.mxu0 %v1893_v33  ;;  %vm3944_vm14 = vcmask 1047688  }
 0x461   : > { %v1598_v15 = vpop.permute.xlu1 %1597  ;;  %1990 = vmatprep.subr.mxu0 %v3492_v22 }
 0x462   : > { %v1601_v35 = vsel %vm3939_vm1, %v1596_v37, %v1598_v15  ;;  %1991 = vmatpush2.msra.mxu0 %v1891_v34  ;;  %vm3945_vm1 = vcmask 138240  }
 0x463   : > { %v1736_v41 = vpop.permute.xlu0 %1735  ;;  %v1921_v36 = vld [vmem:[#allocation2 + $0x290] sm:$0xff]  ;;  %1992 = vmatprep.subr.mxu0 %v1601_v35 }
 0x464   : > { %1749 = vst.msk [vmem:[#allocation2 + $0x270] sm:$0xff] %vm3940_vm7, %v1736_v41  ;;  %2032 = vmatpush1.msra.mxu1 %v1921_v36  ;;  %vm3946_vm7 = vcmask 1047840  }
 0x465   : > { %v1738_v19 = vpop.permute.xlu1 %1737  ;;  %2033 = vmatprep.subr.mxu1 %v3500_v25 }
 0x466   : > { %v1741_v39 = vsel %vm3941_vm0, %v1736_v41, %v1738_v19  ;;  %2034 = vmatpush1.msra.mxu1 %v1919_v38  ;;  %vm3947_vm0 = vcmask 293888  }
 0x467   : > { %v1576_v45 = vpop.permute.xlu0 %1575  ;;  %v1889_v42 = vld [vmem:[#allocation2 + $0x190] sm:$0xff]  ;;  %2035 = vmatprep.subr.mxu1 %v1741_v39 }
 0x468   : > { %1589 = vst.msk [vmem:[#allocation2 + $0x170] sm:$0xff] %vm3942_vm12, %v1576_v45  ;;  %1993 = vmatpush2.msra.mxu0 %v1889_v42  ;;  %vm3948_vm12 = vcmask 1047696  }
 0x469   : > { %v1578_v22 = vpop.permute.xlu1 %1577  ;;  %1994 = vmatprep.subr.mxu0 %v3508_v54 }
 0x46a   : > { %v1581_v43 = vsel %vm3943_vm15, %v1576_v45, %v1578_v22  ;;  %1995 = vmatpush2.msra.mxu0 %v1887_v44  ;;  %vm1526_vm15 = vcmask 1047944   ;;  %v3727_v22 = vld [vmem:[%s3781_s9] sm:$0x77] }
 0x46b   : > { %v1716_v49 = vpop.permute.xlu0 %1715  ;;  %v1917_v27 = vld [vmem:[#allocation2 + $0x270] sm:$0xff]  ;;  %1996 = vmatprep.subr.mxu0 %v1581_v43  ;;  %v2446_v44 = vcombine.high %v3727_v22, %v3727_v22  ;;  %v2439_v43 = vld [vmem:[%s3782_s10] sm:$0x7] }
 0x46c   : > { %1729 = vst.msk [vmem:[#allocation2 + $0x250] sm:$0xff] %vm3944_vm14, %v1716_v49  ;;  %2036 = vmatpush1.msra.mxu1 %v1917_v27  ;;  %vm3950_vm14 = vcmp.eq.s32.totalorder %v3001_v58, 1 }
 0x46d   : > { %v1718_v25 = vpop.permute.xlu1 %1717  ;;  %2037 = vmatprep.subr.mxu1 %v3516_v31 }
 0x46e   : > { %v1721_v47 = vsel %vm3945_vm1, %v1716_v49, %v1718_v25  ;;  %2038 = vmatpush1.msra.mxu1 %v1915_v29  ;;  %vm3962_vm1 = vcmask 179200  }
 0x46f   : > { %v1556_v57 = vpop.permute.xlu0 %1555  ;;  %v1885_v48 = vld [vmem:[#allocation2 + $0x170] sm:$0xff]  ;;  %2039 = vmatprep.subr.mxu1 %v1721_v47 }
 0x470   : > { %1569 = vst.msk [vmem:[#allocation2 + $0x150] sm:$0xff] %vm3946_vm7, %v1556_v57  ;;  %1997 = vmatpush2.msra.mxu0 %v1885_v48  ;;  %vm2359_vm7 = vcmask 1045536  }
 0x471   : > { %v1558_v54 = vpop.permute.xlu1 %1557  ;;  %1998 = vmatprep.subr.mxu0 %v3531_v40 }
 0x472   : > { %v1561_v53 = vsel %vm3947_vm0, %v1556_v57, %v1558_v54  ;;  %1999 = vmatpush2.msra.mxu0 %v1883_v50  ;;  %vm2313_vm0 = vcmask 1045656  }
 0x473   : > { %v1696_v62 = vpop.permute.xlu0 %1695  ;;  %v1913_v55 = vld [vmem:[#allocation2 + $0x250] sm:$0xff]  ;;  %2000 = vmatprep.subr.mxu0 %v1561_v53 }
 0x474   : > { %1709 = vst.msk [vmem:[#allocation2 + $0x230] sm:$0xff] %vm3948_vm12, %v1696_v62  ;;  %2040 = vmatpush1.msra.mxu1 %v1913_v55  ;;  %vm3963_vm12 = vcmask 31744  }
 0x475   : > { %v1698_v31 = vpop.permute.xlu1 %1697  ;;  %2041 = vmatprep.subr.mxu1 %v3539_v46 }
 0x476   : > { %v1701_v60 = vsel %vm1699_vm2, %v1696_v62, %v1698_v31  ;;  %2042 = vmatpush1.msra.mxu1 %v1911_v51 }
 0x477   : > { %v1536_v61 = vpop.permute.xlu0 %1535  ;;  %v1881_v3 = vld [vmem:[#allocation2 + $0x150] sm:$0xff]  ;;  %2043 = vmatprep.subr.mxu1 %v1701_v60 }
 0x478   : > { %1549 = vst.msk [vmem:[#allocation2 + $0x130] sm:$0xff] %vm1546_vm10, %v1536_v61  ;;  %2001 = vmatpush2.msra.mxu0 %v1881_v3  ;;  %vm1519_vm10 = vcmask 400384  }
 0x479   : > { %v1538_v40 = vpop.permute.xlu1 %1537  ;;  %2002 = vmatprep.subr.mxu0 %v3548_v24 }
 0x47a   : > { %v1541_v4 = vsel %vm1539_vm13, %v1536_v61, %v1538_v40  ;;  %2003 = vmatpush2.msra.mxu0 %v1879_v2 }
 0x47b   : > { %v1676_v8 = vpop.permute.xlu0 %1675  ;;  %v1909_v11 = vld [vmem:[#allocation2 + $0x230] sm:$0xff]  ;;  %2004 = vmatprep.subr.mxu0 %v1541_v4 }
 0x47c   : > { %1689 = vst.msk [vmem:[#allocation2 + $0x210] sm:$0xff] %vm1686_vm11, %v1676_v8  ;;  %2044 = vmatpush1.msra.mxu1 %v1909_v11  ;;  %vm3949_vm11 = vcmp.eq.s32.totalorder %v2997_v56, 1 }
 0x47d   : > { %v1678_v46 = vpop.permute.xlu1 %1677  ;;  %2045 = vmatprep.subr.mxu1 %v3552_v59 }
 0x47e   : > { %v1681_v7 = vsel %vm1679_vm5, %v1676_v8, %v1678_v46  ;;  %2046 = vmatpush1.msra.mxu1 %v1907_v1 }
 0x47f   : > { %v1516_v13 = vpop.permute.xlu0 %1515  ;;  %v1877_v24 = vld [vmem:[#allocation2 + $0x130] sm:$0xff]  ;;  %2047 = vmatprep.subr.mxu1 %v1681_v7 }
 0x480   : > { %1529 = vst.msk [vmem:[#allocation2 + $0x110] sm:$0xff] %vm1526_vm15, %v1516_v13  ;;  %2005 = vmatpush2.msra.mxu0 %v1877_v24 }
 0x481   : > { %v1518_v14 = vpop.permute.xlu1 %1517  ;;  %2006 = vmatprep.subr.mxu0 %v3556_v63 }
 0x482   : > { %v1521_v17 = vsel %vm1519_vm10, %v1516_v13, %v1518_v14  ;;  %2007 = vmatpush2.msra.mxu0 %v3563_v10  ;;  %v1936_v10 = vld [vmem:[#allocation2 + $0x308] sm:$0xff] }
 0x483   : > { %1530 = vst [vmem:[#allocation2 + $0x118] sm:$0xff] %v1521_v17  ;;  %v1512_v59 = vpop.permute.xlu0 %1511  ;;  %v1905_v5 = vld [vmem:[#allocation2 + $0x210] sm:$0xff]  ;;  %2008 = vmatprep.subr.mxu0 %v1521_v17 }
 0x484   : > { %1527 = vst.msk [vmem:[#allocation2 + $0x100] sm:$0xff] %vm1526_vm15, %v1512_v59  ;;  %2048 = vmatpush1.msra.mxu1 %v1905_v5  ;;  %vm2267_vm15 = vcmask 1045776  }
 0x485   : > { %v1514_v18 = vpop.permute.xlu1 %1513  ;;  %2049 = vmatprep.subr.mxu1 %v3561_v6  ;;  %v1935_v6 = vld [vmem:[#allocation2 + $0x300] sm:$0xff] }
 0x486   : > { %v1520_v21 = vsel %vm1519_vm10, %v1512_v59, %v1514_v18  ;;  %2050 = vmatpush1.msra.mxu1 %v1903_v20 }
 0x487   : > { %1528 = vst [vmem:[#allocation2 + $0x108] sm:$0xff] %v1520_v21  ;;  %2079 = vmatprep.subr.mxu1 %v1938_v23  ;;  %v1873_v63 = vld [vmem:[#allocation2 + $0x110] sm:$0xff] }
 0x488   : > { %2009 = vmatpush2.msra.mxu0 %v1873_v63  ;;  %2111 = vst.msk [vmem:[#allocation2 + $0x110] sm:$0xff] %vm1298_vm4, %v2702_v0  ;;  %2080 = vmatpush2.msra.mxu1 %v1937_v9 }
 0x489   : > { %2081 = vmatprep.subr.mxu1 %v1936_v10  ;;  %2010 = vmatprep.subr.mxu0 %v1520_v21 }
 0x48a   : > { %2082 = vmatpush2.msra.mxu1 %v1935_v6 }
 0x48b   : > { %v1871_v52 = vld [vmem:[#allocation2 + $0x100] sm:$0xff]  ;;  %2084 = vmatmul.mubr.f32.vlgmr.msra.gmra.mxu1 %v1837_v16 }
 0x48c   : > { %2011 = vmatpush2.msra.mxu0 %v1871_v52  ;;  %2110 = vst.msk [vmem:[#allocation2 + $0x100] sm:$0xff] %vm1298_vm4, %v2702_v0  ;;  %2619 = vmatprep.mubr.msk.f32.mxu1 %vm3962_vm1, %v2446_v44  ;;  %vm2175_vm1 = vcmask 1046016  }
 0x48d   : > { %2013 = vmatmul.mubr.f32.vlgmr.msra.gmra.mxu0 %v1835_v26 }
 0x490   : > { %v1943_v28 = vpop.permute.xlu0 %1942 }
 0x54b   : > { %v2085_v30 = vpop.f32.mrf.mxu1 }
 0x54d   : > { %v2014_v12 = vpop.f32.mrf.mxu0  ;;  %v2087_v34 = vpop.f32.mrf.mxu1 }
 0x54e   : > { %v2015_v32 = vadd.f32 %v2014_v12, %v1943_v28 }
 0x54f   : > { %v2016_v37 = vpop.f32.mrf.mxu0 }
 0x550   : > { %v2086_v33 = vadd.f32 %v2085_v30, %v2015_v32  ;;  %v2017_v15 = vadd.f32 %v2016_v37, %v1943_v28 }
 0x552   : > { %v2090_v35 = vmax.f32 %v2086_v33, 0.0  ;;  %v2088_v41 = vadd.f32 %v2087_v34, %v2017_v15 }
 0x554   : > { %v2092_v36 = vsel %vm3949_vm11, %v2090_v35, 0.0  ;;  %v2091_v19 = vmax.f32 %v2088_v41, 0.0  ;;  %vm2221_vm11 = vcmask 1045896  }
 0x555   : > { %2398 = vst [vmem:[#allocation2 + $0x120] sm:$0x3f] %v2092_v36  ;;  %2352 = vrot.lane.b32.xlu1 %v2092_v36, %s3913_s24  ;;  %v2126_v56 = vrot.slane %v2092_v36, 2  ;;  %v2141_v38 = vrot.slane %v2092_v36, 4  ;;  %v2156_v45 = vrot.slane %v2092_v36, 6 }
 0x556   : > { %v2093_v0 = vsel %vm3950_vm14, %v2091_v19, 0.0  ;;  %vm3964_vm14 = vcmask 277504  }
 0x557   : > { %2399 = vst [vmem:[#allocation2 + $0x128] sm:$0x3f] %v2093_v0  ;;  %2354 = vrot.lane.b32.xlu0 %v2093_v0, %s3913_s24  ;;  %v2127_v58 = vrot.slane %v2093_v0, 2  ;;  %v2142_v39 = vrot.slane %v2093_v0, 4  ;;  %v2157_v42 = vrot.slane %v2093_v0, 6  ;;  %s3959_s24 = smov 67  }
 0x559   : > { %2306 = vrot.lane.b32.xlu1 %v2092_v36, %s2749_s28 }
 0x55b   : > { %2308 = vrot.lane.b32.xlu0 %v2093_v0, %s2749_s28 }
 0x55d   : > { %2260 = vrot.lane.b32.xlu1 %v2092_v36, %s3914_s16 }
 0x55f   : > { %2262 = vrot.lane.b32.xlu0 %v2093_v0, %s3914_s16  ;;  %s3954_s16 = smov 51  }
 0x561   : > { %2214 = vrot.lane.b32.xlu1 %v2092_v36, %s2750_s23 }
 0x563   : > { %2216 = vrot.lane.b32.xlu0 %v2093_v0, %s2750_s23  ;;  %s3957_s23 = smov 66  }
 0x565   : > { %2168 = vrot.lane.b32.xlu1 %v2092_v36, %s2709_s29 }
 0x567   : > { %2170 = vrot.lane.b32.xlu0 %v2093_v0, %s2709_s29  ;;  %s3951_s29 = smov 20  }
 0x569   : > { %2116 = vrot.lane.b32.xlu1 %v2092_v36, %s2734_s20 }
 0x56b   : > { %2118 = vrot.lane.b32.xlu0 %v2093_v0, %s2734_s20  ;;  %s3955_s20 = smov 50  }
 0x56d   : > { %2362 = vrot.lane.b32.xlu1 %v2126_v56, %s2739_s26 }
 0x56f   : > { %2364 = vrot.lane.b32.xlu0 %v2127_v58, %s2739_s26 }
 0x571   : > { %2329 = vrot.lane.b32.xlu1 %v2141_v38, %s3917_s15 }
 0x573   : > { %2331 = vrot.lane.b32.xlu0 %v2142_v39, %s3917_s15  ;;  %s3952_s15 = smov 36  }
 0x575   : > { %2342 = vrot.lane.b32.xlu1 %v2156_v45, %s3915_s21 }
 0x577   : > { %2344 = vrot.lane.b32.xlu0 %v2157_v42, %s3915_s21  ;;  %s3953_s21 = smov 48  }
 0x579   : > { %2316 = vrot.lane.b32.xlu1 %v2126_v56, %s2747_s12 }
 0x57b   : > { %2318 = vrot.lane.b32.xlu0 %v2127_v58, %s2747_s12  ;;  %s3961_s12 = smov 1  }
 0x57d   : > { %2283 = vrot.lane.b32.xlu1 %v2141_v38, %s2738_s25 }
 0x57f   : > { %2285 = vrot.lane.b32.xlu0 %v2142_v39, %s2738_s25  ;;  %s3960_s25 = smov 2  }
 0x581   : > { %2296 = vrot.lane.b32.xlu1 %v2156_v45, %s3951_s29 }
 0x583   : > { %2298 = vrot.lane.b32.xlu0 %v2157_v42, %s3951_s29 }
 0x585   : > { %2270 = vrot.lane.b32.xlu1 %v2126_v56, %s3912_s19 }
 0x587   : > { %2272 = vrot.lane.b32.xlu0 %v2127_v58, %s3912_s19  ;;  %s3956_s19 = smov 52  }
 0x589   : > { %2237 = vrot.lane.b32.xlu1 %v2141_v38, %s3952_s15 }
 0x58b   : > { %2239 = vrot.lane.b32.xlu0 %v2142_v39, %s3952_s15  ;;  %s386_s15 = scalar_lea.vmem %s3783_s11, %s3980_s13 }
 0x58d   : > { %2250 = vrot.lane.b32.xlu1 %v2156_v45, %s3916_s22 }
 0x58f   : > { %2252 = vrot.lane.b32.xlu0 %v2157_v42, %s3916_s22  ;;  %s3958_s22 = smov 65  }
 0x591   : > { %2224 = vrot.lane.b32.xlu1 %v2126_v56, %s3953_s21 }
 0x593   : > { %2226 = vrot.lane.b32.xlu0 %v2127_v58, %s3953_s21 }
 0x595   : > { %2191 = vrot.lane.b32.xlu1 %v2141_v38, %s3954_s16 }
 0x597   : > { %2193 = vrot.lane.b32.xlu0 %v2142_v39, %s3954_s16 }
 0x599   : > { %2204 = vrot.lane.b32.xlu1 %v2156_v45, %s3955_s20 }
 0x59b   : > { %2206 = vrot.lane.b32.xlu0 %v2157_v42, %s3955_s20 }
 0x59d   : > { %2178 = vrot.lane.b32.xlu1 %v2126_v56, %s3956_s19 }
 0x59f   : > { %2180 = vrot.lane.b32.xlu0 %v2127_v58, %s3956_s19 }
 0x5a1   : > { %2143 = vrot.lane.b32.xlu1 %v2141_v38, %s3957_s23 }
 0x5a3   : > { %2145 = vrot.lane.b32.xlu0 %v2142_v39, %s3957_s23 }
 0x5a5   : > { %2158 = vrot.lane.b32.xlu1 %v2156_v45, %s3958_s22 }
 0x5a7   : > { %2160 = vrot.lane.b32.xlu0 %v2157_v42, %s3958_s22 }
 0x5a9   : > { %2128 = vrot.lane.b32.xlu1 %v2126_v56, %s3959_s24 }
 0x5ab   : > { %2130 = vrot.lane.b32.xlu0 %v2127_v58, %s3959_s24 }
 0x5ad   : > { %2375 = vrot.lane.b32.xlu1 %v2141_v38, %s3960_s25 }
 0x5af   : > { %2377 = vrot.lane.b32.xlu0 %v2142_v39, %s3960_s25 }
 0x5b1   : > { %2388 = vrot.lane.b32.xlu1 %v2156_v45, %s3961_s12 }
 0x5b3   : > { %2390 = vrot.lane.b32.xlu0 %v2157_v42, %s3961_s12 }
 0x5b5   : > { %2442 = vperm.xlu1 %2682, %v2439_v43  }
 0x5c7   : > { %v2353_v49 = vpop.permute.xlu1 %2352 }
 0x5c8   : > { %2360 = vst.msk [vmem:[#allocation2 + $0xf0] sm:$0x3f] %vm2359_vm7, %v2353_v49  ;;  %vm2123_vm7 = vcmask 1046048  }
 0x5c9   : > { %v2355_v27 = vpop.permute.xlu0 %2354 }
 0x5ca   : > { %v2356_v25 = vsel %vm3963_vm12, %v2353_v49, %v2355_v27  ;;  %vm2339_vm12 = vcmask 1041544  }
 0x5cb   : > { %2361 = vst [vmem:[#allocation2 + $0xf8] sm:$0x3f] %v2356_v25  ;;  %v2307_v29 = vpop.permute.xlu1 %2306 }
 0x5cc   : > { %2314 = vst.msk [vmem:[#allocation2 + $0xc0] sm:$0x3f] %vm2313_vm0, %v2307_v29  ;;  %vm2372_vm0 = vcmask 1043480  }
 0x5cd   : > { %v2309_v47 = vpop.permute.xlu0 %2308 }
 0x5ce   : > { %v2310_v57 = vsel %vm1679_vm5, %v2307_v29, %v2309_v47  ;;  %vm2369_vm5 = vcmask 1047582  }
 0x5cf   : > { %2315 = vst [vmem:[#allocation2 + $0xc8] sm:$0x3f] %v2310_v57  ;;  %v2261_v48 = vpop.permute.xlu1 %2260 }
 0x5d0   : > { %2268 = vst.msk [vmem:[#allocation2 + $0x90] sm:$0x3f] %vm2267_vm15, %v2261_v48  ;;  %vm3965_vm15 = vcmask 23552  }
 0x5d1   : > { %v2263_v54 = vpop.permute.xlu0 %2262 }
 0x5d2   : > { %v2264_v50 = vsel %vm3964_vm14, %v2261_v48, %v2263_v54  ;;  %vm2326_vm14 = vcmask 1043600  }
 0x5d3   : > { %2269 = vst [vmem:[#allocation2 + $0x98] sm:$0x3f] %v2264_v50  ;;  %v2215_v53 = vpop.permute.xlu1 %2214 }
 0x5d4   : > { %2222 = vst.msk [vmem:[#allocation2 + $0x60] sm:$0x3f] %vm2221_vm11, %v2215_v53  ;;  %vm3966_vm11 = vcmask 138240  }
 0x5d5   : > { %v2217_v62 = vpop.permute.xlu0 %2216 }
 0x5d6   : > { %v2218_v55 = vsel %vm1519_vm10, %v2215_v53, %v2217_v62  ;;  %vm2336_vm10 = vcmask 1047692  }
 0x5d7   : > { %2223 = vst [vmem:[#allocation2 + $0x68] sm:$0x3f] %v2218_v55  ;;  %v2169_v31 = vpop.permute.xlu1 %2168 }
 0x5d8   : > { %2176 = vst.msk [vmem:[#allocation2 + $0x30] sm:$0x3f] %vm2175_vm1, %v2169_v31  ;;  %vm3967_vm1 = vcmask 130048  }
 0x5d9   : > { %v2171_v51 = vpop.permute.xlu0 %2170 }
 0x5da   : > { %v2172_v60 = vsel %vm648_vm3, %v2169_v31, %v2171_v51  ;;  %vm2349_vm3 = vcmask 1047682  }
 0x5db   : > { %2177 = vst [vmem:[#allocation2 + $0x38] sm:$0x3f] %v2172_v60  ;;  %v2117_v61 = vpop.permute.xlu1 %2116 }
 0x5dc   : > { %2124 = vst.msk [vmem:[#allocation2] sm:$0x3f] %vm2123_vm7, %v2117_v61  ;;  %vm2290_vm7 = vcmask 1047812  }
 0x5dd   : > { %v2119_v3 = vpop.permute.xlu0 %2118 }
 0x5de   : > { %v2120_v40 = vsel %vm1298_vm4, %v2117_v61, %v2119_v3  ;;  %vm2323_vm4 = vcmask 1047702  }
 0x5df   : > { %2125 = vst [vmem:[#allocation2 + $0x8] sm:$0x3f] %v2120_v40  ;;  %v2363_v2 = vpop.permute.xlu1 %2362 }
 0x5e0   : > { %2370 = vst.msk [vmem:[#allocation2 + $0xf0] sm:$0xc0] %vm2369_vm5, %v2363_v2  ;;  %vm2293_vm5 = vcmask 1041664  }
 0x5e1   : > { %2373 = vst.msk [vmem:[#allocation2 + $0x100] sm:$0xf] %vm2372_vm0, %v2363_v2  ;;  %v2365_v4 = vpop.permute.xlu0 %2364  ;;  %vm2303_vm0 = vcmask 1047714  }
 0x5e2   : > { %v2366_v8 = vsel %vm3965_vm15, %v2363_v2, %v2365_v4  ;;  %vm2280_vm15 = vcmask 1043720  }
 0x5e3   : > { %2371 = vst [vmem:[#allocation2 + $0x108] ss:$-12 sps:$4 sm:$0xcf] %v2366_v8   ;;  %v2330_v11 = vpop.permute.xlu1 %2329 }
 0x5e4   : > { %2337 = vst.msk [vmem:[#allocation2 + $0xd0] sm:$0xf0] %vm2336_vm10, %v2330_v11  ;;  %vm3968_vm10 = vcmask 261120  }
 0x5e5   : > { %2340 = vst.msk [vmem:[#allocation2 + $0xe0] sm:$0x3] %vm2339_vm12, %v2330_v11  ;;  %v2332_v46 = vpop.permute.xlu0 %2331  ;;  %vm2277_vm12 = vcmask 1047822  }
 0x5e6   : > { %v2333_v1 = vsel %vm3966_vm11, %v2330_v11, %v2332_v46  ;;  %vm2247_vm11 = vcmask 1041696  }
 0x5e7   : > { %2338 = vst [vmem:[#allocation2 + $0xe8] ss:$-12 sps:$4 sm:$0xf3] %v2333_v1   ;;  %v2343_v7 = vpop.permute.xlu1 %2342  ;;  %v2431_v59 = vld [vmem:[#allocation2 + $0xf0] sm:$0xff] }
 0x5e8   : > { %2350 = vst.msk [vmem:[#allocation2 + $0xe0] sm:$0xfc] %vm2349_vm3, %v2343_v7  ;;  %vm3969_vm3 = vcmask 162816  }
 0x5e9   : > { %v2345_v13 = vpop.permute.xlu0 %2344 }
 0x5ea   : > { %v2346_v24 = vsel %vm3967_vm1, %v2343_v7, %v2345_v13  ;;  %v2432_v14 = vld [vmem:[#allocation2 + $0xf8] sm:$0xff]  ;;  %vm3971_vm1 = vcmask 293888  }
 0x5eb   : > { %2351 = vst [vmem:[#allocation2 + $0xe8] sm:$0xfc] %v2346_v24  ;;  %2455 = vmatprep.subr.mxu1 %v2432_v14  ;;  %v2317_v17 = vpop.permute.xlu1 %2316 }
 0x5ec   : > { %2324 = vst.msk [vmem:[#allocation2 + $0xc0] sm:$0xc0] %vm2323_vm4, %v2317_v17  ;;  %2456 = vmatpush1.msra.mxu1 %v2431_v59  ;;  %vm3970_vm4 = vcmask 269312  }
 0x5ed   : > { %2327 = vst.msk [vmem:[#allocation2 + $0xd0] sm:$0xf] %vm2326_vm14, %v2317_v17  ;;  %v2319_v5 = vpop.permute.xlu0 %2318  ;;  %vm2257_vm14 = vcmask 1047834  }
 0x5ee   : > { %v2320_v18 = vsel %vm1699_vm2, %v2317_v17, %v2319_v5  ;;  %vm2244_vm2 = vcmask 1047844  }
 0x5ef   : > { %2325 = vst [vmem:[#allocation2 + $0xd8] ss:$-12 sps:$4 sm:$0xcf] %v2320_v18   ;;  %v2284_v20 = vpop.permute.xlu1 %2283  ;;  %v2429_v10 = vld [vmem:[#allocation2 + $0xe0] sm:$0xff] }
 0x5f0   : > { %2291 = vst.msk [vmem:[#allocation2 + $0xa0] sm:$0xf0] %vm2290_vm7, %v2284_v20  ;;  %vm2231_vm7 = vcmask 1047942  }
 0x5f1   : > { %2294 = vst.msk [vmem:[#allocation2 + $0xb0] sm:$0x3] %vm2293_vm5, %v2284_v20  ;;  %v2286_v21 = vpop.permute.xlu0 %2285  ;;  %vm2234_vm5 = vcmask 1043840  }
 0x5f2   : > { %v2287_v23 = vsel %vm3968_vm10, %v2284_v20, %v2286_v21  ;;  %v2430_v63 = vld [vmem:[#allocation2 + $0xe8] sm:$0xff]  ;;  %vm2198_vm10 = vcmask 1047964  }
 0x5f3   : > { %2292 = vst [vmem:[#allocation2 + $0xb8] ss:$-12 sps:$4 sm:$0xf3] %v2287_v23   ;;  %2457 = vmatprep.subr.mxu1 %v2430_v63  ;;  %v2297_v9 = vpop.permute.xlu1 %2296  ;;  %v2425_v32 = vld [vmem:[#allocation2 + $0xc0] sm:$0xff] }
 0x5f4   : > { %2304 = vst.msk [vmem:[#allocation2 + $0xb0] sm:$0xfc] %vm2303_vm0, %v2297_v9  ;;  %2458 = vmatpush1.msra.mxu1 %v2429_v10  ;;  %v2427_v28 = vld [vmem:[#allocation2 + $0xd0] sm:$0xff]  ;;  %vm3972_vm0 = vcmask 285696  }
 0x5f5   : > { %v2299_v16 = vpop.permute.xlu0 %2298 }
 0x5f6   : > { %v2300_v6 = vsel %vm3969_vm3, %v2297_v9, %v2299_v16  ;;  %v2428_v26 = vld [vmem:[#allocation2 + $0xd8] sm:$0xff]  ;;  %v2426_v12 = vld [vmem:[#allocation2 + $0xc8] sm:$0xff]  ;;  %vm2185_vm3 = vcmask 1047974  }
 0x5f7   : > { %2305 = vst [vmem:[#allocation2 + $0xb8] sm:$0xfc] %v2300_v6  ;;  %2459 = vmatprep.subr.mxu1 %v2428_v26  ;;  %v2271_v52 = vpop.permute.xlu1 %2270 }
 0x5f8   : > { %2278 = vst.msk [vmem:[#allocation2 + $0x90] sm:$0xc0] %vm2277_vm12, %v2271_v52  ;;  %2460 = vmatpush1.msra.mxu1 %v2427_v28  ;;  %vm2201_vm12 = vcmask 1041816   ;;  %v2437_v28 = vld [vmem:[#allocation2 + $0x120] sm:$0x3f] }
 0x5f9   : > { %2281 = vst.msk [vmem:[#allocation2 + $0xa0] sm:$0xf] %vm2280_vm15, %v2271_v52  ;;  %v2273_v30 = vpop.permute.xlu0 %2272  ;;  %2461 = vmatprep.subr.mxu1 %v2426_v12  ;;  %vm2211_vm15 = vcmask 1047954  }
 0x5fa   : > { %v2274_v37 = vsel %vm3970_vm4, %v2271_v52, %v2273_v30  ;;  %2462 = vmatpush1.msra.mxu1 %v2425_v32  ;;  %vm2135_vm4 = vcmask 1048094   ;;  %v2438_v52 = vld [vmem:[#allocation2 + $0x128] sm:$0x3f] }
 0x5fb   : > { %2279 = vst [vmem:[#allocation2 + $0xa8] ss:$-12 sps:$4 sm:$0xcf] %v2274_v37   ;;  %v2238_v33 = vpop.permute.xlu1 %2237  ;;  %v2423_v36 = vld [vmem:[#allocation2 + $0xb0] sm:$0xff] }
 0x5fc   : > { %2245 = vst.msk [vmem:[#allocation2 + $0x70] sm:$0xf0] %vm2244_vm2, %v2238_v33  ;;  %vm2188_vm2 = vcmask 1043872  }
 0x5fd   : > { %2248 = vst.msk [vmem:[#allocation2 + $0x80] sm:$0x3] %vm2247_vm11, %v2238_v33  ;;  %v2240_v15 = vpop.permute.xlu0 %2239  ;;  %vm3973_vm11 = vcmask 539648  }
 0x5fe   : > { %v2241_v34 = vsel %vm3971_vm1, %v2238_v33, %v2240_v15  ;;  %v2424_v35 = vld [vmem:[#allocation2 + $0xb8] sm:$0xff]  ;;  %vm2382_vm1 = vcmask 1047572  }
 0x5ff   : > { %2246 = vst [vmem:[#allocation2 + $0x88] ss:$-12 sps:$4 sm:$0xf3] %v2241_v34   ;;  %2463 = vmatprep.subr.mxu1 %v2424_v35  ;;  %v2251_v41 = vpop.permute.xlu1 %2250  ;;  %v2419_v42 = vld [vmem:[#allocation2 + $0x90] sm:$0xff] }
 0x600   : > { %2258 = vst.msk [vmem:[#allocation2 + $0x80] sm:$0xfc] %vm2257_vm14, %v2251_v41  ;;  %2464 = vmatpush1.msra.mxu1 %v2423_v36  ;;  %v2421_v38 = vld [vmem:[#allocation2 + $0xa0] sm:$0xff]  ;;  %vm2138_vm14 = vcmask 1043992  }
 0x601   : > { %v2253_v19 = vpop.permute.xlu0 %2252 }
 0x602   : > { %v2254_v0 = vsel %vm3972_vm0, %v2251_v41, %v2253_v19  ;;  %v2422_v56 = vld [vmem:[#allocation2 + $0xa8] sm:$0xff]  ;;  %v2420_v39 = vld [vmem:[#allocation2 + $0x98] sm:$0xff]  ;;  %vm2395_vm0 = vcmask 1047562  }
 0x603   : > { %2259 = vst [vmem:[#allocation2 + $0x88] sm:$0xfc] %v2254_v0  ;;  %2465 = vmatprep.subr.mxu1 %v2422_v56  ;;  %v2225_v58 = vpop.permute.xlu1 %2224 }
 0x604   : > { %2232 = vst.msk [vmem:[#allocation2 + $0x60] sm:$0xc0] %vm2231_vm7, %v2225_v58  ;;  %2466 = vmatpush1.msra.mxu1 %v2421_v38  ;;  %vm2385_vm7 = vcmask 1041424  }
 0x605   : > { %2235 = vst.msk [vmem:[#allocation2 + $0x70] sm:$0xf] %vm2234_vm5, %v2225_v58  ;;  %v2227_v45 = vpop.permute.xlu0 %2226  ;;  %2467 = vmatprep.subr.mxu1 %v2420_v39  ;;  %vm3975_vm5 = vcmask 547840  }
 0x606   : > { %v2228_v44 = vsel %vm1539_vm13, %v2225_v58, %v2227_v45  ;;  %2468 = vmatpush1.msra.mxu1 %v2419_v42  ;;  %vm2153_vm13 = vcmask 1041936  }
 0x607   : > { %2233 = vst [vmem:[#allocation2 + $0x78] ss:$-12 sps:$4 sm:$0xcf] %v2228_v44   ;;  %v2192_v43 = vpop.permute.xlu1 %2191  ;;  %v2417_v47 = vld [vmem:[#allocation2 + $0x80] sm:$0xff] }
 0x608   : > { %2199 = vst.msk [vmem:[#allocation2 + $0x40] sm:$0xf0] %vm2198_vm10, %v2192_v43  ;;  %vm3976_vm10 = vcmask 15360  }
 0x609   : > { %2202 = vst.msk [vmem:[#allocation2 + $0x50] sm:$0x3] %vm2201_vm12, %v2192_v43  ;;  %v2194_v49 = vpop.permute.xlu0 %2193  ;;  %vm3977_vm12 = vcmask 7168  }
 0x60a   : > { %v2195_v27 = vsel %vm1479_vm6, %v2192_v43, %v2194_v49  ;;  %v2418_v25 = vld [vmem:[#allocation2 + $0x88] sm:$0xff]  ;;  %vm2150_vm6 = vcmask 1048084  }
 0x60b   : > { %2200 = vst [vmem:[#allocation2 + $0x58] ss:$-12 sps:$4 sm:$0xf3] %v2195_v27   ;;  %2469 = vmatprep.subr.mxu1 %v2418_v25  ;;  %v2205_v29 = vpop.permute.xlu1 %2204  ;;  %v2413_v31 = vld [vmem:[#allocation2 + $0x60] sm:$0xff] }
 0x60c   : > { %2212 = vst.msk [vmem:[#allocation2 + $0x50] sm:$0xfc] %vm2211_vm15, %v2205_v29  ;;  %2470 = vmatpush1.msra.mxu1 %v2417_v47  ;;  %v2415_v53 = vld [vmem:[#allocation2 + $0x70] sm:$0xff]  ;;  %vm3978_vm15 = vcmask 1045504  }
 0x60d   : > { %v2207_v57 = vpop.permute.xlu0 %2206 }
 0x60e   : > { %v2208_v48 = vsel %vm1499_vm9, %v2205_v29, %v2207_v57  ;;  %v2416_v54 = vld [vmem:[#allocation2 + $0x78] sm:$0xff]  ;;  %v2414_v62 = vld [vmem:[#allocation2 + $0x68] sm:$0xff]  ;;  %vm2165_vm9 = vcmask 1048074  }
 0x60f   : > { %2213 = vst [vmem:[#allocation2 + $0x58] sm:$0xfc] %v2208_v48  ;;  %2471 = vmatprep.subr.mxu1 %v2416_v54  ;;  %v2179_v50 = vpop.permute.xlu1 %2178 }
 0x610   : > { %2186 = vst.msk [vmem:[#allocation2 + $0x30] sm:$0xc0] %vm2185_vm3, %v2179_v50  ;;  %2472 = vmatpush1.msra.mxu1 %v2415_v53  ;;  %vm3979_vm3 = vmmov %vm3978_vm15 }
 0x611   : > { %2189 = vst.msk [vmem:[#allocation2 + $0x40] sm:$0xf] %vm2188_vm2, %v2179_v50  ;;  %v2181_v55 = vpop.permute.xlu0 %2180  ;;  %2473 = vmatprep.subr.mxu1 %v2414_v62 }
 0x612   : > { %v2182_v51 = vsel %vm1459_vm8, %v2179_v50, %v2181_v55  ;;  %2474 = vmatpush1.msra.mxu1 %v2413_v31  ;;  %vm3974_vm8 = vcmask 531456  }
 0x613   : > { %2187 = vst [vmem:[#allocation2 + $0x48] ss:$-12 sps:$4 sm:$0xcf] %v2182_v51   ;;  %v2144_v60 = vpop.permute.xlu1 %2143  ;;  %v2411_v4 = vld [vmem:[#allocation2 + $0x50] sm:$0xff] }
 0x614   : > { %2151 = vst.msk [vmem:[#allocation2 + $0x10] sm:$0xf0] %vm2150_vm6, %v2144_v60 }
 0x615   : > { %2154 = vst.msk [vmem:[#allocation2 + $0x20] sm:$0x3] %vm2153_vm13, %v2144_v60  ;;  %v2146_v61 = vpop.permute.xlu0 %2145 }
 0x616   : > { %v2147_v3 = vsel %vm3973_vm11, %v2144_v60, %v2146_v61  ;;  %v2412_v40 = vld [vmem:[#allocation2 + $0x58] sm:$0xff] }
 0x617   : > { %2152 = vst [vmem:[#allocation2 + $0x28] ss:$-12 sps:$4 sm:$0xf3] %v2147_v3   ;;  %2475 = vmatprep.subr.mxu1 %v2412_v40  ;;  %v2159_v2 = vpop.permute.xlu1 %2158  ;;  %v2407_v14 = vld [vmem:[#allocation2 + $0x30] sm:$0xff] }
 0x618   : > { %2166 = vst.msk [vmem:[#allocation2 + $0x20] sm:$0xfc] %vm2165_vm9, %v2159_v2  ;;  %2476 = vmatpush1.msra.mxu1 %v2411_v4  ;;  %v2409_v7 = vld [vmem:[#allocation2 + $0x40] sm:$0xff] }
 0x619   : > { %v2161_v8 = vpop.permute.xlu0 %2160 }
 0x61a   : > { %v2162_v11 = vsel %vm3974_vm8, %v2159_v2, %v2161_v8  ;;  %v2410_v46 = vld [vmem:[#allocation2 + $0x48] sm:$0xff]  ;;  %v2408_v13 = vld [vmem:[#allocation2 + $0x38] sm:$0xff] }
 0x61b   : > { %2167 = vst [vmem:[#allocation2 + $0x28] sm:$0xfc] %v2162_v11  ;;  %2477 = vmatprep.subr.mxu1 %v2410_v46  ;;  %v2129_v1 = vpop.permute.xlu1 %2128 }
 0x61c   : > { %2136 = vst.msk [vmem:[#allocation2] sm:$0xc0] %vm2135_vm4, %v2129_v1  ;;  %2478 = vmatpush1.msra.mxu1 %v2409_v7 }
 0x61d   : > { %2139 = vst.msk [vmem:[#allocation2 + $0x10] sm:$0xf] %vm2138_vm14, %v2129_v1  ;;  %v2131_v24 = vpop.permute.xlu0 %2130  ;;  %2479 = vmatprep.subr.mxu1 %v2408_v13 }
 0x61e   : > { %v2132_v17 = vsel %vm3975_vm5, %v2129_v1, %v2131_v24  ;;  %2480 = vmatpush1.msra.mxu1 %v2407_v14 }
 0x61f   : > { %2137 = vst [vmem:[#allocation2 + $0x18] ss:$-12 sps:$4 sm:$0xcf] %v2132_v17   ;;  %v2376_v59 = vpop.permute.xlu1 %2375  ;;  %v2405_v23 = vld [vmem:[#allocation2 + $0x20] sm:$0xff] }
 0x620   : > { %2383 = vst.msk [vmem:[#allocation2 + $0x100] sm:$0xf0] %vm2382_vm1, %v2376_v59 }
 0x621   : > { %2386 = vst.msk [vmem:[#allocation2 + $0x110] sm:$0x3] %vm2385_vm7, %v2376_v59  ;;  %v2378_v5 = vpop.permute.xlu0 %2377 }
 0x622   : > { %v2379_v18 = vsel %vm3976_vm10, %v2376_v59, %v2378_v5  ;;  %v2406_v20 = vld [vmem:[#allocation2 + $0x28] sm:$0xff] }
 0x623   : > { %2384 = vst [vmem:[#allocation2 + $0x118] ss:$-12 sps:$4 sm:$0xf3] %v2379_v18   ;;  %2481 = vmatprep.subr.mxu1 %v2406_v20  ;;  %v2389_v21 = vpop.permute.xlu1 %2388  ;;  %v2401_v26 = vld [vmem:[#allocation2] sm:$0xff] }
 0x624   : > { %2396 = vst.msk [vmem:[#allocation2 + $0x110] sm:$0xfc] %vm2395_vm0, %v2389_v21  ;;  %2482 = vmatpush1.msra.mxu1 %v2405_v23  ;;  %v2403_v16 = vld [vmem:[#allocation2 + $0x10] sm:$0xff] }
 0x625   : > { %v2391_v63 = vpop.permute.xlu0 %2390 }
 0x626   : > { %v2392_v9 = vsel %vm3977_vm12, %v2389_v21, %v2391_v63  ;;  %v2404_v10 = vld [vmem:[#allocation2 + $0x18] sm:$0xff]  ;;  %v2402_v6 = vld [vmem:[#allocation2 + $0x8] sm:$0xff] }
 0x627   : > { %2397 = vst [vmem:[#allocation2 + $0x118] sm:$0xfc] %v2392_v9  ;;  %2483 = vmatprep.subr.mxu1 %v2404_v10  ;;  %v2433_v37 = vld [vmem:[#allocation2 + $0x100] sm:$0xff] }
 0x628   : > { %2484 = vmatpush1.msra.mxu1 %v2403_v16 }
 0x629   : > { %2485 = vmatprep.subr.mxu1 %v2402_v6 }
 0x62a   : > { %2486 = vmatpush1.msra.mxu1 %v2401_v26  ;;  %v2434_v32 = vld [vmem:[#allocation2 + $0x108] sm:$0xff] }
 0x62b   : > { %2617 = vmatprep.subr.msk.mxu1 %vm3978_vm15, %v2438_v52  ;;  %v2435_v30 = vld [vmem:[#allocation2 + $0x110] sm:$0xff] }
 0x62c   : > { %2618 = vmatpush2.msk.msra.mxu1 %vm3979_vm3, %v2437_v28 }
 0x62e   : > { %v2436_v12 = vld [vmem:[#allocation2 + $0x118] sm:$0xff] }
 0x62f   : > { %2515 = vmatprep.subr.mxu1 %v2436_v12 }
 0x630   : > { %2516 = vmatpush2.msra.mxu1 %v2435_v30  ;;  %v2443_v33 = vpop.permute.xlu1 %2442 }
 0x631   : > { %2517 = vmatprep.subr.mxu1 %v2434_v32 }
 0x632   : > { %2518 = vmatpush2.msra.mxu1 %v2433_v37 }
 0x633   : > { %2520 = vmatmul.mubr.f32.vlgmr.msra.gmra.mxu1 %v3727_v22 }
 0x6f3   : > { %v2521_v15 = vpop.f32.mrf.mxu1 }
 0x6f4   : > { %v2522_v34 = vadd.f32 %v2521_v15, %v2443_v33 }
 0x6f5   : > { %v2523_v35 = vpop.f32.mrf.mxu1 }
 0x6f6   : > { %v2526_v41 = vmax.f32 %v2522_v34, 0.0  ;;  %v2524_v36 = vadd.f32 %v2523_v35, %v2443_v33 }
 0x6f8   : > { %v2528_v19 = vsub.f32 0.0, %v2526_v41  ;;  %v2527_v0 = vmax.f32 %v2524_v36, 0.0 }
 0x6fa   : > { %v2530_v56 = vmul.f32 1.442695, %v2528_v19  ;;  %v2529_v58 = vsub.f32 0.0, %v2527_v0 }
 0x6fc   : > { %2686 = vpow2.f32 %v2530_v56  ;;  %v2532_v38 = vmul.f32 1.442695, %v2529_v58 }
 0x6fe   : > { %2688 = vpow2.f32 %v2532_v38 }
 0x709   : > { %v2687_v39 = vpop.eup %2686 }
 0x70a   : > { %v2534_v45 = vadd.f32 1.0, %v2687_v39 }
 0x70b   : > { %v2689_v42 = vpop.eup %2688 }
 0x70c   : > { %v2535_v44 = vadd.f32 1.0, %v2689_v42  ;;  %2690 = vrcp.f32 %v2534_v45 }
 0x70e   : > { %2692 = vrcp.f32 %v2535_v44 }
 0x719   : > { %v2691_v22 = vpop.eup %2690 }
 0x71b   : > { %v2693_v43 = vpop.eup %2692 }
 0x71c   : > { %v2542_v49 = vcombine.low %v2691_v22, %v2693_v43 }
 0x71e   : > { %2544 = vst [vmem:[%s386_s15] sm:$0x77] %v2542_v49 }
 0x71f PF: > { %s21_s17 = sadd.s32 1, %s2700_s17  }
 0x720   : > { %p18_p4 = scmp.ge.s32.totalorder %s21_s17, 4  }
 0x722   :  { %20 = sbr.rel (!%p18_p4) target bundleno = 1 (0x1), region = 94 }

</bundles_post_ra>
